<compile_context>
chip_gen: v7x
topology: tpu7x:2x2x1
jax: 0.10.0
libtpu: 0.0.40
codegen_flags: <defaults>
</compile_context>

<pallas_src>
import jax
import jax.numpy as jnp
from jax.experimental import pallas as pl
from jax.experimental.pallas import tpu as pltpu

_NUM_CLASSES = 1000
_NUM_CLASSES_PAD = 1024   # lane-dense classifier width (multiple of 128)
_C_IN = 256
_C_MID = 1280


def _round_up(x, m):
    return ((x + m - 1) // m) * m


def _make_head_kernel(hw, tile_hw, b_fold, pad_rows):
    """All arguments are static Python ints."""
    inv_hw = 1.0 / float(hw)
    m_rows = b_fold * tile_hw

    def kernel(x_ref, wc_ref, bias_ref, pool_ref, wfc_ref, bfc_ref, out_ref, acc_ref):
        s = pl.program_id(1)

        @pl.when(s == 0)
        def _():
            acc_ref[...] = jnp.zeros_like(acc_ref)

        # 1x1 pointwise conv (BN scale pre-folded into wc) == channel matmul on the MXU.
        x = x_ref[...].reshape(m_rows, _C_IN)                              # (M, 256) bf16
        h = jnp.dot(x, wc_ref[...], preferred_element_type=jnp.float32)    # (M, 1280) f32
        # BN bias + SiLU in bf16 (packed VPU/EUP on v6e/v7x; still correct on v5e).
        h = h.astype(jnp.bfloat16) + bias_ref[...]
        h = h * jax.nn.sigmoid(h)                                          # (M, 1280) bf16

        # AdaptiveAvgPool2d(1): per-sample channel sums routed through the MXU via a
        # resident 0/1 pooling matrix; accumulated in f32 scratch.
        acc_ref[...] += jnp.dot(pool_ref[...], h, preferred_element_type=jnp.float32)

        @pl.when(s == pl.num_programs(1) - 1)
        def _():
            acc = acc_ref[...]
            if pad_rows:
                # Zero-padded activation rows contributed exactly silu(bias); undo once.
                b = bias_ref[...]
                acc = acc - float(pad_rows) * (b * jax.nn.sigmoid(b)).astype(jnp.float32)
            pooled = acc * inv_hw                                          # (B_tile, 1280) f32
            # Dropout(p=0.2) is identity at inference.
            # TODO(synk): dropout kept as eval-mode identity (no RNG mask).
            logits = jnp.dot(pooled.astype(jnp.bfloat16), wfc_ref[...],
                             preferred_element_type=jnp.float32) + bfc_ref[...]
            out_ref[...] = logits.reshape(out_ref.shape)

    return kernel


def efficientnet_conv1_forward(x_nchw, params, *, max_tile_rows=2048):
    """x_nchw: (N, 256, H, W) float32 -> (N, 1000) float32 logits."""
    N, C, H, W = x_nchw.shape
    assert C == _C_IN, "head of efficientnet_v2_s expects 256 input channels"
    hw = H * W

    # ---- static tiling decisions -------------------------------------------------
    n_spatial = -(-hw // max_tile_rows)                # spatial steps per sample
    tile_hw = _round_up(-(-hw // n_spatial), 8)        # rows per step (sublane aligned)
    hw_pad = n_spatial * tile_hw
    pad_rows = hw_pad - hw

    target_rows = 1024                                 # aim ~1024 MXU rows per grid step
    b_fold = max(1, min(N, target_rows // tile_hw))    # samples folded into one step
    n_batch_tiles = -(-N // b_fold)
    if N > 1 and n_batch_tiles < 2:                    # keep >=2 parallel blocks (v7x megacore)
        b_fold = -(-N // 2)
        n_batch_tiles = -(-N // b_fold)
    n_pad = n_batch_tiles * b_fold
    m_rows = b_fold * tile_hw

    # ---- layout: cast to bf16 FIRST, then NCHW -> (N, HW, C), channels on lanes ----
    x = jnp.transpose(x_nchw.astype(jnp.bfloat16), (0, 2, 3, 1)).reshape(N, hw, C)
    if n_pad != N or hw_pad != hw:
        x = jnp.pad(x, ((0, n_pad - N), (0, hw_pad - hw), (0, 0)))

    # ---- fold inference BatchNorm (eps=1e-3) into the conv weight (f32, then bf16) --
    eps = 1e-3
    scale = params["bn_gamma"] / jnp.sqrt(params["bn_var"] + eps)
    bias = params["bn_beta"] - params["bn_mean"] * scale
    wc = (params["conv_w"] * scale[None, :]).astype(jnp.bfloat16)            # (256, 1280)
    bias_bf = bias.reshape(1, _C_MID).astype(jnp.bfloat16)                   # (1, 1280)

    pad_cls = _NUM_CLASSES_PAD - _NUM_CLASSES
    wfc = jnp.pad(params["fc_w"], ((0, 0), (0, pad_cls))).astype(jnp.bfloat16)   # (1280, 1024)
    bfc = jnp.pad(params["fc_b"], (0, pad_cls)).reshape(1, -1).astype(jnp.float32)  # (1, 1024)

    # 0/1 pooling matrix: row b selects sample b's tile_hw rows inside a folded step.
    sample_of_row = jnp.arange(m_rows, dtype=jnp.int32) // tile_hw
    pool = (sample_of_row[None, :] ==
            jnp.arange(b_fold, dtype=jnp.int32)[:, None]).astype(jnp.bfloat16)   # (B_tile, M)

    kernel = _make_head_kernel(hw, tile_hw, b_fold, pad_rows)

    out = pl.pallas_call(
        kernel,
        out_shape=jax.ShapeDtypeStruct((n_batch_tiles, b_fold, _NUM_CLASSES_PAD), jnp.float32),
        grid_spec=pltpu.PrefetchScalarGridSpec(
            num_scalar_prefetch=0,
            grid=(n_batch_tiles, n_spatial),
            in_specs=[
                pl.BlockSpec((b_fold, tile_hw, _C_IN), lambda b, s: (b, s, 0)),
                # Constant index maps keep weights / BN bias / pooling matrix VMEM-resident.
                pl.BlockSpec((_C_IN, _C_MID), lambda b, s: (0, 0)),
                pl.BlockSpec((1, _C_MID), lambda b, s: (0, 0)),
                pl.BlockSpec((b_fold, m_rows), lambda b, s: (0, 0)),
                pl.BlockSpec((_C_MID, _NUM_CLASSES_PAD), lambda b, s: (0, 0)),
                pl.BlockSpec((1, _NUM_CLASSES_PAD), lambda b, s: (0, 0)),
            ],
            out_specs=pl.BlockSpec((1, b_fold, _NUM_CLASSES_PAD), lambda b, s: (b, 0, 0)),
            scratch_shapes=[pltpu.VMEM((b_fold, _C_MID), jnp.float32)],
        ),
        compiler_params=pltpu.CompilerParams(
            dimension_semantics=("parallel", "arbitrary"),
            vmem_limit_bytes=48 << 20,   # headroom under v7x's 64 MiB physical VMEM
        ),
    )(x, wc, bias_bf, pool, wfc, bfc)

    return out.reshape(n_pad, _NUM_CLASSES_PAD)[:N, :_NUM_CLASSES]


def _reference(x_nchw, params):
    """Pure-JAX f32 reference of the same head, for a sanity check."""
    eps = 1e-3
    scale = params["bn_gamma"] / jnp.sqrt(params["bn_var"] + eps)
    bias = params["bn_beta"] - params["bn_mean"] * scale
    x = jnp.transpose(x_nchw, (0, 2, 3, 1))                          # (N, H, W, 256)
    h = jnp.einsum("nhwc,cd->nhwd", x, params["conv_w"],
                   precision=jax.lax.Precision.HIGHEST)
    h = h * scale + bias
    h = h * jax.nn.sigmoid(h)
    pooled = jnp.mean(h, axis=(1, 2))                                # (N, 1280)
    return jnp.dot(pooled, params["fc_w"],
                   precision=jax.lax.Precision.HIGHEST) + params["fc_b"]


def init_params(key):
    """Deterministic synthetic parameters matching the PyTorch module's shapes."""
    k1, k2, k3, k4, k5, k6, k7 = jax.random.split(key, 7)
    # Conv2d(256, 1280, kernel_size=1, bias=False): weight (1280, 256, 1, 1).
    conv_w_oihw = jax.random.normal(k1, (1280, 256, 1, 1), jnp.float32) * 0.02
    conv_w = jnp.transpose(conv_w_oihw[:, :, 0, 0], (1, 0))          # (256, 1280)
    # BatchNorm2d(1280) running stats + affine params.
    bn_gamma = 1.0 + 0.1 * jax.random.normal(k2, (1280,), jnp.float32)
    bn_beta = 0.1 * jax.random.normal(k3, (1280,), jnp.float32)
    bn_mean = 0.1 * jax.random.normal(k4, (1280,), jnp.float32)
    bn_var = 1.0 + 0.1 * jnp.abs(jax.random.normal(k5, (1280,), jnp.float32))
    # Linear(1280, 1000): PyTorch weight is (1000, 1280); store transposed.
    fc_w = jnp.transpose(jax.random.normal(k6, (1000, 1280), jnp.float32) * 0.02, (1, 0))
    fc_b = 0.01 * jax.random.normal(k7, (1000,), jnp.float32)
    return {
        "conv_w": conv_w,
        "bn_gamma": bn_gamma,
        "bn_beta": bn_beta,
        "bn_mean": bn_mean,
        "bn_var": bn_var,
        "fc_w": fc_w,
        "fc_b": fc_b,
    }


if __name__ == "__main__":
    key = jax.random.PRNGKey(0)
    kx, kp = jax.random.split(key)
    params = init_params(kp)

    fwd = jax.jit(efficientnet_conv1_forward, static_argnames="max_tile_rows")

    # Small test cases covering: batch-folded single spatial step, padded spatial rows
    # (silu(bias) correction path), and multi-step spatial accumulation.
    cases = [
        ((2, 256, 8, 8), {}),
        ((2, 256, 5, 5), {}),
        ((2, 256, 8, 8), {"max_tile_rows": 16}),
    ]
    for i, (shape, kw) in enumerate(cases):
        x = jax.random.normal(jax.random.fold_in(kx, i), shape, jnp.float32)
        out = fwd(x, params, **kw)
        jax.block_until_ready(out)
        assert out.shape == (shape[0], 1000) and out.dtype == jnp.float32

        ref = _reference(x, params)
        max_err = float(jnp.max(jnp.abs(out - ref)))
        assert jnp.isfinite(out).all() and max_err < 5e-2, f"case {i}: max abs err {max_err}"

    print("KERNEL_OK")
</pallas_src>

<mosaic_0001>
module attributes {stable_mosaic.version = 11 : i64} {
  func.func @kernel(%arg0: i32, %arg1: i32, %arg2: memref<1x64x256xbf16, #tpu.memory_space<vmem>>, %arg3: memref<256x1280xbf16, #tpu.memory_space<vmem>>, %arg4: memref<1x1280xbf16, #tpu.memory_space<vmem>>, %arg5: memref<1x64xbf16, #tpu.memory_space<vmem>>, %arg6: memref<1280x1024xbf16, #tpu.memory_space<vmem>>, %arg7: memref<1x1024xf32, #tpu.memory_space<vmem>>, %arg8: memref<1x1x1024xf32, #tpu.memory_space<vmem>>, %arg9: memref<1x1280xf32, #tpu.memory_space<vmem>>) attributes {dimension_semantics = [#tpu.dimension_semantics<parallel>, #tpu.dimension_semantics<arbitrary>], iteration_bounds = array<i64: 2, 1>, scalar_prefetch = 0 : i64, scratch_operands = 1 : i64, tpu.core_type = #tpu.core_type<tc>, window_params = [{transform_indices = @transform_0, window_bounds = array<i64: 1, 64, 256>}, {pipeline_mode = #tpu.pipeline_mode<synchronous>, transform_indices = @transform_1, window_bounds = array<i64: 256, 1280>}, {pipeline_mode = #tpu.pipeline_mode<synchronous>, transform_indices = @transform_2, window_bounds = array<i64: 1, 1280>}, {pipeline_mode = #tpu.pipeline_mode<synchronous>, transform_indices = @transform_3, window_bounds = array<i64: 1, 64>}, {pipeline_mode = #tpu.pipeline_mode<synchronous>, transform_indices = @transform_4, window_bounds = array<i64: 1280, 1024>}, {pipeline_mode = #tpu.pipeline_mode<synchronous>, transform_indices = @transform_5, window_bounds = array<i64: 1, 1024>}, {transform_indices = @transform_6, window_bounds = array<i64: 1, 1, 1024>}]} {
    %c0_i32 = arith.constant 0 : i32
    %0 = arith.cmpi eq, %arg1, %c0_i32 : i32
    %1 = arith.extui %0 : i1 to i32
    %c0_i32_0 = arith.constant 0 : i32
    %2 = arith.cmpi ne, %1, %c0_i32_0 : i32
    scf.if %2 {
      %cst_17 = arith.constant 0.000000e+00 : f32
      %25 = vector.broadcast %cst_17 : f32 to vector<1x1280xf32>
      %c0_18 = arith.constant 0 : index
      %c0_19 = arith.constant 0 : index
      %26 = vector.load %arg9[%c0_18, %c0_19] : memref<1x1280xf32, #tpu.memory_space<vmem>>, vector<1x1280xf32>
      tpu.vector_store %arg9[%c0_18, %c0_19], %25 {strides = array<i32>} : memref<1x1280xf32, #tpu.memory_space<vmem>>, vector<1x1280xf32>,
    } else {
    }
    %c0 = arith.constant 0 : index
    %c0_1 = arith.constant 0 : index
    %c0_2 = arith.constant 0 : index
    %3 = vector.load %arg2[%c0, %c0_1, %c0_2] : memref<1x64x256xbf16, #tpu.memory_space<vmem>>, vector<1x64x256xbf16>
    %4 = vector.shape_cast %3 : vector<1x64x256xbf16> to vector<64x256xbf16>
    %c0_3 = arith.constant 0 : index
    %c0_4 = arith.constant 0 : index
    %5 = vector.load %arg3[%c0_3, %c0_4] : memref<256x1280xbf16, #tpu.memory_space<vmem>>, vector<256x1280xbf16>
    %cst = arith.constant dense<0.000000e+00> : vector<64x1280xf32>
    %6 = tpu.matmul %4, %5, %cst {dimension_numbers = #tpu.dot_dimension_numbers<[1], [0], [0], [1], [0, 0, 1, 1], [], []>} : vector<64x256xbf16>, vector<256x1280xbf16>, vector<64x1280xf32> -> vector<64x1280xf32>
    %7 = arith.truncf %6 : vector<64x1280xf32> to vector<64x1280xbf16>
    %c0_5 = arith.constant 0 : index
    %c0_6 = arith.constant 0 : index
    %8 = vector.load %arg4[%c0_5, %c0_6] : memref<1x1280xbf16, #tpu.memory_space<vmem>>, vector<1x1280xbf16>
    %9 = vector.broadcast %8 : vector<1x1280xbf16> to vector<64x1280xbf16>
    %10 = arith.addf %7, %9 : vector<64x1280xbf16>
    %11 = arith.negf %10 : vector<64x1280xbf16>
    %12 = math.exp %11 : vector<64x1280xbf16>
    %cst_7 = arith.constant 1.000000e+00 : bf16
    %13 = vector.broadcast %cst_7 : bf16 to vector<64x1280xbf16>
    %14 = arith.addf %13, %12 : vector<64x1280xbf16>
    %15 = arith.divf %13, %14 : vector<64x1280xbf16>
    %16 = arith.mulf %10, %15 : vector<64x1280xbf16>
    %c0_8 = arith.constant 0 : index
    %c0_9 = arith.constant 0 : index
    %17 = vector.load %arg9[%c0_8, %c0_9] : memref<1x1280xf32, #tpu.memory_space<vmem>>, vector<1x1280xf32>
    %c0_10 = arith.constant 0 : index
    %c0_11 = arith.constant 0 : index
    %18 = vector.load %arg5[%c0_10, %c0_11] : memref<1x64xbf16, #tpu.memory_space<vmem>>, vector<1x64xbf16>
    %cst_12 = arith.constant dense<0.000000e+00> : vector<1x1280xf32>
    %19 = tpu.matmul %18, %16, %cst_12 {dimension_numbers = #tpu.dot_dimension_numbers<[1], [0], [0], [1], [0, 0, 1, 1], [], []>} : vector<1x64xbf16>, vector<64x1280xbf16>, vector<1x1280xf32> -> vector<1x1280xf32>
    %20 = arith.addf %17, %19 : vector<1x1280xf32>
    %c0_13 = arith.constant 0 : index
    %c0_14 = arith.constant 0 : index
    %21 = vector.load %arg9[%c0_13, %c0_14] : memref<1x1280xf32, #tpu.memory_space<vmem>>, vector<1x1280xf32>
    tpu.vector_store %arg9[%c0_13, %c0_14], %20 {strides = array<i32>} : memref<1x1280xf32, #tpu.memory_space<vmem>>, vector<1x1280xf32>,
    %c0_i32_15 = arith.constant 0 : i32
    %22 = arith.cmpi eq, %arg1, %c0_i32_15 : i32
    %23 = arith.extui %22 : i1 to i32
    %c0_i32_16 = arith.constant 0 : i32
    %24 = arith.cmpi ne, %23, %c0_i32_16 : i32
    scf.if %24 {
      %c0_17 = arith.constant 0 : index
      %c0_18 = arith.constant 0 : index
      %25 = vector.load %arg9[%c0_17, %c0_18] : memref<1x1280xf32, #tpu.memory_space<vmem>>, vector<1x1280xf32>
      %cst_19 = arith.constant 1.562500e-02 : f32
      %26 = vector.broadcast %cst_19 : f32 to vector<1x1280xf32>
      %27 = arith.mulf %25, %26 : vector<1x1280xf32>
      %28 = arith.truncf %27 : vector<1x1280xf32> to vector<1x1280xbf16>
      %c0_20 = arith.constant 0 : index
      %c0_21 = arith.constant 0 : index
      %29 = vector.load %arg6[%c0_20, %c0_21] : memref<1280x1024xbf16, #tpu.memory_space<vmem>>, vector<1280x1024xbf16>
      %cst_22 = arith.constant dense<0.000000e+00> : vector<1x1024xf32>
      %30 = tpu.matmul %28, %29, %cst_22 {dimension_numbers = #tpu.dot_dimension_numbers<[1], [0], [0], [1], [0, 0, 1, 1], [], []>} : vector<1x1280xbf16>, vector<1280x1024xbf16>, vector<1x1024xf32> -> vector<1x1024xf32>
      %c0_23 = arith.constant 0 : index
      %c0_24 = arith.constant 0 : index
      %31 = vector.load %arg7[%c0_23, %c0_24] : memref<1x1024xf32, #tpu.memory_space<vmem>>, vector<1x1024xf32>
      %32 = arith.addf %30, %31 : vector<1x1024xf32>
      %33 = vector.shape_cast %32 : vector<1x1024xf32> to vector<1x1x1024xf32>
      %c0_25 = arith.constant 0 : index
      %c0_26 = arith.constant 0 : index
      %c0_27 = arith.constant 0 : index
      %34 = vector.load %arg8[%c0_25, %c0_26, %c0_27] : memref<1x1x1024xf32, #tpu.memory_space<vmem>>, vector<1x1x1024xf32>
      tpu.vector_store %arg8[%c0_25, %c0_26, %c0_27], %33 {strides = array<i32>} : memref<1x1x1024xf32, #tpu.memory_space<vmem>>, vector<1x1x1024xf32>,
    } else {
    }
    return
  }
  func.func @transform_0(%arg0: i32, %arg1: i32) -> (i32, i32, i32) {
    %c0_i32 = arith.constant 0 : i32
    %c0_i32_0 = arith.constant 0 : i32
    return %arg0, %arg1, %c0_i32 : i32, i32, i32
  }
  func.func @transform_1(%arg0: i32, %arg1: i32) -> (i32, i32) {
    %c0_i32 = arith.constant 0 : i32
    %c0_i32_0 = arith.constant 0 : i32
    %c0_i32_1 = arith.constant 0 : i32
    return %c0_i32, %c0_i32_0 : i32, i32
  }
  func.func @transform_2(%arg0: i32, %arg1: i32) -> (i32, i32) {
    %c0_i32 = arith.constant 0 : i32
    %c0_i32_0 = arith.constant 0 : i32
    %c0_i32_1 = arith.constant 0 : i32
    return %c0_i32, %c0_i32_0 : i32, i32
  }
  func.func @transform_3(%arg0: i32, %arg1: i32) -> (i32, i32) {
    %c0_i32 = arith.constant 0 : i32
    %c0_i32_0 = arith.constant 0 : i32
    %c0_i32_1 = arith.constant 0 : i32
    return %c0_i32, %c0_i32_0 : i32, i32
  }
  func.func @transform_4(%arg0: i32, %arg1: i32) -> (i32, i32) {
    %c0_i32 = arith.constant 0 : i32
    %c0_i32_0 = arith.constant 0 : i32
    %c0_i32_1 = arith.constant 0 : i32
    return %c0_i32, %c0_i32_0 : i32, i32
  }
  func.func @transform_5(%arg0: i32, %arg1: i32) -> (i32, i32) {
    %c0_i32 = arith.constant 0 : i32
    %c0_i32_0 = arith.constant 0 : i32
    %c0_i32_1 = arith.constant 0 : i32
    return %c0_i32, %c0_i32_0 : i32, i32
  }
  func.func @transform_6(%arg0: i32, %arg1: i32) -> (i32, i32, i32) {
    %c0_i32 = arith.constant 0 : i32
    %c0_i32_0 = arith.constant 0 : i32
    %c0_i32_1 = arith.constant 0 : i32
    return %arg0, %c0_i32, %c0_i32_0 : i32, i32, i32
  }
}

</mosaic_0001>

<bundles_post_ra>
// kernel: efficientnet_conv1_forward.1
= control target key start
LH: loop header
LB: loop body
LE: loop exit
PB: predicated region body
PF: predicated region fallthrough
CT: control target
= control target key end

     0   :  { %s8846_s21 = smov 0   ;;  %s8848_s22 = smov 0   ;;  %s11835_s0 = inlined_call_operand.vmem [shape: bf16[2,64,256], index: 0, kind: input, shape index: {}]   ;;  %s11836_s1 = inlined_call_operand.vmem [shape: bf16[256,1280], index: 1, kind: input, shape index: {}]   ;;  %s11837_s2 = inlined_call_operand.vmem [shape: bf16[1,1280], index: 2, kind: input, shape index: {}]   ;;  %s11838_s3 = inlined_call_operand.vmem [shape: bf16[1,64], index: 3, kind: input, shape index: {}]   ;;  %s11839_s4 = inlined_call_operand.vmem [shape: bf16[1280,1024], index: 4, kind: input, shape index: {}]   ;;  %s11840_s5 = inlined_call_operand.vmem [shape: f32[1,1024], index: 5, kind: input, shape index: {}]   ;;  %s11841_s6 = inlined_call_operand.vmem [shape: f32[2,1,1024], index: 6, kind: output, shape index: {}]  }
   0x1   :  { %s8850_s23 = smov 0  }
   0x2 LB: > { %s28_s24 = sadd.s32 1, %s8802_s22  ;;  %p7411_p0 = scmp.ge.s32.totalorder %s8806_s23, 1  ;;  %s8806_s23 = sphi %s8850_s23, %s16_s23   ;;  %s8802_s22 = sphi %s8848_s22, %s11845_s22   ;;  %s8798_s21 = sphi %s8846_s21, %s11844_s21  }
   0x3   : > { %p30_p1 = scmp.ge.s32.totalorder %s28_s24, 2  ;;  %p232_p2 = scmp.lt.s32.totalorder %s8806_s23, 3 }
   0x5   : > { %s11847_s24 = smov (%p30_p1, %s28_s24), 0  ;;  %p233_p3 = pnand %p7411_p0, %p232_p2 }
   0x6   : > { %v8371_v0 = vld [vmem:[%s11836_s1 + $0x4] ss:$40 sps:$4 sm:$0xff] (!%p233_p3)   ;;  %v8375_v2 = vld [vmem:[%s11836_s1] ss:$40 sps:$4 sm:$0xff] (!%p233_p3)   ;;  %v8377_v4 = vld [vmem:[%s11836_s1 + $0x54] ss:$40 sps:$4 sm:$0xff] (!%p233_p3)  }
   0x7   : > { %236 = sbr.rel (%p233_p3) target bundleno = 1465 (0x5b9), region = 44  ;;  %v8373_v1 = vld [vmem:[%s11836_s1 + $0xc] ss:$40 sps:$4 sm:$0xff] (!%p233_p3)   ;;  %1301 = vmatprep.subr.bf16.mxu0 (!%p233_p3), %v8371_v0  ;;  %v8376_v3 = vld [vmem:[%s11836_s1 + $0x8] ss:$40 sps:$4 sm:$0xff] (!%p233_p3)   ;;  %p267_p4 = scmp.lt.s32.totalorder (!%p233_p3), %s8798_s21, 1 }
   0x8   : > { %1374 = vmatprep.subr.bf16.mxu1 (!%p233_p3), %v8373_v1  ;;  %1302 = vmatpush1.bf16.msra.mxu0 (!%p233_p3), %v8375_v2  ;;  %v8379_v5 = vld [vmem:[%s11836_s1 + $0x5c] ss:$40 sps:$4 sm:$0xff] (!%p233_p3)   ;;  %v8381_v6 = vld [vmem:[%s11836_s1 + $0x50] ss:$40 sps:$4 sm:$0xff] (!%p233_p3)   ;;  %v8385_v9 = vld [vmem:[%s11836_s1 + $0xac] ss:$40 sps:$4 sm:$0xff] (!%p233_p3)  }
   0x9   : > { %1375 = vmatpush1.bf16.msra.mxu1 (!%p233_p3), %v8376_v3  ;;  %1303 = vmatprep.subr.bf16.mxu0 (!%p233_p3), %v8377_v4  ;;  %v8382_v7 = vld [vmem:[%s11836_s1 + $0x58] ss:$40 sps:$4 sm:$0xff] (!%p233_p3)   ;;  %v8383_v8 = vld [vmem:[%s11836_s1 + $0xa4] ss:$40 sps:$4 sm:$0xff] (!%p233_p3)   ;;  %v8388_v11 = vld [vmem:[%s11836_s1 + $0xa8] ss:$40 sps:$4 sm:$0xff] (!%p233_p3)  }
   0xa   : > { %1376 = vmatprep.subr.bf16.mxu1 (!%p233_p3), %v8379_v5  ;;  %v8387_v10 = vld [vmem:[%s11836_s1 + $0xa0] ss:$40 sps:$4 sm:$0xff] (!%p233_p3)   ;;  %v8389_v12 = vld [vmem:[%s11836_s1 + $0xf4] ss:$40 sps:$4 sm:$0xff] (!%p233_p3)   ;;  %v8393_v14 = vld [vmem:[%s11836_s1 + $0xf0] ss:$40 sps:$4 sm:$0xff] (!%p233_p3)  }
   0xb   : > { %v8391_v13 = vld [vmem:[%s11836_s1 + $0xfc] ss:$40 sps:$4 sm:$0xff] (!%p233_p3)   ;;  %v8394_v15 = vld [vmem:[%s11836_s1 + $0xf8] ss:$40 sps:$4 sm:$0xff] (!%p233_p3)   ;;  %v8397_v17 = vld [vmem:[%s11836_s1 + $0x14c] ss:$40 sps:$4 sm:$0xff] (!%p233_p3)  }
   0xc   : > { %1304 = vmatpush1.bf16.msra.mxu0 (!%p233_p3), %v8381_v6  ;;  %v8395_v16 = vld [vmem:[%s11836_s1 + $0x144] ss:$40 sps:$4 sm:$0xff] (!%p233_p3)   ;;  %v8399_v18 = vld [vmem:[%s11836_s1 + $0x140] ss:$40 sps:$4 sm:$0xff] (!%p233_p3)   ;;  %v8401_v20 = vld [vmem:[%s11836_s1 + $0x194] ss:$40 sps:$4 sm:$0xff] (!%p233_p3)  }
   0xd   : > { %1377 = vmatpush1.bf16.msra.mxu1 (!%p233_p3), %v8382_v7  ;;  %1305 = vmatprep.subr.bf16.mxu0 (!%p233_p3), %v8383_v8  ;;  %v8400_v19 = vld [vmem:[%s11836_s1 + $0x148] ss:$40 sps:$4 sm:$0xff] (!%p233_p3)   ;;  %v8403_v21 = vld [vmem:[%s11836_s1 + $0x19c] ss:$40 sps:$4 sm:$0xff] (!%p233_p3)   ;;  %v8406_v23 = vld [vmem:[%s11836_s1 + $0x198] ss:$40 sps:$4 sm:$0xff] (!%p233_p3)  }
   0xe   : > { %1378 = vmatprep.subr.bf16.mxu1 %v8385_v9  ;;  %v8405_v22 = vld [vmem:[%s11836_s1 + $0x190] ss:$40 sps:$4 sm:$0xff]   ;;  %v8407_v24 = vld [vmem:[%s11836_s1 + $0x1e4] ss:$40 sps:$4 sm:$0xff]   ;;  %v8411_v26 = vld [vmem:[%s11836_s1 + $0x1e0] ss:$40 sps:$4 sm:$0xff]  }
   0xf   : > { %v8409_v25 = vld [vmem:[%s11836_s1 + $0x1ec] ss:$40 sps:$4 sm:$0xff]   ;;  %v8412_v27 = vld [vmem:[%s11836_s1 + $0x1e8] ss:$40 sps:$4 sm:$0xff]   ;;  %v8415_v29 = vld [vmem:[%s11836_s1 + $0x23c] ss:$40 sps:$4 sm:$0xff]  }
  0x10   : > { %1306 = vmatpush1.bf16.msra.mxu0 %v8387_v10  ;;  %v8413_v28 = vld [vmem:[%s11836_s1 + $0x234] ss:$40 sps:$4 sm:$0xff]   ;;  %v8417_v30 = vld [vmem:[%s11836_s1 + $0x230] ss:$40 sps:$4 sm:$0xff]   ;;  %v8419_v32 = vld [vmem:[%s11836_s1 + $0x284] ss:$40 sps:$4 sm:$0xff]  }
  0x11   : > { %1379 = vmatpush1.bf16.msra.mxu1 %v8388_v11  ;;  %1307 = vmatprep.subr.bf16.mxu0 %v8389_v12  ;;  %v8418_v31 = vld [vmem:[%s11836_s1 + $0x238] ss:$40 sps:$4 sm:$0xff]   ;;  %v8421_v33 = vld [vmem:[%s11836_s1 + $0x28c] ss:$40 sps:$4 sm:$0xff]   ;;  %v8424_v35 = vld [vmem:[%s11836_s1 + $0x288] ss:$40 sps:$4 sm:$0xff]  }
  0x12   : > { %1380 = vmatprep.subr.bf16.mxu1 %v8391_v13  ;;  %v8423_v34 = vld [vmem:[%s11836_s1 + $0x280] ss:$40 sps:$4 sm:$0xff]   ;;  %v8425_v36 = vld [vmem:[%s11836_s1 + $0x2d4] ss:$40 sps:$4 sm:$0xff]   ;;  %s11849_s21 = smov (!%p267_p4, %s8798_s21), 1  ;;  %vm2214_vm0 = vcmask 523264  }
  0x13   : > { %v8427_v37 = vld [vmem:[%s11836_s1 + $0x2dc] ss:$40 sps:$4 sm:$0xff]   ;;  %v8429_v38 = vld [vmem:[%s11836_s1 + $0x2d0] ss:$40 sps:$4 sm:$0xff]   ;;  %v8433_v41 = vld [vmem:[%s11836_s1 + $0x32c] ss:$40 sps:$4 sm:$0xff]  }
  0x14   : > { %1308 = vmatpush1.bf16.msra.mxu0 %v8393_v14  ;;  %v8430_v39 = vld [vmem:[%s11836_s1 + $0x2d8] ss:$40 sps:$4 sm:$0xff]   ;;  %v8431_v40 = vld [vmem:[%s11836_s1 + $0x324] ss:$40 sps:$4 sm:$0xff]   ;;  %s8271_s29 = sshll.u32 %s11849_s21, 6  ;;  %s7414_s17 = sshll.u32 %s11849_s21, 3 }
  0x15   : > { %1381 = vmatpush1.bf16.msra.mxu1 %v8394_v15  ;;  %1309 = vmatprep.subr.bf16.mxu0 %v8395_v16  ;;  %v8435_v42 = vld [vmem:[%s11836_s1 + $0x320] ss:$40 sps:$4 sm:$0xff]   ;;  %v8437_v44 = vld [vmem:[%s11836_s1 + $0x374] ss:$40 sps:$4 sm:$0xff]   ;;  %s9009_s14 = scalar_lea.vmem %s11835_s0, %s8271_s29  ;;  %v8441_v46 = vld [vmem:[%s11836_s1 + $0x370] ss:$40 sps:$4 sm:$0xff]   ;;  %s280_s20 = scalar_lea.vmem %s11841_s6, %s7414_s17 }
  0x16   : > { %1382 = vmatprep.subr.bf16.mxu1 %v8397_v17  ;;  %v8436_v43 = vld [vmem:[%s11836_s1 + $0x328] ss:$40 sps:$4 sm:$0xff]   ;;  %v8439_v45 = vld [vmem:[%s11836_s1 + $0x37c] ss:$40 sps:$4 sm:$0xff]   ;;  %v8442_v47 = vld [vmem:[%s11836_s1 + $0x378] ss:$40 sps:$4 sm:$0xff]  }
  0x17   : > { %v9021_v48 = vld [vmem:[%s9009_s14 + $0x4] ss:$8 sps:$4 sm:$0xff]   ;;  %v8447_v51 = vld [vmem:[%s11836_s1 + $0x3c0] ss:$40 sps:$4 sm:$0xff]   ;;  %v8449_v53 = vld [vmem:[%s11836_s1 + $0x414] ss:$40 sps:$4 sm:$0xff]  }
  0x18   : > { %1310 = vmatpush1.bf16.msra.mxu0 %v8399_v18  ;;  %v8443_v49 = vld [vmem:[%s11836_s1 + $0x3c4] ss:$40 sps:$4 sm:$0xff]   ;;  %1333 = vmatprep.mubr.bf16.mxu0 %v9021_v48  ;;  %v8448_v52 = vld [vmem:[%s11836_s1 + $0x3c8] ss:$40 sps:$4 sm:$0xff]   ;;  %v8454_v56 = vld [vmem:[%s11836_s1 + $0x418] ss:$40 sps:$4 sm:$0xff]  }
  0x19   : > { %1383 = vmatpush1.bf16.msra.mxu1 %v8400_v19  ;;  %1311 = vmatprep.subr.bf16.mxu0 %v8401_v20  ;;  %v8445_v50 = vld [vmem:[%s11836_s1 + $0x3cc] ss:$40 sps:$4 sm:$0xff]   ;;  %v8451_v54 = vld [vmem:[%s11836_s1 + $0x41c] ss:$40 sps:$4 sm:$0xff]   ;;  %v8453_v55 = vld [vmem:[%s11836_s1 + $0x410] ss:$40 sps:$4 sm:$0xff]  }
  0x1a   : > { %1384 = vmatprep.subr.bf16.mxu1 %v8403_v21  ;;  %1406 = vmatprep.mubr.bf16.mxu1 %v9021_v48  ;;  %v8455_v57 = vld [vmem:[%s11836_s1 + $0x464] ss:$40 sps:$4 sm:$0xff]   ;;  %v8459_v59 = vld [vmem:[%s11836_s1 + $0x460] ss:$40 sps:$4 sm:$0xff]   ;;  %v8461_v61 = vld [vmem:[%s11836_s1 + $0x4b4] ss:$40 sps:$4 sm:$0xff]  }
  0x1b   : > { %v8457_v58 = vld [vmem:[%s11836_s1 + $0x46c] ss:$40 sps:$4 sm:$0xff]   ;;  %v8460_v60 = vld [vmem:[%s11836_s1 + $0x468] ss:$40 sps:$4 sm:$0xff]   ;;  %v8463_v62 = vld [vmem:[%s11836_s1 + $0x4bc] ss:$40 sps:$4 sm:$0xff]  }
  0x1c   : > { %1312 = vmatpush1.bf16.msra.mxu0 %v8405_v22  ;;  %v8465_v63 = vld [vmem:[%s11836_s1 + $0x4b0] ss:$40 sps:$4 sm:$0xff]   ;;  %v8472_v1 = vld [vmem:[%s11836_s1 + $0x14] ss:$40 sps:$4 sm:$0xff]   ;;  %v9080_v3 = vld [vmem:[%s9009_s14] ss:$8 sps:$4 sm:$0xff]  }
  0x1d   : > { %1385 = vmatpush1.bf16.msra.mxu1 %v8406_v23  ;;  %1313 = vmatprep.subr.bf16.mxu0 %v8407_v24  ;;  %v8466_v0 = vld [vmem:[%s11836_s1 + $0x4b8] ss:$40 sps:$4 sm:$0xff]   ;;  %v8475_v2 = vld [vmem:[%s11836_s1 + $0x1c] ss:$40 sps:$4 sm:$0xff]   ;;  %v8481_v7 = vld [vmem:[%s11836_s1 + $0x6c] ss:$40 sps:$4 sm:$0xff]  }
  0x1e   : > { %1386 = vmatprep.subr.bf16.mxu1 %v8409_v25  ;;  %v8470_v4 = vld [vmem:[%s11836_s1 + $0x10] ss:$40 sps:$4 sm:$0xff]   ;;  %v8478_v6 = vld [vmem:[%s11836_s1 + $0x64] ss:$40 sps:$4 sm:$0xff]   ;;  %v9095_v8 = vld [vmem:[%s9009_s14 + $0x14] ss:$8 sps:$4 sm:$0xff]  }
  0x1f   : > { %v8473_v5 = vld [vmem:[%s11836_s1 + $0x18] ss:$40 sps:$4 sm:$0xff]   ;;  %v8479_v10 = vld [vmem:[%s11836_s1 + $0x68] ss:$40 sps:$4 sm:$0xff]   ;;  %v8487_v11 = vld [vmem:[%s11836_s1 + $0xb4] ss:$40 sps:$4 sm:$0xff]  }
  0x20   : > { %1314 = vmatpush1.bf16.msra.mxu0 %v8411_v26  ;;  %v8476_v9 = vld [vmem:[%s11836_s1 + $0x60] ss:$40 sps:$4 sm:$0xff]   ;;  %v8490_v12 = vld [vmem:[%s11836_s1 + $0xbc] ss:$40 sps:$4 sm:$0xff]   ;;  %v9113_v13 = vld [vmem:[%s9009_s14 + $0x10] ss:$8 sps:$4 sm:$0xff]  }
  0x21   : > { %1387 = vmatpush1.bf16.msra.mxu1 %v8412_v27  ;;  %1315 = vmatprep.subr.bf16.mxu0 %v8413_v28  ;;  %v8485_v14 = vld [vmem:[%s11836_s1 + $0xb0] ss:$40 sps:$4 sm:$0xff]   ;;  %v8493_v16 = vld [vmem:[%s11836_s1 + $0x104] ss:$40 sps:$4 sm:$0xff]   ;;  %v8491_v19 = vld [vmem:[%s11836_s1 + $0x100] ss:$40 sps:$4 sm:$0xff]  }
  0x22   : > { %1388 = vmatprep.subr.bf16.mxu1 %v8415_v29  ;;  %v8488_v15 = vld [vmem:[%s11836_s1 + $0xb8] ss:$40 sps:$4 sm:$0xff]   ;;  %v8496_v17 = vld [vmem:[%s11836_s1 + $0x10c] ss:$40 sps:$4 sm:$0xff]   ;;  %v8494_v20 = vld [vmem:[%s11836_s1 + $0x108] ss:$40 sps:$4 sm:$0xff]  }
  0x23   : > { %v9129_v18 = vld [vmem:[%s9009_s14 + $0x24] ss:$8 sps:$4 sm:$0xff]   ;;  %v8502_v21 = vld [vmem:[%s11836_s1 + $0x154] ss:$40 sps:$4 sm:$0xff]   ;;  %v9147_v23 = vld [vmem:[%s9009_s14 + $0x20] ss:$8 sps:$4 sm:$0xff]  }
  0x24   : > { %1316 = vmatpush1.bf16.msra.mxu0 %v8417_v30  ;;  %v8505_v22 = vld [vmem:[%s11836_s1 + $0x15c] ss:$40 sps:$4 sm:$0xff]   ;;  %v8500_v24 = vld [vmem:[%s11836_s1 + $0x150] ss:$40 sps:$4 sm:$0xff]   ;;  %v8511_v27 = vld [vmem:[%s11836_s1 + $0x1ac] ss:$40 sps:$4 sm:$0xff]  }
  0x25   : > { %1389 = vmatpush1.bf16.msra.mxu1 %v8418_v31  ;;  %1317 = vmatprep.subr.bf16.mxu0 %v8419_v32  ;;  %v8503_v25 = vld [vmem:[%s11836_s1 + $0x158] ss:$40 sps:$4 sm:$0xff]   ;;  %v8508_v26 = vld [vmem:[%s11836_s1 + $0x1a4] ss:$40 sps:$4 sm:$0xff]   ;;  %v9163_v28 = vld [vmem:[%s9009_s14 + $0x34] ss:$8 sps:$4 sm:$0xff]  }
  0x26   : > { %1390 = vmatprep.subr.bf16.mxu1 %v8421_v33  ;;  %v8506_v29 = vld [vmem:[%s11836_s1 + $0x1a0] ss:$40 sps:$4 sm:$0xff]   ;;  %v8517_v31 = vld [vmem:[%s11836_s1 + $0x1f4] ss:$40 sps:$4 sm:$0xff]   ;;  %v9181_v33 = vld [vmem:[%s9009_s14 + $0x30] ss:$8 sps:$4 sm:$0xff]  }
  0x27   : > { %v8509_v30 = vld [vmem:[%s11836_s1 + $0x1a8] ss:$40 sps:$4 sm:$0xff]   ;;  %v8520_v32 = vld [vmem:[%s11836_s1 + $0x1fc] ss:$40 sps:$4 sm:$0xff]  }
  0x28   : > { %1318 = vmatpush1.bf16.msra.mxu0 %v8423_v34  ;;  %v8515_v34 = vld [vmem:[%s11836_s1 + $0x1f0] ss:$40 sps:$4 sm:$0xff]  }
  0x29   : > { %1391 = vmatpush1.bf16.msra.mxu1 %v8424_v35  ;;  %1319 = vmatprep.subr.bf16.mxu0 %v8425_v36  ;;  %v8518_v35 = vld [vmem:[%s11836_s1 + $0x1f8] ss:$40 sps:$4 sm:$0xff]   ;;  %v8523_v36 = vld [vmem:[%s11836_s1 + $0x244] ss:$40 sps:$4 sm:$0xff]  }
  0x2a   : > { %1392 = vmatprep.subr.bf16.mxu1 %v8427_v37  ;;  %v8526_v37 = vld [vmem:[%s11836_s1 + $0x24c] ss:$40 sps:$4 sm:$0xff]  }
  0x2c   : > { %1320 = vmatpush1.bf16.msra.mxu0 %v8429_v38  ;;  %v8521_v38 = vld [vmem:[%s11836_s1 + $0x240] ss:$40 sps:$4 sm:$0xff]  }
  0x2d   : > { %1393 = vmatpush1.bf16.msra.mxu1 %v8430_v39  ;;  %1321 = vmatprep.subr.bf16.mxu0 %v8431_v40  ;;  %v8524_v39 = vld [vmem:[%s11836_s1 + $0x248] ss:$40 sps:$4 sm:$0xff]   ;;  %v8529_v40 = vld [vmem:[%s11836_s1 + $0x294] ss:$40 sps:$4 sm:$0xff]  }
  0x2e   : > { %1394 = vmatprep.subr.bf16.mxu1 %v8433_v41  ;;  %v8532_v41 = vld [vmem:[%s11836_s1 + $0x29c] ss:$40 sps:$4 sm:$0xff]  }
  0x30   : > { %1322 = vmatpush1.bf16.msra.mxu0 %v8435_v42  ;;  %v8527_v42 = vld [vmem:[%s11836_s1 + $0x290] ss:$40 sps:$4 sm:$0xff]  }
  0x31   : > { %1395 = vmatpush1.bf16.msra.mxu1 %v8436_v43  ;;  %1323 = vmatprep.subr.bf16.mxu0 %v8437_v44  ;;  %v8530_v43 = vld [vmem:[%s11836_s1 + $0x298] ss:$40 sps:$4 sm:$0xff]   ;;  %v8535_v44 = vld [vmem:[%s11836_s1 + $0x2e4] ss:$40 sps:$4 sm:$0xff]  }
  0x32   : > { %1396 = vmatprep.subr.bf16.mxu1 %v8439_v45  ;;  %v8538_v45 = vld [vmem:[%s11836_s1 + $0x2ec] ss:$40 sps:$4 sm:$0xff]  }
  0x34   : > { %1324 = vmatpush1.bf16.msra.mxu0 %v8441_v46  ;;  %v8533_v46 = vld [vmem:[%s11836_s1 + $0x2e0] ss:$40 sps:$4 sm:$0xff]  }
  0x35   : > { %1397 = vmatpush1.bf16.msra.mxu1 %v8442_v47  ;;  %1325 = vmatprep.subr.bf16.mxu0 %v8443_v49  ;;  %v8536_v47 = vld [vmem:[%s11836_s1 + $0x2e8] ss:$40 sps:$4 sm:$0xff]   ;;  %v8541_v49 = vld [vmem:[%s11836_s1 + $0x334] ss:$40 sps:$4 sm:$0xff]  }
  0x36   : > { %1398 = vmatprep.subr.bf16.mxu1 %v8445_v50  ;;  %v8544_v50 = vld [vmem:[%s11836_s1 + $0x33c] ss:$40 sps:$4 sm:$0xff]  }
  0x38   : > { %1326 = vmatpush1.bf16.msra.mxu0 %v8447_v51  ;;  %v8539_v51 = vld [vmem:[%s11836_s1 + $0x330] ss:$40 sps:$4 sm:$0xff]  }
  0x39   : > { %1399 = vmatpush1.bf16.msra.mxu1 %v8448_v52  ;;  %1327 = vmatprep.subr.bf16.mxu0 %v8449_v53  ;;  %v8542_v52 = vld [vmem:[%s11836_s1 + $0x338] ss:$40 sps:$4 sm:$0xff]   ;;  %v8547_v53 = vld [vmem:[%s11836_s1 + $0x384] ss:$40 sps:$4 sm:$0xff]  }
  0x3a   : > { %1400 = vmatprep.subr.bf16.mxu1 %v8451_v54  ;;  %v8550_v54 = vld [vmem:[%s11836_s1 + $0x38c] ss:$40 sps:$4 sm:$0xff]  }
  0x3c   : > { %1328 = vmatpush1.bf16.msra.mxu0 %v8453_v55  ;;  %v8545_v55 = vld [vmem:[%s11836_s1 + $0x380] ss:$40 sps:$4 sm:$0xff]  }
  0x3d   : > { %1401 = vmatpush1.bf16.msra.mxu1 %v8454_v56  ;;  %1329 = vmatprep.subr.bf16.mxu0 %v8455_v57  ;;  %v8548_v56 = vld [vmem:[%s11836_s1 + $0x388] ss:$40 sps:$4 sm:$0xff]   ;;  %v8553_v57 = vld [vmem:[%s11836_s1 + $0x3d4] ss:$40 sps:$4 sm:$0xff]  }
  0x3e   : > { %1402 = vmatprep.subr.bf16.mxu1 %v8457_v58  ;;  %v8556_v58 = vld [vmem:[%s11836_s1 + $0x3dc] ss:$40 sps:$4 sm:$0xff]  }
  0x40   : > { %1330 = vmatpush1.bf16.msra.mxu0 %v8459_v59  ;;  %v8551_v59 = vld [vmem:[%s11836_s1 + $0x3d0] ss:$40 sps:$4 sm:$0xff]  }
  0x41   : > { %1403 = vmatpush1.bf16.msra.mxu1 %v8460_v60  ;;  %1331 = vmatprep.subr.bf16.mxu0 %v8461_v61  ;;  %v8554_v60 = vld [vmem:[%s11836_s1 + $0x3d8] ss:$40 sps:$4 sm:$0xff]   ;;  %v8559_v61 = vld [vmem:[%s11836_s1 + $0x424] ss:$40 sps:$4 sm:$0xff]  }
  0x42   : > { %1404 = vmatprep.subr.bf16.mxu1 %v8463_v62  ;;  %v8562_v62 = vld [vmem:[%s11836_s1 + $0x42c] ss:$40 sps:$4 sm:$0xff]  }
  0x44   : > { %1332 = vmatpush1.bf16.msra.mxu0 %v8465_v63  ;;  %v8557_v63 = vld [vmem:[%s11836_s1 + $0x420] ss:$40 sps:$4 sm:$0xff]  }
  0x45   : > { %1405 = vmatpush1.bf16.msra.mxu1 %v8466_v0  ;;  %1447 = vmatprep.subr.bf16.mxu0 %v8472_v1  ;;  %v8560_v0 = vld [vmem:[%s11836_s1 + $0x428] ss:$40 sps:$4 sm:$0xff]   ;;  %v8565_v1 = vld [vmem:[%s11836_s1 + $0x474] ss:$40 sps:$4 sm:$0xff]  }
  0x46   : > { %1520 = vmatprep.subr.bf16.mxu1 %v8475_v2  ;;  %v8568_v2 = vld [vmem:[%s11836_s1 + $0x47c] ss:$40 sps:$4 sm:$0xff]  }
  0x47   : > { %1334 = vmatmul.mubr.bf16.vlgmr.msra.gmra.mrb[0].mxu0 %v9080_v3 }
  0x48   : > { %1407 = vmatmul.mubr.bf16.vlgmr.msra.gmra.mrb[0].mxu1 %v9080_v3  ;;  %1448 = vmatpush1.bf16.msra.mxu0 %v8470_v4  ;;  %v8563_v4 = vld [vmem:[%s11836_s1 + $0x470] ss:$40 sps:$4 sm:$0xff]  }
  0x49   : > { %1521 = vmatpush1.bf16.msra.mxu1 %v8473_v5  ;;  %1449 = vmatprep.subr.bf16.mxu0 %v8478_v6  ;;  %v8566_v5 = vld [vmem:[%s11836_s1 + $0x478] ss:$40 sps:$4 sm:$0xff]   ;;  %v8571_v6 = vld [vmem:[%s11836_s1 + $0x4c4] ss:$40 sps:$4 sm:$0xff]  }
  0x4a   : > { %1522 = vmatprep.subr.bf16.mxu1 %v8481_v7  ;;  %1343 = vmatprep.mubr.bf16.mxu0 %v9095_v8  ;;  %v8574_v7 = vld [vmem:[%s11836_s1 + $0x4cc] ss:$40 sps:$4 sm:$0xff]  }
  0x4b   : > { %1416 = vmatprep.mubr.bf16.mxu1 %v9095_v8 }
  0x4c   : > { %1450 = vmatpush1.bf16.msra.mxu0 %v8476_v9  ;;  %v8569_v9 = vld [vmem:[%s11836_s1 + $0x4c0] ss:$40 sps:$4 sm:$0xff]  }
  0x4d   : > { %1523 = vmatpush1.bf16.msra.mxu1 %v8479_v10  ;;  %1451 = vmatprep.subr.bf16.mxu0 %v8487_v11  ;;  %v8572_v10 = vld [vmem:[%s11836_s1 + $0x4c8] ss:$40 sps:$4 sm:$0xff]   ;;  %v8577_v11 = vld [vmem:[%s11836_s1 + $0x24] ss:$40 sps:$4 sm:$0xff]  }
  0x4e   : > { %1524 = vmatprep.subr.bf16.mxu1 %v8490_v12  ;;  %v8575_v12 = vld [vmem:[%s11836_s1 + $0x20] ss:$40 sps:$4 sm:$0xff]  }
  0x4f   : > { %1344 = vmatmul.mubr.bf16.gmra.mrb[4].mxu0 %v9113_v13 }
  0x50   : > { %1417 = vmatmul.mubr.bf16.gmra.mrb[4].mxu1 %v9113_v13  ;;  %1452 = vmatpush1.bf16.msra.mxu0 %v8485_v14  ;;  %v8580_v14 = vld [vmem:[%s11836_s1 + $0x74] ss:$40 sps:$4 sm:$0xff]  }
  0x51   : > { %1525 = vmatpush1.bf16.msra.mxu1 %v8488_v15  ;;  %1453 = vmatprep.subr.bf16.mxu0 %v8493_v16  ;;  %v8578_v15 = vld [vmem:[%s11836_s1 + $0x70] ss:$40 sps:$4 sm:$0xff]   ;;  %v8583_v16 = vld [vmem:[%s11836_s1 + $0xc4] ss:$40 sps:$4 sm:$0xff]  }
  0x52   : > { %1526 = vmatprep.subr.bf16.mxu1 %v8496_v17  ;;  %1353 = vmatprep.mubr.bf16.mxu0 %v9129_v18  ;;  %v8581_v17 = vld [vmem:[%s11836_s1 + $0xc0] ss:$40 sps:$4 sm:$0xff]  }
  0x53   : > { %1426 = vmatprep.mubr.bf16.mxu1 %v9129_v18 }
  0x54   : > { %1454 = vmatpush1.bf16.msra.mxu0 %v8491_v19  ;;  %v8586_v19 = vld [vmem:[%s11836_s1 + $0x114] ss:$40 sps:$4 sm:$0xff]  }
  0x55   : > { %1527 = vmatpush1.bf16.msra.mxu1 %v8494_v20  ;;  %1455 = vmatprep.subr.bf16.mxu0 %v8502_v21  ;;  %v8584_v20 = vld [vmem:[%s11836_s1 + $0x110] ss:$40 sps:$4 sm:$0xff]   ;;  %v8589_v21 = vld [vmem:[%s11836_s1 + $0x164] ss:$40 sps:$4 sm:$0xff]  }
  0x56   : > { %1528 = vmatprep.subr.bf16.mxu1 %v8505_v22  ;;  %v8587_v22 = vld [vmem:[%s11836_s1 + $0x160] ss:$40 sps:$4 sm:$0xff]  }
  0x57   : > { %1354 = vmatmul.mubr.bf16.gmra.mrb[8].mxu0 %v9147_v23 }
  0x58   : > { %1427 = vmatmul.mubr.bf16.gmra.mrb[8].mxu1 %v9147_v23  ;;  %1456 = vmatpush1.bf16.msra.mxu0 %v8500_v24  ;;  %v8592_v24 = vld [vmem:[%s11836_s1 + $0x1b4] ss:$40 sps:$4 sm:$0xff]  }
  0x59   : > { %1529 = vmatpush1.bf16.msra.mxu1 %v8503_v25  ;;  %1457 = vmatprep.subr.bf16.mxu0 %v8508_v26  ;;  %v8590_v25 = vld [vmem:[%s11836_s1 + $0x1b0] ss:$40 sps:$4 sm:$0xff]   ;;  %v8595_v26 = vld [vmem:[%s11836_s1 + $0x204] ss:$40 sps:$4 sm:$0xff]  }
  0x5a   : > { %1530 = vmatprep.subr.bf16.mxu1 %v8511_v27  ;;  %1363 = vmatprep.mubr.bf16.mxu0 %v9163_v28  ;;  %v8593_v27 = vld [vmem:[%s11836_s1 + $0x200] ss:$40 sps:$4 sm:$0xff]  }
  0x5b   : > { %1436 = vmatprep.mubr.bf16.mxu1 %v9163_v28 }
  0x5c   : > { %1458 = vmatpush1.bf16.msra.mxu0 %v8506_v29  ;;  %v8598_v29 = vld [vmem:[%s11836_s1 + $0x254] ss:$40 sps:$4 sm:$0xff]  }
  0x5d   : > { %1531 = vmatpush1.bf16.msra.mxu1 %v8509_v30  ;;  %1459 = vmatprep.subr.bf16.mxu0 %v8517_v31  ;;  %v8596_v30 = vld [vmem:[%s11836_s1 + $0x250] ss:$40 sps:$4 sm:$0xff]   ;;  %v8601_v31 = vld [vmem:[%s11836_s1 + $0x2a4] ss:$40 sps:$4 sm:$0xff]  }
  0x5e   : > { %1532 = vmatprep.subr.bf16.mxu1 %v8520_v32  ;;  %v8599_v32 = vld [vmem:[%s11836_s1 + $0x2a0] ss:$40 sps:$4 sm:$0xff]  }
  0x5f   : > { %1364 = vmatmul.mubr.bf16.gmra.mrb[12].mxu0 %v9181_v33 }
  0x60   : > { %1437 = vmatmul.mubr.bf16.gmra.mrb[12].mxu1 %v9181_v33  ;;  %1460 = vmatpush1.bf16.msra.mxu0 %v8515_v34  ;;  %v8602_v34 = vld [vmem:[%s11836_s1 + $0x2f0] ss:$40 sps:$4 sm:$0xff]  }
  0x61   : > { %1533 = vmatpush1.bf16.msra.mxu1 %v8518_v35  ;;  %1461 = vmatprep.subr.bf16.mxu0 %v8523_v36  ;;  %v8607_v35 = vld [vmem:[%s11836_s1 + $0x344] ss:$40 sps:$4 sm:$0xff]   ;;  %v8605_v36 = vld [vmem:[%s11836_s1 + $0x340] ss:$40 sps:$4 sm:$0xff]  }
  0x62   : > { %1534 = vmatprep.subr.bf16.mxu1 %v8526_v37  ;;  %1479 = vmatprep.mubr.bf16.mxu0 %v9021_v48  ;;  %v8610_v37 = vld [vmem:[%s11836_s1 + $0x394] ss:$40 sps:$4 sm:$0xff]  }
  0x63   : > { %1552 = vmatprep.mubr.bf16.mxu1 %v9021_v48 }
  0x64   : > { %1462 = vmatpush1.bf16.msra.mxu0 %v8521_v38  ;;  %v8608_v38 = vld [vmem:[%s11836_s1 + $0x390] ss:$40 sps:$4 sm:$0xff]  }
  0x65   : > { %1535 = vmatpush1.bf16.msra.mxu1 %v8524_v39  ;;  %1463 = vmatprep.subr.bf16.mxu0 %v8529_v40  ;;  %v8613_v39 = vld [vmem:[%s11836_s1 + $0x3e4] ss:$40 sps:$4 sm:$0xff]   ;;  %v8611_v40 = vld [vmem:[%s11836_s1 + $0x3e0] ss:$40 sps:$4 sm:$0xff]  }
  0x66   : > { %1536 = vmatprep.subr.bf16.mxu1 %v8532_v41  ;;  %v8616_v41 = vld [vmem:[%s11836_s1 + $0x434] ss:$40 sps:$4 sm:$0xff]  }
  0x68   : > { %1464 = vmatpush1.bf16.msra.mxu0 %v8527_v42  ;;  %v8614_v42 = vld [vmem:[%s11836_s1 + $0x430] ss:$40 sps:$4 sm:$0xff]  }
  0x69   : > { %1537 = vmatpush1.bf16.msra.mxu1 %v8530_v43  ;;  %1465 = vmatprep.subr.bf16.mxu0 %v8535_v44  ;;  %v8619_v43 = vld [vmem:[%s11836_s1 + $0x484] ss:$40 sps:$4 sm:$0xff]   ;;  %v8617_v44 = vld [vmem:[%s11836_s1 + $0x480] ss:$40 sps:$4 sm:$0xff]  }
  0x6a   : > { %1538 = vmatprep.subr.bf16.mxu1 %v8538_v45  ;;  %v8622_v45 = vld [vmem:[%s11836_s1 + $0x4d4] ss:$40 sps:$4 sm:$0xff]  }
  0x6c   : > { %1466 = vmatpush1.bf16.msra.mxu0 %v8533_v46  ;;  %v8620_v46 = vld [vmem:[%s11836_s1 + $0x4d0] ss:$40 sps:$4 sm:$0xff]  }
  0x6d   : > { %1539 = vmatpush1.bf16.msra.mxu1 %v8536_v47  ;;  %1467 = vmatprep.subr.bf16.mxu0 %v8541_v49  ;;  %v8808_v47 = vmov 0   ;;  %v288_v49 = vlaneseq }
  0x6e   : > { %1540 = vmatprep.subr.bf16.mxu1 %v8544_v50  ;;  %v8809_v50 = vmov 1966171168  }
  0x6f   : > { %vm10055_vm1 = vcmp.lt.s32.totalorder %v288_v49, 256 }
  0x70   : > { %1468 = vmatpush1.bf16.msra.mxu0 %v8539_v51 }
  0x71   : > { %1541 = vmatpush1.bf16.msra.mxu1 %v8542_v52  ;;  %1469 = vmatprep.subr.bf16.mxu0 %v8547_v53 }
  0x72   : > { %1542 = vmatprep.subr.bf16.mxu1 %v8550_v54 }
  0x74   : > { %1470 = vmatpush1.bf16.msra.mxu0 %v8545_v55 }
  0x75   : > { %1543 = vmatpush1.bf16.msra.mxu1 %v8548_v56  ;;  %1471 = vmatprep.subr.bf16.mxu0 %v8553_v57 }
  0x76   : > { %1544 = vmatprep.subr.bf16.mxu1 %v8556_v58 }
  0x78   : > { %1472 = vmatpush1.bf16.msra.mxu0 %v8551_v59 }
  0x79   : > { %1545 = vmatpush1.bf16.msra.mxu1 %v8554_v60  ;;  %1473 = vmatprep.subr.bf16.mxu0 %v8559_v61 }
  0x7a   : > { %1546 = vmatprep.subr.bf16.mxu1 %v8562_v62 }
  0x7c   : > { %1474 = vmatpush1.bf16.msra.mxu0 %v8557_v63 }
  0x7d   : > { %1547 = vmatpush1.bf16.msra.mxu1 %v8560_v0  ;;  %1475 = vmatprep.subr.bf16.mxu0 %v8565_v1 }
  0x7e   : > { %1548 = vmatprep.subr.bf16.mxu1 %v8568_v2 }
  0x80   : > { %1476 = vmatpush1.bf16.msra.mxu0 %v8563_v4 }
  0x81   : > { %1549 = vmatpush1.bf16.msra.mxu1 %v8566_v5  ;;  %1477 = vmatprep.subr.bf16.mxu0 %v8571_v6 }
  0x82   : > { %1550 = vmatprep.subr.bf16.mxu1 %v8574_v7 }
  0x84   : > { %1478 = vmatpush1.bf16.msra.mxu0 %v8569_v9 }
  0x85   : > { %1551 = vmatpush1.bf16.msra.mxu1 %v8572_v10  ;;  %1593 = vmatprep.subr.bf16.mxu0 %v8577_v11 }
  0x87   : > { %1480 = vmatmul.mubr.bf16.vlgmr.msra.gmra.mrb[16].mxu0 %v9080_v3 }
  0x88   : > { %1553 = vmatmul.mubr.bf16.vlgmr.msra.gmra.mrb[16].mxu1 %v9080_v3  ;;  %1489 = vmatprep.mubr.bf16.mxu0 %v9095_v8 }
  0x89   : > { %1562 = vmatprep.mubr.bf16.mxu1 %v9095_v8  ;;  %1594 = vmatpush1.bf16.msra.mxu0 %v8575_v12 }
  0x8a   : > { %1595 = vmatprep.subr.bf16.mxu0 %v8580_v14 }
  0x8d   : > { %1596 = vmatpush1.bf16.msra.mxu0 %v8578_v15 }
  0x8e   : > { %1597 = vmatprep.subr.bf16.mxu0 %v8583_v16 }
  0x8f   : > { %1490 = vmatmul.mubr.bf16.gmra.mrb[20].mxu0 %v9113_v13 }
  0x90   : > { %1563 = vmatmul.mubr.bf16.gmra.mrb[20].mxu1 %v9113_v13  ;;  %1499 = vmatprep.mubr.bf16.mxu0 %v9129_v18 }
  0x91   : > { %1572 = vmatprep.mubr.bf16.mxu1 %v9129_v18  ;;  %1598 = vmatpush1.bf16.msra.mxu0 %v8581_v17 }
  0x92   : > { %1599 = vmatprep.subr.bf16.mxu0 %v8586_v19 }
  0x95   : > { %1600 = vmatpush1.bf16.msra.mxu0 %v8584_v20 }
  0x96   : > { %1601 = vmatprep.subr.bf16.mxu0 %v8589_v21 }
  0x97   : > { %1500 = vmatmul.mubr.bf16.gmra.mrb[24].mxu0 %v9147_v23 }
  0x98   : > { %1573 = vmatmul.mubr.bf16.gmra.mrb[24].mxu1 %v9147_v23  ;;  %1509 = vmatprep.mubr.bf16.mxu0 %v9163_v28 }
  0x99   : > { %1582 = vmatprep.mubr.bf16.mxu1 %v9163_v28  ;;  %1602 = vmatpush1.bf16.msra.mxu0 %v8587_v22 }
  0x9a   : > { %1603 = vmatprep.subr.bf16.mxu0 %v8592_v24 }
  0x9d   : > { %1604 = vmatpush1.bf16.msra.mxu0 %v8590_v25 }
  0x9e   : > { %1605 = vmatprep.subr.bf16.mxu0 %v8595_v26 }
  0x9f   : > { %1510 = vmatmul.mubr.bf16.gmra.mrb[28].mxu0 %v9181_v33 }
  0xa0   : > { %1583 = vmatmul.mubr.bf16.gmra.mrb[28].mxu1 %v9181_v33  ;;  %1625 = vmatprep.mubr.bf16.mxu0 %v9021_v48  ;;  %v8604_v48 = vld [vmem:[%s11836_s1 + $0x2f4] ss:$40 sps:$4 sm:$0xff]  }
  0xa1   : > { %1606 = vmatpush1.bf16.msra.mxu0 %v8593_v27  ;;  %2250 = vmatprep.mubr.bf16.mxu1 %v8808_v47 }
  0xa2   : > { %1607 = vmatprep.subr.bf16.mxu0 %v8598_v29 }
  0xa5   : > { %1608 = vmatpush1.bf16.msra.mxu0 %v8596_v30 }
  0xa6   : > { %1609 = vmatprep.subr.bf16.mxu0 %v8601_v31 }
  0xa9   : > { %1610 = vmatpush1.bf16.msra.mxu0 %v8599_v32 }
  0xaa   : > { %1611 = vmatprep.subr.bf16.mxu0 %v8604_v48 }
  0xad   : > { %1612 = vmatpush1.bf16.msra.mxu0 %v8602_v34 }
  0xae   : > { %1613 = vmatprep.subr.bf16.mxu0 %v8607_v35 }
  0xb1   : > { %1614 = vmatpush1.bf16.msra.mxu0 %v8605_v36 }
  0xb2   : > { %1615 = vmatprep.subr.bf16.mxu0 %v8610_v37 }
  0xb5   : > { %1616 = vmatpush1.bf16.msra.mxu0 %v8608_v38 }
  0xb6   : > { %1617 = vmatprep.subr.bf16.mxu0 %v8613_v39 }
  0xb9   : > { %1618 = vmatpush1.bf16.msra.mxu0 %v8611_v40 }
  0xba   : > { %1619 = vmatprep.subr.bf16.mxu0 %v8616_v41 }
  0xbd   : > { %1620 = vmatpush1.bf16.msra.mxu0 %v8614_v42 }
  0xbe   : > { %1621 = vmatprep.subr.bf16.mxu0 %v8619_v43 }
  0xc1   : > { %1622 = vmatpush1.bf16.msra.mxu0 %v8617_v44 }
  0xc2   : > { %1623 = vmatprep.subr.bf16.mxu0 %v8622_v45 }
  0xc5   : > { %1624 = vmatpush1.bf16.msra.mxu0 %v8620_v46 }
  0xc8   : > { %1626 = vmatmul.mubr.bf16.vlgmr.msra.gmra.mrb[32].mxu0 %v9080_v3  ;;  %v1712_v3 = vunpack.c.l.s4 %v8809_v50 }
  0xc9   : > { %1635 = vmatprep.mubr.bf16.mxu0 %v9095_v8  ;;  %v9423_v8 = vshrl.u32 %v288_v49, 7 }
  0xca   : > { %v1713_v51 = vunpack.c.0.s8 %v1712_v3 }
  0xcb   : > { %v9438_v54 = vsub.s32 0, %v9423_v8 }
  0xd0   : > { %1636 = vmatmul.mubr.bf16.gmra.mrb[36].mxu0 %v9113_v13  ;;  %v9426_v13 = vsub.s32 %v1713_v51, %v9423_v8 }
  0xd1   : > { %1645 = vmatprep.mubr.bf16.mxu0 %v9129_v18  ;;  %v9431_v18 = vld [vmem:[%s11837_s2] sm:$0xff] }
  0xd8   : > { %1646 = vmatmul.mubr.bf16.gmra.mrb[40].mxu0 %v9147_v23  ;;  %v1717_v23 = vrot.slane %v9431_v18, %v9426_v13 }
  0xd9   : > { %1655 = vmatprep.mubr.bf16.mxu0 %v9163_v28 }
  0xda   : > { %v1725_v28 = vcombine.high %v1717_v23, %v1717_v23 }
  0xdc   : > { %v1747_v52 = vrot.slane %v1725_v28, %v9426_v13 }
  0xde   : > { %v1789_v55 = vpack.i.b16 %v1747_v52, %v1747_v52  ;;  %v1757_v10 = vcombine.high %v1747_v52, %v1747_v52 }
  0xe0   : > { %1656 = vmatmul.mubr.bf16.gmra.mrb[44].mxu0 %v9181_v33  ;;  %v1733_v33 = vrot.slane %v1717_v23, %v9426_v13  ;;  %v9444_v63 = vrot.slane %v1789_v55, %v9438_v54  ;;  %v1803_v20 = vpack.i.b16 %v1757_v10, %v1757_v10 }
  0xe1   : > { %2414 = vmatprep.mubr.bf16.mxu0 %v8808_v47 }
  0xe2   : > { %v1782_v53 = vpack.i.b16 %v1733_v33, %v1733_v33  ;;  %v1755_v19 = vcombine.high %v1733_v33, %v1733_v33  ;;  %v9464_v48 = vrot.slane %v1803_v20, %v9438_v54 }
  0xe4   : > { %v9441_v60 = vrot.slane %v1782_v53, %v9438_v54  ;;  %v1796_v32 = vpack.i.b16 %v1755_v19, %v1755_v19 }
  0xe6   : > { %v9472_v41 = vrot.slane %v1796_v32, %v9438_v54 }
 0x11a   : > { %v1335_v56 = vpop.f32.mrb[0].mxu0 }
 0x11b   : > { %v1408_v57 = vpop.f32.mrb[0].mxu1  ;;  %v1337_v58 = vpop.f32.mrb[1].mxu0 }
 0x11c   : > { %v1410_v59 = vpop.f32.mrb[1].mxu1  ;;  %v1339_v61 = vpop.f32.mrb[2].mxu0 }
 0x11d   : > { %v1412_v62 = vpop.f32.mrb[2].mxu1  ;;  %v1666_v0 = vpack.c.bf16 %v1339_v61, %v1335_v56  ;;  %v1341_v2 = vpop.f32.mrb[3].mxu0 }
 0x11e   : > { %v1668_v1 = vpack.c.bf16 %v1412_v62, %v1408_v57  ;;  %v1414_v4 = vpop.f32.mrb[3].mxu1  ;;  %v1667_v5 = vpack.c.bf16 %v1341_v2, %v1337_v58 }
 0x11f   : > { %v1669_v6 = vpack.c.bf16 %v1414_v4, %v1410_v59  ;;  %v9447_v7 = vadd.bf16 %v9441_v60, %v1666_v0 }
 0x120   : > { %v9450_v9 = vadd.bf16 %v9444_v63, %v1667_v5  ;;  %v9481_v55 = vadd.bf16 %v9472_v41, %v1668_v1 }
 0x121   : > { %v7584_v11 = vmul.bf16 3216621497, %v9447_v7  ;;  %v9475_v42 = vadd.bf16 %v9464_v48, %v1669_v6 }
 0x122   : > { %v7585_v12 = vmul.bf16 3216621497, %v9450_v9  ;;  %v1345_v14 = vpop.f32.mrb[4].mxu0  ;;  %v7586_v5 = vmul.bf16 3216621497, %v9481_v55 }
 0x123   : > { %v9454_v15 = vpop.f32.mrb[4].mxu1  ;;  %8624 = vpow.bf16 %v7584_v11  ;;  %v1347_v16 = vpop.f32.mrb[5].mxu0  ;;  %v7587_v56 = vmul.bf16 3216621497, %v9475_v42 }
 0x124   : > { %v1420_v17 = vpop.f32.mrb[5].mxu1  ;;  %v1349_v21 = vpop.f32.mrb[6].mxu0  ;;  %8626 = vpow.bf16 %v7585_v12 }
 0x125   : > { %v9456_v22 = vpop.f32.mrb[6].mxu1  ;;  %v1676_v24 = vpack.c.bf16 %v1349_v21, %v1345_v14  ;;  %v1351_v25 = vpop.f32.mrb[7].mxu0 }
 0x126   : > { %v1678_v26 = vpack.c.bf16 %v9456_v22, %v9454_v15  ;;  %v1424_v27 = vpop.f32.mrb[7].mxu1  ;;  %v1677_v29 = vpack.c.bf16 %v1351_v25, %v1347_v16 }
 0x127   : > { %v1679_v30 = vpack.c.bf16 %v1424_v27, %v1420_v17  ;;  %v9461_v31 = vadd.bf16 %v9441_v60, %v1676_v24 }
 0x128   : > { %v9467_v34 = vadd.bf16 %v9444_v63, %v1677_v29  ;;  %v9494_v22 = vadd.bf16 %v9472_v41, %v1678_v26 }
 0x129   : > { %v7594_v35 = vmul.bf16 3216621497, %v9461_v31  ;;  %v9490_v4 = vadd.bf16 %v9464_v48, %v1679_v30 }
 0x12a   : > { %v7595_v36 = vmul.bf16 3216621497, %v9467_v34  ;;  %v1355_v37 = vpop.f32.mrb[8].mxu0 }
 0x12b   : > { %v1428_v38 = vpop.f32.mrb[8].mxu1  ;;  %8628 = vpow.bf16 %v7594_v35  ;;  %v1357_v39 = vpop.f32.mrb[9].mxu0  ;;  %v7597_v25 = vmul.bf16 3216621497, %v9490_v4 }
 0x12c   : > { %v1430_v40 = vpop.f32.mrb[9].mxu1  ;;  %8630 = vpow.bf16 %v7595_v36  ;;  %v1359_v43 = vpop.f32.mrb[10].mxu0  ;;  %v7596_v36 = vmul.bf16 3216621497, %v9494_v22 }
 0x12d   : > { %v1432_v44 = vpop.f32.mrb[10].mxu1  ;;  %v1686_v45 = vpack.c.bf16 %v1359_v43, %v1355_v37  ;;  %v1361_v46 = vpop.f32.mrb[11].mxu0 }
 0x12e   : > { %v1688_v50 = vpack.c.bf16 %v1432_v44, %v1428_v38  ;;  %v1434_v3 = vpop.f32.mrb[11].mxu1  ;;  %v8625_v51 = vpop.eup %8624  ;;  %v1687_v23 = vpack.c.bf16 %v1361_v46, %v1357_v39 }
 0x12f   : > { %v1689_v28 = vpack.c.bf16 %v1434_v3, %v1430_v40  ;;  %v2051_v33 = vadd.bf16 1065369472, %v8625_v51  ;;  %v9478_v52 = vadd.bf16 %v9441_v60, %v1686_v45  ;;  %v8627_v53 = vpop.eup %8626 }
 0x130   : > { %v9485_v57 = vadd.bf16 %v9444_v63, %v1687_v23  ;;  %v2052_v58 = vadd.bf16 1065369472, %v8627_v53  ;;  %v9508_v35 = vadd.bf16 %v9472_v41, %v1688_v50 }
 0x131   : > { %8632 = vrcp.bf16 %v2051_v33  ;;  %v7604_v59 = vmul.bf16 3216621497, %v9478_v52  ;;  %v9504_v30 = vadd.bf16 %v9464_v48, %v1689_v28 }
 0x132   : > { %v7605_v61 = vmul.bf16 3216621497, %v9485_v57  ;;  %v1365_v62 = vpop.f32.mrb[12].mxu0  ;;  %8634 = vrcp.bf16 %v2052_v58  ;;  %v7606_v38 = vmul.bf16 3216621497, %v9508_v35 }
 0x133   : > { %v1438_v0 = vpop.f32.mrb[12].mxu1  ;;  %v1367_v2 = vpop.f32.mrb[13].mxu0  ;;  %8636 = vpow.bf16 %v7587_v56  ;;  %v7607_v37 = vmul.bf16 3216621497, %v9504_v30 }
 0x134   : > { %v1440_v1 = vpop.f32.mrb[13].mxu1  ;;  %v1369_v6 = vpop.f32.mrb[14].mxu0  ;;  %8638 = vpow.bf16 %v7604_v59 }
 0x135   : > { %v1442_v10 = vpop.f32.mrb[14].mxu1  ;;  %v1696_v11 = vpack.c.bf16 %v1369_v6, %v1365_v62  ;;  %v1371_v12 = vpop.f32.mrb[15].mxu0  ;;  %8640 = vpow.bf16 %v7605_v61 }
 0x136   : > { %v1698_v14 = vpack.c.bf16 %v1442_v10, %v1438_v0  ;;  %v1444_v15 = vpop.f32.mrb[15].mxu1  ;;  %v8629_v16 = vpop.eup %8628  ;;  %v1697_v17 = vpack.c.bf16 %v1371_v12, %v1367_v2  ;;  %8642 = vpow.bf16 %v7586_v5  ;;  %v1710_v12 = vcombine.high %v9431_v18, %v9431_v18 }
 0x137   : > { %v1699_v19 = vpack.c.bf16 %v1444_v15, %v1440_v1  ;;  %v8631_v20 = vpop.eup %8630  ;;  %v2061_v21 = vadd.bf16 1065369472, %v8629_v16  ;;  %v9497_v24 = vadd.bf16 %v9441_v60, %v1696_v11 }
 0x138   : > { %v2062_v27 = vadd.bf16 1065369472, %v8631_v20  ;;  %v9501_v29 = vadd.bf16 %v9444_v63, %v1697_v17 }
 0x139   : > { %8644 = vrcp.bf16 %v2061_v21  ;;  %v7614_v32 = vmul.bf16 3216621497, %v9497_v24  ;;  %v9512_v26 = vadd.bf16 %v9464_v48, %v1699_v19  ;;  %v9519_v48 = vadd.bf16 %v9472_v41, %v1698_v14 }
 0x13a   : > { %8646 = vrcp.bf16 %v2062_v27  ;;  %v7615_v60 = vmul.bf16 3216621497, %v9501_v29 }
 0x13b   : > { %8648 = vpow.bf16 %v7597_v25  ;;  %v7617_v43 = vmul.bf16 3216621497, %v9512_v26  ;;  %v7616_v53 = vmul.bf16 3216621497, %v9519_v48 }
 0x13c   : > { %v8633_v63 = vpop.eup %8632  ;;  %8650 = vpow.bf16 %v7614_v32 }
 0x13d   : > { %v8635_v39 = vpop.eup %8634  ;;  %v2092_v40 = vmul.bf16 1065369472, %v8633_v63  ;;  %8652 = vpow.bf16 %v7615_v60 }
 0x13e   : > { %v8637_v44 = vpop.eup %8636  ;;  %8654 = vpow.bf16 %v7596_v36  ;;  %v2094_v45 = vmul.bf16 1065369472, %v8635_v39 }
 0x13f   : > { %v8639_v46 = vpop.eup %8638  ;;  %8656 = vpow.bf16 %v7607_v37  ;;  %v2171_v23 = vmul.bf16 %v2092_v40, %v9447_v7  ;;  %v2054_v58 = vadd.bf16 1065369472, %v8637_v44 }
 0x140   : > { %v8641_v50 = vpop.eup %8640  ;;  %v2071_v3 = vadd.bf16 1065369472, %v8639_v46  ;;  %8658 = vpow.bf16 %v7606_v38  ;;  %v2172_v51 = vmul.bf16 %v2094_v45, %v9450_v9 }
 0x141   : > { %v2072_v28 = vadd.bf16 1065369472, %v8641_v50  ;;  %8660 = vpow.bf16 %v7617_v43  ;;  %v8643_v33 = vpop.eup %8642 }
 0x142   : > { %8662 = vrcp.bf16 %v2071_v3  ;;  %2218 = vmatprep.subr.bf16.mxu1 %v2172_v51  ;;  %v2053_v1 = vadd.bf16 1065369472, %v8643_v33 }
 0x143   : > { %8664 = vrcp.bf16 %v2072_v28  ;;  %2219 = vmatpush1.bf16.msra.mxu1 %v2171_v23 }
 0x144   : > { %v8645_v56 = vpop.eup %8644  ;;  %8666 = vpow.bf16 %v7616_v53 }
 0x145   : > { %v8647_v41 = vpop.eup %8646  ;;  %v2112_v59 = vmul.bf16 1065369472, %v8645_v56  ;;  %8668 = vrcp.bf16 %v2054_v58 }
 0x146   : > { %v8649_v61 = vpop.eup %8648  ;;  %v2114_v62 = vmul.bf16 1065369472, %v8647_v41 }
 0x147   : > { %v8651_v0 = vpop.eup %8650  ;;  %v2181_v5 = vmul.bf16 %v2112_v59, %v9461_v31  ;;  %v2064_v10 = vadd.bf16 1065369472, %v8649_v61  ;;  %v1724_v31 = vrot.slane %v1710_v12, %v9426_v13 }
 0x148   : > { %v2081_v9 = vadd.bf16 1065369472, %v8651_v0  ;;  %v2182_v7 = vmul.bf16 %v2114_v62, %v9467_v34  ;;  %v8653_v2 = vpop.eup %8652 }
 0x149   : > { %v8655_v6 = vpop.eup %8654  ;;  %v2082_v11 = vadd.bf16 1065369472, %v8653_v2  ;;  %v1726_v36 = vcombine.high %v1724_v31, %v1724_v31  ;;  %v9532_v40 = vrot.slane %v1724_v31, %v9426_v13 }
 0x14a   : > { %8670 = vrcp.bf16 %v2081_v9  ;;  %2220 = vmatprep.subr.bf16.mxu1 %v2182_v7  ;;  %v8657_v14 = vpop.eup %8656  ;;  %v2063_v34 = vadd.bf16 1065369472, %v8655_v6 }
 0x14b   : > { %2221 = vmatpush1.bf16.msra.mxu1 %v2181_v5  ;;  %v8659_v15 = vpop.eup %8658  ;;  %8672 = vrcp.bf16 %v2082_v11  ;;  %v2074_v19 = vadd.bf16 1065369472, %v8657_v14  ;;  %v1754_v43 = vrot.slane %v1726_v36, %v9426_v13 }
 0x14c   : > { %v8661_v16 = vpop.eup %8660  ;;  %8674 = vrcp.bf16 %v2053_v1  ;;  %v2073_v32 = vadd.bf16 1065369472, %v8659_v15 }
 0x14d   : > { %v8663_v17 = vpop.eup %8662  ;;  %8676 = vrcp.bf16 %v2064_v10  ;;  %v2084_v25 = vadd.bf16 1065369472, %v8661_v16  ;;  %v1817_v3 = vpack.i.b16 %v1754_v43, %v1754_v43  ;;  %v9559_v10 = vld [vmem:[%s11838_s3] sm:$0x1] }
 0x14e   : > { %v8665_v20 = vpop.eup %8664  ;;  %v2132_v21 = vmul.bf16 1065369472, %v8663_v17  ;;  %8678 = vrcp.bf16 %v2063_v34 }
 0x14f   : > { %v2134_v27 = vmul.bf16 1065369472, %v8665_v20  ;;  %v8667_v60 = vpop.eup %8666  ;;  %8680 = vrcp.bf16 %v2074_v19  ;;  %v9550_v7 = vrot.slane %v1817_v3, %v9438_v54 }
 0x150   : > { %v2191_v63 = vmul.bf16 %v2132_v21, %v9478_v52  ;;  %v8669_v37 = vpop.eup %8668  ;;  %8682 = vrcp.bf16 %v2084_v25  ;;  %v2083_v39 = vadd.bf16 1065369472, %v8667_v60 }
 0x151   : > { %v2192_v18 = vmul.bf16 %v2134_v27, %v9485_v57  ;;  %8684 = vrcp.bf16 %v2073_v32  ;;  %v1810_v57 = vpack.i.b16 %v9532_v40, %v9532_v40  ;;  %v2098_v52 = vmul.bf16 1065369472, %v8669_v37 }
 0x152   : > { %8686 = vrcp.bf16 %v2083_v39 }
 0x153   : > { %2222 = vmatprep.subr.bf16.mxu1 %v2192_v18  ;;  %v9544_v59 = vrot.slane %v1810_v57, %v9438_v54  ;;  %v2174_v9 = vmul.bf16 %v2098_v52, %v9475_v42 }
 0x154   : > { %2223 = vmatpush1.bf16.msra.mxu1 %v2191_v63  ;;  %v1758_v63 = vcombine.high %v1754_v43, %v1754_v43 }
 0x155   : > { %v8671_v38 = vpop.eup %8670 }
 0x156   : > { %v8673_v44 = vpop.eup %8672  ;;  %v2152_v45 = vmul.bf16 1065369472, %v8671_v38 }
 0x157   : > { %v8675_v46 = vpop.eup %8674  ;;  %v2154_v50 = vmul.bf16 1065369472, %v8673_v44 }
 0x158   : > { %v8677_v51 = vpop.eup %8676  ;;  %v2096_v53 = vmul.bf16 1065369472, %v8675_v46  ;;  %v2201_v56 = vmul.bf16 %v2152_v45, %v9497_v24  ;;  %v1756_v46 = vcombine.high %v9532_v40, %v9532_v40 }
 0x159   : > { %v2202_v33 = vmul.bf16 %v2154_v50, %v9501_v29  ;;  %v8679_v61 = vpop.eup %8678  ;;  %v2118_v29 = vmul.bf16 1065369472, %v8677_v51 }
 0x15a   : > { %v1481_v23 = vpop.f32.mrb[16].mxu0  ;;  %v8681_v2 = vpop.eup %8680  ;;  %v2173_v14 = vmul.bf16 %v2096_v53, %v9481_v55  ;;  %v2116_v15 = vmul.bf16 1065369472, %v8679_v61  ;;  %v1824_v40 = vpack.i.b16 %v1756_v46, %v1756_v46 }
 0x15b   : > { %v9537_v28 = vpop.f32.mrb[16].mxu1  ;;  %v1483_v41 = vpop.f32.mrb[17].mxu0  ;;  %2224 = vmatprep.subr.bf16.mxu1 %v2202_v33  ;;  %v2184_v19 = vmul.bf16 %v2118_v29, %v9490_v4  ;;  %v2138_v31 = vmul.bf16 1065369472, %v8681_v2 }
 0x15c   : > { %v9541_v58 = vpop.f32.mrb[17].mxu1  ;;  %v1485_v62 = vpop.f32.mrb[18].mxu0  ;;  %2225 = vmatpush1.bf16.msra.mxu1 %v2201_v56  ;;  %v2183_v32 = vmul.bf16 %v2116_v15, %v9494_v22  ;;  %v1829_v15 = vrot.slane %v1824_v40, %v9438_v54 }
 0x15d   : > { %v9546_v0 = vpop.f32.mrb[18].mxu1  ;;  %v1670_v24 = vpack.c.bf16 %v1485_v62, %v1481_v23  ;;  %v1487_v5 = vpop.f32.mrb[19].mxu0  ;;  %2259 = vmatprep.subr.bf16.mxu1 %v2174_v9  ;;  %v2194_v39 = vmul.bf16 %v2138_v31, %v9504_v30  ;;  %v1831_v23 = vpack.i.b16 %v1758_v63, %v1758_v63 }
 0x15e   : > { %v1672_v1 = vpack.c.bf16 %v9546_v0, %v9537_v28  ;;  %v9554_v6 = vpop.f32.mrb[19].mxu1  ;;  %v1671_v42 = vpack.c.bf16 %v1487_v5, %v1483_v41  ;;  %v8683_v12 = vpop.eup %8682 }
 0x15f   : > { %v1673_v11 = vpack.c.bf16 %v9554_v6, %v9541_v58  ;;  %v9565_v16 = vadd.bf16 %v9544_v59, %v1670_v24  ;;  %v8685_v34 = vpop.eup %8684  ;;  %7624 = vmatmul.mubr.msk.bf16.vlgmr.msra.gmra.mrb[32].mxu1 %vm2214_vm0, %v9559_v10  ;;  %v2158_v27 = vmul.bf16 1065369472, %v8683_v12  ;;  %v1836_v9 = vrot.slane %v1831_v23, %v9438_v54 }
 0x160   : > { %v9568_v17 = vadd.bf16 %v9550_v7, %v1671_v42  ;;  %2260 = vmatpush1.bf16.msra.mxu1 %v2173_v14  ;;  %2291 = vmatprep.mubr.bf16.mxu1 %v8808_v47  ;;  %v2136_v60 = vmul.bf16 1065369472, %v8685_v34  ;;  %v8687_v4 = vpop.eup %8686 }
 0x161   : > { %v7588_v20 = vmul.bf16 3216621497, %v9565_v16  ;;  %2261 = vmatprep.subr.bf16.mxu1 %v2184_v19  ;;  %v2204_v52 = vmul.bf16 %v2158_v27, %v9512_v26  ;;  %v2156_v30 = vmul.bf16 1065369472, %v8687_v4 }
 0x162   : > { %v7589_v55 = vmul.bf16 3216621497, %v9568_v17  ;;  %v1491_v21 = vpop.f32.mrb[20].mxu0  ;;  %v2193_v3 = vmul.bf16 %v2136_v60, %v9508_v35  ;;  %v9620_v60 = vadd.bf16 %v1829_v15, %v1672_v1 }
 0x163   : > { %v9576_v25 = vpop.f32.mrb[20].mxu1  ;;  %8688 = vpow.bf16 %v7588_v20  ;;  %v1493_v18 = vpop.f32.mrb[21].mxu0  ;;  %v2203_v26 = vmul.bf16 %v2156_v30, %v9519_v48 }
 0x164   : > { %v9579_v36 = vpop.f32.mrb[21].mxu1  ;;  %v1495_v37 = vpop.f32.mrb[22].mxu0  ;;  %8690 = vpow.bf16 %v7589_v55  ;;  %2262 = vmatpush1.bf16.msra.mxu1 %v2183_v32  ;;  %v9608_v55 = vadd.bf16 %v1836_v9, %v1673_v11 }
 0x165   : > { %v9581_v38 = vpop.f32.mrb[22].mxu1  ;;  %v1680_v44 = vpack.c.bf16 %v1495_v37, %v1491_v21  ;;  %v1497_v57 = vpop.f32.mrb[23].mxu0  ;;  %2263 = vmatprep.subr.bf16.mxu1 %v2194_v39 }
 0x166   : > { %v1682_v45 = vpack.c.bf16 %v9581_v38, %v9576_v25  ;;  %v1570_v22 = vpop.f32.mrb[23].mxu1  ;;  %v1681_v50 = vpack.c.bf16 %v1497_v57, %v1493_v18  ;;  %v7591_v18 = vmul.bf16 3216621497, %v9608_v55  ;;  %v7590_v57 = vmul.bf16 3216621497, %v9620_v60 }
 0x167   : > { %v1683_v43 = vpack.c.bf16 %v1570_v22, %v9579_v36  ;;  %v9592_v51 = vadd.bf16 %v9544_v59, %v1680_v44 }
 0x168   : > { %v9595_v33 = vadd.bf16 %v9550_v7, %v1681_v50  ;;  %2264 = vmatpush1.bf16.msra.mxu1 %v2193_v3 }
 0x169   : > { %v7598_v53 = vmul.bf16 3216621497, %v9592_v51  ;;  %2265 = vmatprep.subr.bf16.mxu1 %v2204_v52  ;;  %v9624_v36 = vadd.bf16 %v1836_v9, %v1683_v43  ;;  %v9630_v43 = vadd.bf16 %v1829_v15, %v1682_v45 }
 0x16a   : > { %v7599_v56 = vmul.bf16 3216621497, %v9595_v33  ;;  %v1501_v41 = vpop.f32.mrb[24].mxu0 }
 0x16b   : > { %v1574_v61 = vpop.f32.mrb[24].mxu1  ;;  %8692 = vpow.bf16 %v7598_v53  ;;  %v1503_v35 = vpop.f32.mrb[25].mxu0  ;;  %v7601_v30 = vmul.bf16 3216621497, %v9624_v36  ;;  %v7600_v45 = vmul.bf16 3216621497, %v9630_v43 }
 0x16c   : > { %v1576_v62 = vpop.f32.mrb[25].mxu1  ;;  %v1505_v29 = vpop.f32.mrb[26].mxu0  ;;  %8694 = vpow.bf16 %v7599_v56  ;;  %2266 = vmatpush1.bf16.msra.mxu1 %v2203_v26 }
 0x16d   : > { %v1578_v2 = vpop.f32.mrb[26].mxu1  ;;  %v1690_v24 = vpack.c.bf16 %v1505_v29, %v1501_v41  ;;  %v1507_v42 = vpop.f32.mrb[27].mxu0 }
 0x16e   : > { %v1692_v5 = vpack.c.bf16 %v1578_v2, %v1574_v61  ;;  %v1580_v12 = vpop.f32.mrb[27].mxu1  ;;  %v8689_v14 = vpop.eup %8688  ;;  %v1691_v34 = vpack.c.bf16 %v1507_v42, %v1503_v35 }
 0x16f   : > { %v1693_v19 = vpack.c.bf16 %v1580_v12, %v1576_v62  ;;  %v2055_v31 = vadd.bf16 1065369472, %v8689_v14  ;;  %v9603_v48 = vadd.bf16 %v9544_v59, %v1690_v24  ;;  %v8691_v20 = vpop.eup %8690  ;;  %7625 = vmatmul.mubr.msk.bf16.vlgmr.msra.gmra.mrb[36].mxu1 %vm2214_vm0, %v9559_v10 }
 0x170   : > { %v9611_v21 = vadd.bf16 %v9550_v7, %v1691_v34  ;;  %v2056_v27 = vadd.bf16 1065369472, %v8691_v20  ;;  %2332 = vmatprep.mubr.bf16.mxu1 %v8808_v47  ;;  %v9641_v41 = vadd.bf16 %v1829_v15, %v1692_v5 }
 0x171   : > { %8696 = vrcp.bf16 %v2055_v31  ;;  %v7608_v32 = vmul.bf16 3216621497, %v9603_v48  ;;  %v9636_v40 = vadd.bf16 %v1836_v9, %v1693_v19 }
 0x172   : > { %8698 = vrcp.bf16 %v2056_v27  ;;  %v7609_v58 = vmul.bf16 3216621497, %v9611_v21  ;;  %v1511_v6 = vpop.f32.mrb[28].mxu0  ;;  %v7610_v62 = vmul.bf16 3216621497, %v9641_v41 }
 0x173   : > { %v1584_v11 = vpop.f32.mrb[28].mxu1  ;;  %v1513_v4 = vpop.f32.mrb[29].mxu0  ;;  %8700 = vpow.bf16 %v7608_v32  ;;  %v7611_v26 = vmul.bf16 3216621497, %v9636_v40 }
 0x174   : > { %v1586_v63 = vpop.f32.mrb[29].mxu1  ;;  %v1515_v37 = vpop.f32.mrb[30].mxu0  ;;  %8702 = vpow.bf16 %v7609_v58 }
 0x175   : > { %v1588_v39 = vpop.f32.mrb[30].mxu1  ;;  %v1700_v28 = vpack.c.bf16 %v1515_v37, %v1511_v6  ;;  %v1517_v1 = vpop.f32.mrb[31].mxu0  ;;  %8704 = vpow.bf16 %v7591_v18 }
 0x176   : > { %v8693_v44 = vpop.eup %8692  ;;  %v1702_v0 = vpack.c.bf16 %v1588_v39, %v1584_v11  ;;  %v1590_v22 = vpop.f32.mrb[31].mxu1  ;;  %v1701_v50 = vpack.c.bf16 %v1517_v1, %v1513_v4 }
 0x177   : > { %v2065_v46 = vadd.bf16 1065369472, %v8693_v44  ;;  %v1703_v52 = vpack.c.bf16 %v1590_v22, %v1586_v63  ;;  %v8695_v3 = vpop.eup %8694  ;;  %v9634_v23 = vadd.bf16 %v9544_v59, %v1700_v28 }
 0x178   : > { %v2066_v53 = vadd.bf16 1065369472, %v8695_v3  ;;  %v9639_v56 = vadd.bf16 %v9550_v7, %v1701_v50  ;;  %v9650_v24 = vadd.bf16 %v1829_v15, %v1702_v0 }
 0x179   : > { %8706 = vrcp.bf16 %v2065_v46  ;;  %v7618_v61 = vmul.bf16 3216621497, %v9634_v23  ;;  %v9646_v59 = vadd.bf16 %v1836_v9, %v1703_v52 }
 0x17a   : > { %8708 = vpow.bf16 %v7590_v57  ;;  %v7619_v25 = vmul.bf16 3216621497, %v9639_v56  ;;  %v7620_v20 = vmul.bf16 3216621497, %v9650_v24 }
 0x17b   : > { %8710 = vrcp.bf16 %v2066_v53  ;;  %v7621_v5 = vmul.bf16 3216621497, %v9646_v59 }
 0x17c   : > { %v8697_v38 = vpop.eup %8696  ;;  %8712 = vpow.bf16 %v7601_v30 }
 0x17d   : > { %8714 = vpow.bf16 %v7618_v61  ;;  %v8699_v35 = vpop.eup %8698  ;;  %v2100_v7 = vmul.bf16 1065369472, %v8697_v38 }
 0x17e   : > { %8716 = vpow.bf16 %v7619_v25  ;;  %v2102_v29 = vmul.bf16 1065369472, %v8699_v35  ;;  %v8701_v2 = vpop.eup %8700 }
 0x17f   : > { %8718 = vpow.bf16 %v7600_v45  ;;  %v2075_v42 = vadd.bf16 1065369472, %v8701_v2  ;;  %v8703_v12 = vpop.eup %8702  ;;  %v2175_v14 = vmul.bf16 %v2100_v7, %v9565_v16 }
 0x180   : > { %8720 = vpow.bf16 %v7611_v26  ;;  %v2176_v9 = vmul.bf16 %v2102_v29, %v9568_v17  ;;  %v8705_v34 = vpop.eup %8704  ;;  %v2076_v19 = vadd.bf16 1065369472, %v8703_v12 }
 0x181   : > { %8722 = vpow.bf16 %v7610_v62  ;;  %v2058_v32 = vadd.bf16 1065369472, %v8705_v34 }
 0x182   : > { %8724 = vrcp.bf16 %v2075_v42  ;;  %2300 = vmatprep.subr.bf16.mxu1 %v2176_v9 }
 0x183   : > { %8726 = vpow.bf16 %v7621_v5  ;;  %2301 = vmatpush1.bf16.msra.mxu1 %v2175_v14 }
 0x184   : > { %v8707_v31 = vpop.eup %8706  ;;  %8728 = vrcp.bf16 %v2076_v19 }
 0x185   : > { %v8709_v15 = vpop.eup %8708  ;;  %v2120_v58 = vmul.bf16 1065369472, %v8707_v31  ;;  %8730 = vpow.bf16 %v7620_v20 }
 0x186   : > { %v8711_v27 = vpop.eup %8710  ;;  %v2057_v63 = vadd.bf16 1065369472, %v8709_v15  ;;  %8732 = vrcp.bf16 %v2058_v32 }
 0x187   : > { %v8713_v6 = vpop.eup %8712  ;;  %v2122_v17 = vmul.bf16 1065369472, %v8711_v27  ;;  %v2185_v37 = vmul.bf16 %v2120_v58, %v9592_v51 }
 0x188   : > { %v8715_v11 = vpop.eup %8714  ;;  %v2068_v44 = vadd.bf16 1065369472, %v8713_v6 }
 0x189   : > { %v2085_v16 = vadd.bf16 1065369472, %v8715_v11  ;;  %v2186_v18 = vmul.bf16 %v2122_v17, %v9595_v33  ;;  %v8717_v4 = vpop.eup %8716  ;;  %v7583_v33 = vld.sshfl [vmem:[%s11837_s2 + $0x8] sm:$0x11 pattern:$0x75316420] }
 0x18a   : > { %v8719_v39 = vpop.eup %8718  ;;  %v2086_v57 = vadd.bf16 1065369472, %v8717_v4  ;;  %v1766_v30 = vcombine.high %v7583_v33, %v7583_v33  ;;  %v1773_v26 = vrot.slane %v7583_v33, %v9426_v13 }
 0x18b   : > { %8734 = vrcp.bf16 %v2085_v16  ;;  %2302 = vmatprep.subr.bf16.mxu1 %v2186_v18  ;;  %v8721_v28 = vpop.eup %8720  ;;  %v2067_v22 = vadd.bf16 1065369472, %v8719_v39 }
 0x18c   : > { %2303 = vmatpush1.bf16.msra.mxu1 %v2185_v37  ;;  %v8723_v0 = vpop.eup %8722  ;;  %8736 = vrcp.bf16 %v2086_v57  ;;  %v2078_v50 = vadd.bf16 1065369472, %v8721_v28  ;;  %v1780_v7 = vrot.slane %v1766_v30, %v9426_v13  ;;  %v1838_v42 = vpack.i.b16 %v1773_v26, %v1773_v26 }
 0x18d   : > { %v8725_v1 = vpop.eup %8724  ;;  %8738 = vrcp.bf16 %v2057_v63  ;;  %v2077_v53 = vadd.bf16 1065369472, %v8723_v0 }
 0x18e   : > { %v8727_v46 = vpop.eup %8726  ;;  %8740 = vrcp.bf16 %v2068_v44  ;;  %v2140_v52 = vmul.bf16 1065369472, %v8725_v1  ;;  %v9668_v27 = vrot.slane %v1838_v42, %v9438_v54 }
 0x18f   : > { %v8729_v51 = vpop.eup %8728  ;;  %8742 = vrcp.bf16 %v2067_v22  ;;  %v2088_v25 = vadd.bf16 1065369472, %v8727_v46 }
 0x190   : > { %v2142_v3 = vmul.bf16 1065369472, %v8729_v51  ;;  %v8731_v61 = vpop.eup %8730  ;;  %8744 = vrcp.bf16 %v2078_v50  ;;  %v2195_v45 = vmul.bf16 %v2140_v52, %v9603_v48 }
 0x191   : > { %v8733_v35 = vpop.eup %8732  ;;  %8746 = vrcp.bf16 %v2077_v53  ;;  %v2087_v29 = vadd.bf16 1065369472, %v8731_v61 }
 0x192   : > { %v2196_v38 = vmul.bf16 %v2142_v3, %v9611_v21  ;;  %8748 = vrcp.bf16 %v2088_v25  ;;  %v2106_v14 = vmul.bf16 1065369472, %v8733_v35  ;;  %v1845_v21 = vpack.i.b16 %v1780_v7, %v1780_v7 }
 0x193   : > { %8750 = vrcp.bf16 %v2087_v29 }
 0x194   : > { %2304 = vmatprep.subr.bf16.mxu1 %v2196_v38  ;;  %v2178_v58 = vmul.bf16 %v2106_v14, %v9608_v55  ;;  %v9672_v11 = vrot.slane %v1845_v21, %v9438_v54 }
 0x195   : > { %2305 = vmatpush1.bf16.msra.mxu1 %v2195_v45 }
 0x196   : > { %v8735_v62 = vpop.eup %8734 }
 0x197   : > { %v8737_v2 = vpop.eup %8736  ;;  %v2160_v5 = vmul.bf16 1065369472, %v8735_v62 }
 0x198   : > { %v8739_v9 = vpop.eup %8738  ;;  %v2162_v12 = vmul.bf16 1065369472, %v8737_v2 }
 0x199   : > { %v8741_v34 = vpop.eup %8740  ;;  %v2104_v31 = vmul.bf16 1065369472, %v8739_v9  ;;  %v2205_v20 = vmul.bf16 %v2160_v5, %v9634_v23 }
 0x19a   : > { %v2206_v48 = vmul.bf16 %v2162_v12, %v9639_v56  ;;  %v8743_v32 = vpop.eup %8742  ;;  %v2126_v6 = vmul.bf16 1065369472, %v8741_v34 }
 0x19b   : > { %v1627_v19 = vpop.f32.mrb[32].mxu0  ;;  %v8745_v16 = vpop.eup %8744  ;;  %v2177_v23 = vmul.bf16 %v2104_v31, %v9620_v60  ;;  %v2124_v63 = vmul.bf16 1065369472, %v8743_v32 }
 0x19c   : > { %v1629_v15 = vpop.f32.mrb[33].mxu0  ;;  %2306 = vmatprep.subr.bf16.mxu1 %v2206_v48  ;;  %v8747_v39 = vpop.eup %8746  ;;  %v2188_v55 = vmul.bf16 %v2126_v6, %v9624_v36  ;;  %v2146_v44 = vmul.bf16 1065369472, %v8745_v16 }
 0x19d   : > { %v1631_v17 = vpop.f32.mrb[34].mxu0  ;;  %2307 = vmatpush1.bf16.msra.mxu1 %v2205_v20  ;;  %v8749_v28 = vpop.eup %8748  ;;  %v2187_v22 = vmul.bf16 %v2124_v63, %v9630_v43  ;;  %v2144_v33 = vmul.bf16 1065369472, %v8747_v39 }
 0x19e   : > { %v1674_v56 = vpack.c.bf16 %v1631_v17, %v1627_v19  ;;  %v1633_v18 = vpop.f32.mrb[35].mxu0  ;;  %2341 = vmatprep.subr.bf16.mxu1 %v2178_v58  ;;  %v8751_v36 = vpop.eup %8750  ;;  %v2198_v50 = vmul.bf16 %v2146_v44, %v9636_v40  ;;  %v2166_v51 = vmul.bf16 1065369472, %v8749_v28 }
 0x19f   : > { %v1675_v4 = vpack.c.bf16 %v1633_v18, %v1629_v15  ;;  %v2197_v53 = vmul.bf16 %v2144_v33, %v9641_v41  ;;  %v2164_v61 = vmul.bf16 1065369472, %v8751_v36 }
 0x1a0   : > { %v9676_v37 = vadd.bf16 %v9668_v27, %v1674_v56  ;;  %7626 = vmatmul.mubr.msk.bf16.vlgmr.msra.gmra.mrb[40].mxu1 %vm2214_vm0, %v9559_v10  ;;  %v2208_v43 = vmul.bf16 %v2166_v51, %v9646_v59 }
 0x1a1   : > { %v9682_v57 = vadd.bf16 %v9672_v11, %v1675_v4  ;;  %2342 = vmatpush1.bf16.msra.mxu1 %v2177_v23  ;;  %2373 = vmatprep.mubr.bf16.mxu1 %v8808_v47  ;;  %v2207_v35 = vmul.bf16 %v2164_v61, %v9650_v24  ;;  %v2584_v61 = vld [vmem:[%s11839_s4 + $0x40] sm:$0xff] }
 0x1a2   : > { %v7592_v60 = vmul.bf16 3216621497, %v9676_v37  ;;  %2343 = vmatprep.subr.bf16.mxu1 %v2188_v55 }
 0x1a3   : > { %v7593_v0 = vmul.bf16 3216621497, %v9682_v57  ;;  %v1637_v1 = vpop.f32.mrb[36].mxu0 }
 0x1a4   : > { %8752 = vpow.bf16 %v7592_v60  ;;  %v1639_v46 = vpop.f32.mrb[37].mxu0 }
 0x1a5   : > { %8754 = vpow.bf16 %v7593_v0  ;;  %v1641_v52 = vpop.f32.mrb[38].mxu0  ;;  %2344 = vmatpush1.bf16.msra.mxu1 %v2187_v22 }
 0x1a6   : > { %v1684_v3 = vpack.c.bf16 %v1641_v52, %v1637_v1  ;;  %v1643_v47 = vpop.f32.mrb[39].mxu0  ;;  %2345 = vmatprep.subr.bf16.mxu1 %v2198_v50 }
 0x1a7   : > { %v1685_v30 = vpack.c.bf16 %v1643_v47, %v1639_v46  ;;  %v2580_v47 = vld [vmem:[%s11839_s4 + $0x20] sm:$0xff] }
 0x1a8   : > { %v9691_v25 = vadd.bf16 %v9668_v27, %v1684_v3 }
 0x1a9   : > { %v9695_v38 = vadd.bf16 %v9672_v11, %v1685_v30  ;;  %2346 = vmatpush1.bf16.msra.mxu1 %v2197_v53 }
 0x1aa   : > { %v7602_v40 = vmul.bf16 3216621497, %v9691_v25  ;;  %2347 = vmatprep.subr.bf16.mxu1 %v2208_v43 }
 0x1ab   : > { %v7603_v45 = vmul.bf16 3216621497, %v9695_v38  ;;  %v1647_v26 = vpop.f32.mrb[40].mxu0 }
 0x1ac   : > { %8756 = vpow.bf16 %v7602_v40  ;;  %v1649_v41 = vpop.f32.mrb[41].mxu0  ;;  %v2592_v40 = vld [vmem:[%s11839_s4 + $0x80] sm:$0xff] }
 0x1ad   : > { %8758 = vpow.bf16 %v7603_v45  ;;  %v1651_v7 = vpop.f32.mrb[42].mxu0  ;;  %2348 = vmatpush1.bf16.msra.mxu1 %v2207_v35  ;;  %v2596_v35 = vld [vmem:[%s11839_s4 + $0xa0] sm:$0xff] }
 0x1ae   : > { %v1694_v62 = vpack.c.bf16 %v1651_v7, %v1647_v26  ;;  %v1653_v29 = vpop.f32.mrb[43].mxu0 }
 0x1af   : > { %v8753_v59 = vpop.eup %8752  ;;  %v1695_v2 = vpack.c.bf16 %v1653_v29, %v1649_v41  ;;  %v7646_v29 = vcombine.high %v2592_v40, %v2596_v35 }
 0x1b0   : > { %v8755_v5 = vpop.eup %8754  ;;  %v2059_v42 = vadd.bf16 1065369472, %v8753_v59  ;;  %v9701_v9 = vadd.bf16 %v9668_v27, %v1694_v62  ;;  %7627 = vmatmul.mubr.msk.bf16.vlgmr.msra.gmra.mrb[44].mxu1 %vm2214_vm0, %v9559_v10 }
 0x1b1   : > { %v2060_v12 = vadd.bf16 1065369472, %v8755_v5  ;;  %v9706_v24 = vadd.bf16 %v9672_v11, %v1695_v2  ;;  %v2600_v2 = vld [vmem:[%s11839_s4 + $0xc0] sm:$0xff] }
 0x1b2   : > { %8760 = vrcp.bf16 %v2059_v42  ;;  %v7612_v14 = vmul.bf16 3216621497, %v9701_v9  ;;  %v2604_v5 = vld [vmem:[%s11839_s4 + $0xe0] sm:$0xff]  ;;  %v7645_v42 = vcombine.low %v2592_v40, %v2596_v35  ;;  %v2637_v35 = vld [vmem:[%s11839_s4 + $0x1e8] sm:$0xff] }
 0x1b3   : > { %8762 = vrcp.bf16 %v2060_v12  ;;  %v7613_v21 = vmul.bf16 3216621497, %v9706_v24  ;;  %v1657_v34 = vpop.f32.mrb[44].mxu0  ;;  %v7654_v12 = vcombine.high %v2600_v2, %v2604_v5  ;;  %v2636_v40 = vld [vmem:[%s11839_s4 + $0x1e0] sm:$0xff] }
 0x1b4   : > { %8764 = vpow.bf16 %v7612_v14  ;;  %v1659_v48 = vpop.f32.mrb[45].mxu0 }
 0x1b5   : > { %8766 = vpow.bf16 %v7613_v21  ;;  %v1661_v19 = vpop.f32.mrb[46].mxu0 }
 0x1b6   : > { %v1704_v31 = vpack.c.bf16 %v1661_v19, %v1657_v34  ;;  %v1663_v20 = vpop.f32.mrb[47].mxu0  ;;  %v2581_v19 = vld [vmem:[%s11839_s4 + $0x28] sm:$0xff] }
 0x1b7   : > { %v8757_v15 = vpop.eup %8756  ;;  %v1705_v32 = vpack.c.bf16 %v1663_v20, %v1659_v48  ;;  %v2577_v48 = vld [vmem:[%s11839_s4 + $0x8] sm:$0xff]  ;;  %v7653_v20 = vcombine.low %v2600_v2, %v2604_v5 }
 0x1b8   : > { %v8759_v58 = vpop.eup %8758  ;;  %v2069_v6 = vadd.bf16 1065369472, %v8757_v15  ;;  %v9711_v17 = vadd.bf16 %v9668_v27, %v1704_v31  ;;  %v2641_v2 = vld [vmem:[%s11839_s4 + $0x208] sm:$0xff] }
 0x1b9   : > { %v2070_v16 = vadd.bf16 1065369472, %v8759_v58  ;;  %v9714_v56 = vadd.bf16 %v9672_v11, %v1705_v32 }
 0x1ba   : > { %8768 = vrcp.bf16 %v2069_v6  ;;  %v7622_v18 = vmul.bf16 3216621497, %v9711_v17  ;;  %v7632_v6 = vcombine.high %v2577_v48, %v2581_v19 }
 0x1bb   : > { %8770 = vrcp.bf16 %v2070_v16  ;;  %v7623_v4 = vmul.bf16 3216621497, %v9714_v56  ;;  %v2585_v16 = vld [vmem:[%s11839_s4 + $0x48] sm:$0xff] }
 0x1bc   : > { %8772 = vpow.bf16 %v7622_v18  ;;  %v2589_v18 = vld [vmem:[%s11839_s4 + $0x68] sm:$0xff] }
 0x1bd   : > { %v8761_v23 = vpop.eup %8760  ;;  %8774 = vpow.bf16 %v7623_v4 }
 0x1be   : > { %v8763_v63 = vpop.eup %8762  ;;  %v2108_v39 = vmul.bf16 1065369472, %v8761_v23  ;;  %v7631_v23 = vcombine.low %v2577_v48, %v2581_v19  ;;  %v2653_v19 = vld [vmem:[%s11839_s4 + $0x268] sm:$0xff] }
 0x1bf   : > { %v8765_v55 = vpop.eup %8764  ;;  %v2110_v44 = vmul.bf16 1065369472, %v8763_v63  ;;  %v2597_v63 = vld [vmem:[%s11839_s4 + $0xa8] sm:$0xff] }
 0x1c0   : > { %v8767_v28 = vpop.eup %8766  ;;  %v2179_v27 = vmul.bf16 %v2108_v39, %v9676_v37  ;;  %v2079_v60 = vadd.bf16 1065369472, %v8765_v55  ;;  %v7639_v39 = vcombine.low %v2585_v16, %v2589_v18 }
 0x1c1   : > { %v2080_v0 = vadd.bf16 1065369472, %v8767_v28  ;;  %v2180_v11 = vmul.bf16 %v2110_v44, %v9682_v57  ;;  %v2576_v57 = vld [vmem:[%s11839_s4] sm:$0xff]  ;;  %v2601_v44 = vld [vmem:[%s11839_s4 + $0xc8] sm:$0xff] }
 0x1c2   : > { %8776 = vrcp.bf16 %v2079_v60  ;;  %v7629_v30 = vcombine.low %v2576_v57, %v2580_v47  ;;  %v7630_v53 = vcombine.high %v2576_v57, %v2580_v47  ;;  %v2605_v28 = vld [vmem:[%s11839_s4 + $0xe8] sm:$0xff]  ;;  %v2628_v57 = vld [vmem:[%s11839_s4 + $0x1a0] sm:$0xff] }
 0x1c3   : > { %8778 = vrcp.bf16 %v2080_v0  ;;  %2382 = vmatprep.subr.bf16.mxu0 %v2180_v11  ;;  %v7656_v60 = vcombine.high %v2601_v44, %v2605_v28  ;;  %v2613_v0 = vld [vmem:[%s11839_s4 + $0x128] sm:$0xff]  ;;  %v7655_v11 = vcombine.low %v2601_v44, %v2605_v28 }
 0x1c4   : > { %2383 = vmatpush1.bf16.msra.mxu0 %v2179_v27  ;;  %6458 = vmatprep.subr.bf16.mxu1 %v7630_v53  ;;  %v2625_v47 = vld [vmem:[%s11839_s4 + $0x188] sm:$0xff] }
 0x1c5   : > { %v8769_v1 = vpop.eup %8768  ;;  %6459 = vmatpush1.bf16.msra.mxu1 %v7629_v30  ;;  %v2629_v53 = vld [vmem:[%s11839_s4 + $0x1a8] sm:$0xff] }
 0x1c6   : > { %v8771_v22 = vpop.eup %8770  ;;  %v2128_v33 = vmul.bf16 1065369472, %v8769_v1  ;;  %v2669_v44 = vld [vmem:[%s11839_s4 + $0x2e8] sm:$0xff] }
 0x1c7   : > { %v8773_v46 = vpop.eup %8772  ;;  %v2130_v36 = vmul.bf16 1065369472, %v8771_v22  ;;  %v2616_v22 = vld [vmem:[%s11839_s4 + $0x140] sm:$0xff] }
 0x1c8   : > { %v8775_v50 = vpop.eup %8774  ;;  %v2189_v51 = vmul.bf16 %v2128_v33, %v9691_v25  ;;  %v2089_v52 = vadd.bf16 1065369472, %v8773_v46  ;;  %v2588_v25 = vld [vmem:[%s11839_s4 + $0x60] sm:$0xff]  ;;  %v2617_v46 = vld [vmem:[%s11839_s4 + $0x148] sm:$0xff] }
 0x1c9   : > { %v2090_v3 = vadd.bf16 1065369472, %v8775_v50  ;;  %v2190_v37 = vmul.bf16 %v2130_v36, %v9695_v38  ;;  %v7638_v38 = vcombine.high %v2584_v61, %v2588_v25  ;;  %v7637_v7 = vcombine.low %v2584_v61, %v2588_v25  ;;  %v2620_v33 = vld [vmem:[%s11839_s4 + $0x160] sm:$0xff]  ;;  %v2621_v50 = vld [vmem:[%s11839_s4 + $0x168] sm:$0xff] }
 0x1ca   : > { %8780 = vrcp.bf16 %v2089_v52  ;;  %v7670_v36 = vcombine.high %v2616_v22, %v2620_v33  ;;  %v7669_v52 = vcombine.low %v2616_v22, %v2620_v33  ;;  %v7671_v61 = vcombine.low %v2617_v46, %v2621_v50  ;;  %v2677_v22 = vld [vmem:[%s11839_s4 + $0x328] sm:$0xff] }
 0x1cb   : > { %8782 = vrcp.bf16 %v2090_v3  ;;  %2384 = vmatprep.subr.bf16.mxu0 %v2190_v37  ;;  %6460 = vmatprep.subr.bf16.mxu1 %v7638_v38  ;;  %v7672_v3 = vcombine.high %v2617_v46, %v2621_v50  ;;  %v2624_v37 = vld [vmem:[%s11839_s4 + $0x180] sm:$0xff] }
 0x1cc   : > { %2385 = vmatpush1.bf16.msra.mxu0 %v2189_v51  ;;  %6461 = vmatpush1.bf16.msra.mxu1 %v7637_v7  ;;  %v7678_v30 = vcombine.high %v2624_v37, %v2628_v57  ;;  %v7677_v25 = vcombine.low %v2624_v37, %v2628_v57  ;;  %v2632_v38 = vld [vmem:[%s11839_s4 + $0x1c0] sm:$0xff]  ;;  %v2685_v37 = vld [vmem:[%s11839_s4 + $0x368] sm:$0xff] }
 0x1cd   : > { %v8777_v43 = vpop.eup %8776  ;;  %6462 = vmatprep.subr.bf16.mxu1 %v7646_v29  ;;  %v7685_v7 = vcombine.low %v2632_v38, %v2636_v40  ;;  %v2640_v29 = vld [vmem:[%s11839_s4 + $0x200] sm:$0xff] }
 0x1ce   : > { %v8779_v45 = vpop.eup %8778  ;;  %v2148_v26 = vmul.bf16 1065369472, %v8777_v43  ;;  %v7680_v43 = vcombine.high %v2625_v47, %v2629_v53  ;;  %v2680_v50 = vld [vmem:[%s11839_s4 + $0x340] sm:$0xff] }
 0x1cf   : > { %v2150_v41 = vmul.bf16 1065369472, %v8779_v45  ;;  %v2633_v45 = vld [vmem:[%s11839_s4 + $0x1c8] sm:$0xff] }
 0x1d0   : > { %v2199_v62 = vmul.bf16 %v2148_v26, %v9701_v9  ;;  %v2608_v9 = vld [vmem:[%s11839_s4 + $0x100] sm:$0xff]  ;;  %6463 = vmatpush1.bf16.msra.mxu1 %v7645_v42  ;;  %v7686_v26 = vcombine.high %v2632_v38, %v2636_v40  ;;  %v2645_v42 = vld [vmem:[%s11839_s4 + $0x228] sm:$0xff] }
 0x1d1   : > { %v2200_v59 = vmul.bf16 %v2150_v41, %v9706_v24  ;;  %v2612_v24 = vld [vmem:[%s11839_s4 + $0x120] sm:$0xff]  ;;  %6464 = vmatprep.subr.bf16.mxu1 %v7654_v12  ;;  %v7679_v41 = vcombine.low %v2625_v47, %v2629_v53  ;;  %v7687_v12 = vcombine.low %v2633_v45, %v2637_v35  ;;  %v2693_v38 = vld [vmem:[%s11839_s4 + $0x3a8] sm:$0xff] }
 0x1d2   : > { %v7662_v32 = vcombine.high %v2608_v9, %v2612_v24  ;;  %v7661_v4 = vcombine.low %v2608_v9, %v2612_v24  ;;  %v7696_v9 = vcombine.high %v2641_v2, %v2645_v42  ;;  %v2648_v24 = vld [vmem:[%s11839_s4 + $0x240] sm:$0xff] }
 0x1d3   : > { %2386 = vmatprep.subr.bf16.mxu0 %v2200_v59  ;;  %v2644_v59 = vld [vmem:[%s11839_s4 + $0x220] sm:$0xff] }
 0x1d4   : > { %2387 = vmatpush1.bf16.msra.mxu0 %v2199_v62  ;;  %6465 = vmatpush1.bf16.msra.mxu1 %v7653_v20  ;;  %v7688_v62 = vcombine.high %v2633_v45, %v2637_v35  ;;  %v7694_v5 = vcombine.high %v2640_v29, %v2644_v59  ;;  %v2688_v53 = vld [vmem:[%s11839_s4 + $0x380] sm:$0xff] }
 0x1d5   : > { %v8781_v14 = vpop.eup %8780  ;;  %6466 = vmatprep.subr.bf16.mxu1 %v7662_v32  ;;  %v2656_v32 = vld [vmem:[%s11839_s4 + $0x280] sm:$0xff] }
 0x1d6   : > { %v8783_v21 = vpop.eup %8782  ;;  %v2168_v34 = vmul.bf16 1065369472, %v8781_v14  ;;  %v7693_v14 = vcombine.low %v2640_v29, %v2644_v59  ;;  %v2696_v35 = vld [vmem:[%s11839_s4 + $0x3c0] sm:$0xff]  ;;  %v2701_v59 = vld [vmem:[%s11839_s4 + $0x3e8] sm:$0xff] }
 0x1d7   : > { %v2170_v31 = vmul.bf16 1065369472, %v8783_v21  ;;  %v2652_v21 = vld [vmem:[%s11839_s4 + $0x260] sm:$0xff] }
 0x1d8   : > { %v2209_v15 = vmul.bf16 %v2168_v34, %v9711_v17  ;;  %v7640_v17 = vcombine.high %v2585_v16, %v2589_v18  ;;  %6467 = vmatpush1.bf16.msra.mxu1 %v7661_v4  ;;  %v2649_v34 = vld [vmem:[%s11839_s4 + $0x248] sm:$0xff]  ;;  %v7702_v48 = vcombine.high %v2648_v24, %v2652_v21  ;;  %v7701_v20 = vcombine.low %v2648_v24, %v2652_v21 }
 0x1d9   : > { %v2210_v58 = vmul.bf16 %v2170_v31, %v9714_v56  ;;  %v2593_v56 = vld [vmem:[%s11839_s4 + $0x88] sm:$0xff]  ;;  %6468 = vmatprep.subr.bf16.mxu1 %v7670_v36  ;;  %v7695_v31 = vcombine.low %v2641_v2, %v2645_v42  ;;  %v7703_v4 = vcombine.low %v2649_v34, %v2653_v19  ;;  %v9923_v42 = vld [vmem:[%s11839_s4 + $0x400] sm:$0xff] }
 0x1da   : > { %v7648_v55 = vcombine.high %v2593_v56, %v2597_v63  ;;  %v7647_v27 = vcombine.low %v2593_v56, %v2597_v63  ;;  %v2661_v18 = vld [vmem:[%s11839_s4 + $0x2a8] sm:$0xff]  ;;  %v2664_v56 = vld [vmem:[%s11839_s4 + $0x2c0] sm:$0xff] }
 0x1db   : > { %2388 = vmatprep.subr.bf16.mxu0 %v2210_v58  ;;  %v2660_v58 = vld [vmem:[%s11839_s4 + $0x2a0] sm:$0xff]  ;;  %v9940_v24 = vld [vmem:[%s11839_s4 + $0x428] sm:$0xff] }
 0x1dc   : > { %2389 = vmatpush1.bf16.msra.mxu0 %v2209_v15  ;;  %6469 = vmatpush1.bf16.msra.mxu1 %v7669_v52  ;;  %v7704_v15 = vcombine.high %v2649_v34, %v2653_v19  ;;  %v7710_v16 = vcombine.high %v2656_v32, %v2660_v58  ;;  %v2668_v63 = vld [vmem:[%s11839_s4 + $0x2e0] sm:$0xff]  ;;  %v2681_v52 = vld [vmem:[%s11839_s4 + $0x348] sm:$0xff] }
 0x1dd   : > { %6663 = vmatprep.subr.bf16.mxu0 %v7632_v6  ;;  %6470 = vmatprep.subr.bf16.mxu1 %v7678_v30  ;;  %v2657_v6 = vld [vmem:[%s11839_s4 + $0x288] sm:$0xff]  ;;  %v7736_v30 = vcombine.high %v2681_v52, %v2685_v37  ;;  %v7735_v40 = vcombine.low %v2681_v52, %v2685_v37  ;;  %v9955_v52 = vsub.s32 1, %v9423_v8 }
 0x1de   : > { %v7711_v28 = vcombine.low %v2657_v6, %v2661_v18 }
 0x1df   : > { %7628 = vmatmul.mubr.msk.bf16.vlgmr.msra.gmra.mrb[48].mxu0 %vm2214_vm0, %v9559_v10  ;;  %v2609_v10 = vld [vmem:[%s11839_s4 + $0x108] sm:$0xff] }
 0x1e0   : > { %6664 = vmatpush1.bf16.msra.mxu0 %v7631_v23  ;;  %v7664_v1 = vcombine.high %v2609_v10, %v2613_v0  ;;  %v7663_v51 = vcombine.low %v2609_v10, %v2613_v0  ;;  %6471 = vmatpush1.bf16.msra.mxu1 %v7677_v25  ;;  %v7709_v23 = vcombine.low %v2656_v32, %v2660_v58  ;;  %v2672_v10 = vld [vmem:[%s11839_s4 + $0x300] sm:$0xff]  ;;  %v2689_v25 = vld [vmem:[%s11839_s4 + $0x388] sm:$0xff] }
 0x1e1   : > { %6665 = vmatprep.subr.bf16.mxu0 %v7640_v17  ;;  %6472 = vmatprep.subr.bf16.mxu1 %v7686_v26  ;;  %v7712_v17 = vcombine.high %v2657_v6, %v2661_v18  ;;  %v2676_v0 = vld [vmem:[%s11839_s4 + $0x320] sm:$0xff]  ;;  %v7744_v26 = vcombine.high %v2689_v25, %v2693_v38  ;;  %v7743_v2 = vcombine.low %v2689_v25, %v2693_v38  ;;  %v2713_v25 = vld [vmem:[%s11839_s4 + $0x448] sm:$0xff] }
 0x1e2   : > { %v7725_v46 = vcombine.low %v2672_v10, %v2676_v0 }
 0x1e4   : > { %6666 = vmatpush1.bf16.msra.mxu0 %v7639_v39  ;;  %6473 = vmatpush1.bf16.msra.mxu1 %v7685_v7  ;;  %v2665_v39 = vld [vmem:[%s11839_s4 + $0x2c8] sm:$0xff] }
 0x1e5   : > { %6667 = vmatprep.subr.bf16.mxu0 %v7648_v55  ;;  %6474 = vmatprep.subr.bf16.mxu1 %v7694_v5  ;;  %v7718_v55 = vcombine.high %v2664_v56, %v2668_v63  ;;  %v7719_v33 = vcombine.low %v2665_v39, %v2669_v44  ;;  %v2697_v7 = vld [vmem:[%s11839_s4 + $0x3c8] sm:$0xff] }
 0x1e6   : > { %v7752_v5 = vcombine.high %v2697_v7, %v2701_v59  ;;  %v7751_v21 = vcombine.low %v2697_v7, %v2701_v59  ;;  %v2721_v7 = vld [vmem:[%s11839_s4 + $0x488] sm:$0xff] }
 0x1e8   : > { %6668 = vmatpush1.bf16.msra.mxu0 %v7647_v27  ;;  %6475 = vmatpush1.bf16.msra.mxu1 %v7693_v14  ;;  %v7717_v27 = vcombine.low %v2664_v56, %v2668_v63  ;;  %v9933_v14 = vld [vmem:[%s11839_s4 + $0x408] sm:$0xff] }
 0x1e9   : > { %6669 = vmatprep.subr.bf16.mxu0 %v7656_v60  ;;  %6476 = vmatprep.subr.bf16.mxu1 %v7702_v48  ;;  %v7720_v60 = vcombine.high %v2665_v39, %v2669_v44  ;;  %v7759_v48 = vcombine.low %v9933_v14, %v9940_v24  ;;  %v7760_v19 = vcombine.high %v9933_v14, %v9940_v24  ;;  %v2732_v14 = vld [vmem:[%s11839_s4 + $0x4e0] sm:$0xff]  ;;  %v2733_v24 = vld [vmem:[%s11839_s4 + $0x4e8] sm:$0xff] }
 0x1ec   : > { %6670 = vmatpush1.bf16.msra.mxu0 %v7655_v11  ;;  %6477 = vmatpush1.bf16.msra.mxu1 %v7701_v20  ;;  %v2673_v11 = vld [vmem:[%s11839_s4 + $0x308] sm:$0xff] }
 0x1ed   : > { %6671 = vmatprep.subr.bf16.mxu0 %v7664_v1  ;;  %6478 = vmatprep.subr.bf16.mxu1 %v7710_v16  ;;  %v7726_v1 = vcombine.high %v2672_v10, %v2676_v0  ;;  %v7728_v36 = vcombine.high %v2673_v11, %v2677_v22  ;;  %v7727_v57 = vcombine.low %v2673_v11, %v2677_v22 }
 0x1f0   : > { %6672 = vmatpush1.bf16.msra.mxu0 %v7663_v51  ;;  %6479 = vmatpush1.bf16.msra.mxu1 %v7709_v23  ;;  %v2684_v51 = vld [vmem:[%s11839_s4 + $0x360] sm:$0xff] }
 0x1f1   : > { %6673 = vmatprep.subr.bf16.mxu0 %v7672_v3  ;;  %6480 = vmatprep.subr.bf16.mxu1 %v7718_v55  ;;  %v7734_v3 = vcombine.high %v2680_v50, %v2684_v51  ;;  %v7733_v47 = vcombine.low %v2680_v50, %v2684_v51 }
 0x1f4   : > { %6674 = vmatpush1.bf16.msra.mxu0 %v7671_v61  ;;  %6481 = vmatpush1.bf16.msra.mxu1 %v7717_v27  ;;  %v2692_v61 = vld [vmem:[%s11839_s4 + $0x3a0] sm:$0xff] }
 0x1f5   : > { %6675 = vmatprep.subr.bf16.mxu0 %v7680_v43  ;;  %6482 = vmatprep.subr.bf16.mxu1 %v7726_v1  ;;  %v7742_v43 = vcombine.high %v2688_v53, %v2692_v61  ;;  %v7741_v45 = vcombine.low %v2688_v53, %v2692_v61  ;;  %v2716_v61 = vld [vmem:[%s11839_s4 + $0x460] sm:$0xff] }
 0x1f8   : > { %6676 = vmatpush1.bf16.msra.mxu0 %v7679_v41  ;;  %6483 = vmatpush1.bf16.msra.mxu1 %v7725_v46  ;;  %v2700_v41 = vld [vmem:[%s11839_s4 + $0x3e0] sm:$0xff] }
 0x1f9   : > { %6677 = vmatprep.subr.bf16.mxu0 %v7688_v62  ;;  %6484 = vmatprep.subr.bf16.mxu1 %v7734_v3  ;;  %v7749_v62 = vcombine.low %v2696_v35, %v2700_v41  ;;  %v7750_v29 = vcombine.high %v2696_v35, %v2700_v41  ;;  %v2530_v3 = vsub.s32 3, %v9423_v8  ;;  %v2724_v41 = vld [vmem:[%s11839_s4 + $0x4a0] sm:$0xff] }
 0x1fc   : > { %6678 = vmatpush1.bf16.msra.mxu0 %v7687_v12  ;;  %6485 = vmatpush1.bf16.msra.mxu1 %v7733_v47  ;;  %v9928_v12 = vld [vmem:[%s11839_s4 + $0x420] sm:$0xff] }
 0x1fd   : > { %6679 = vmatprep.subr.bf16.mxu0 %v7696_v9  ;;  %6486 = vmatprep.subr.bf16.mxu1 %v7742_v43  ;;  %v7758_v9 = vcombine.high %v9923_v42, %v9928_v12  ;;  %v7757_v34 = vcombine.low %v9923_v42, %v9928_v12  ;;  %v2717_v43 = vld [vmem:[%s11839_s4 + $0x468] sm:$0xff]  ;;  %v2728_v12 = vld [vmem:[%s11839_s4 + $0x4c0] sm:$0xff] }
 0x1fe   : > { %v7768_v35 = vcombine.high %v2713_v25, %v2717_v43 }
 0x200   : > { %6680 = vmatpush1.bf16.msra.mxu0 %v7695_v31  ;;  %6487 = vmatpush1.bf16.msra.mxu1 %v7741_v45  ;;  %v2720_v45 = vld [vmem:[%s11839_s4 + $0x480] sm:$0xff] }
 0x201   : > { %6681 = vmatprep.subr.bf16.mxu0 %v7704_v15  ;;  %6488 = vmatprep.subr.bf16.mxu1 %v7750_v29 }
 0x204   : > { %6682 = vmatpush1.bf16.msra.mxu0 %v7703_v4  ;;  %6489 = vmatpush1.bf16.msra.mxu1 %v7749_v62  ;;  %v2725_v62 = vld [vmem:[%s11839_s4 + $0x4a8] sm:$0xff] }
 0x205   : > { %6683 = vmatprep.subr.bf16.mxu0 %v7712_v17  ;;  %6499 = vmatprep.subr.bf16.mxu1 %v7758_v9  ;;  %v7776_v42 = vcombine.high %v2721_v7, %v2725_v62  ;;  %v2729_v9 = vld [vmem:[%s11839_s4 + $0x4c8] sm:$0xff] }
 0x208   : > { %6684 = vmatpush1.bf16.msra.mxu0 %v7711_v28 }
 0x209   : > { %6685 = vmatprep.subr.bf16.mxu0 %v7720_v60 }
 0x20c   : > { %6686 = vmatpush1.bf16.msra.mxu0 %v7719_v33 }
 0x20d   : > { %6687 = vmatprep.subr.bf16.mxu0 %v7728_v36 }
 0x210   : > { %6688 = vmatpush1.bf16.msra.mxu0 %v7727_v57 }
 0x211   : > { %6689 = vmatprep.subr.bf16.mxu0 %v7736_v30  ;;  %v2712_v30 = vld [vmem:[%s11839_s4 + $0x440] sm:$0xff] }
 0x212   : > { %v7765_v59 = vcombine.low %v2712_v30, %v2716_v61 }
 0x214   : > { %6690 = vmatpush1.bf16.msra.mxu0 %v7735_v40 }
 0x215   : > { %6691 = vmatprep.subr.bf16.mxu0 %v7744_v26  ;;  %v7766_v26 = vcombine.high %v2712_v30, %v2716_v61  ;;  %v2768_v61 = vld [vmem:[%s11839_s4 + $0x600] sm:$0xff] }
 0x218   : > { %6692 = vmatpush1.bf16.msra.mxu0 %v7743_v2  ;;  %v7767_v2 = vcombine.low %v2713_v25, %v2717_v43  ;;  %v2772_v25 = vld [vmem:[%s11839_s4 + $0x620] sm:$0xff]  ;;  %v2769_v43 = vld [vmem:[%s11839_s4 + $0x608] sm:$0xff] }
 0x219   : > { %6693 = vmatprep.subr.bf16.mxu0 %v7752_v5  ;;  %v7774_v5 = vcombine.high %v2720_v45, %v2724_v41 }
 0x21c   : > { %6694 = vmatpush1.bf16.msra.mxu0 %v7751_v21  ;;  %v7773_v21 = vcombine.low %v2720_v45, %v2724_v41  ;;  %v2773_v45 = vld [vmem:[%s11839_s4 + $0x628] sm:$0xff] }
 0x21d   : > { %6704 = vmatprep.subr.bf16.mxu0 %v7760_v19  ;;  %v7784_v19 = vcombine.high %v2729_v9, %v2733_v24 }
 0x232   : > { %v2252_v31 = vpop.f32.mrb[32].mxu1 }
 0x233   : > { %v2254_v20 = vpop.f32.mrb[33].mxu1 }
 0x234   : > { %v2433_v15 = vcombine.low %v2252_v31, %v2254_v20  ;;  %v2256_v32 = vpop.f32.mrb[34].mxu1  ;;  %v2736_v31 = vld [vmem:[%s11839_s4 + $0x500] sm:$0xff] }
 0x235   : > { %v2257_v58 = vpop.f32.mrb[35].mxu1  ;;  %v2740_v20 = vld [vmem:[%s11839_s4 + $0x520] sm:$0xff]  ;;  %v2741_v32 = vld [vmem:[%s11839_s4 + $0x528] sm:$0xff] }
 0x236   : > { %v2443_v18 = vrot.slane %v2433_v15, %v9426_v13  ;;  %v2737_v15 = vld [vmem:[%s11839_s4 + $0x508] sm:$0xff]  ;;  %v7781_v58 = vcombine.low %v2728_v12, %v2732_v14 }
 0x242   : > { %v2293_v6 = vpop.f32.mrb[36].mxu1 }
 0x243   : > { %v2295_v16 = vpop.f32.mrb[37].mxu1 }
 0x244   : > { %v2434_v4 = vcombine.low %v2293_v6, %v2295_v16  ;;  %v2297_v23 = vpop.f32.mrb[38].mxu1  ;;  %v7783_v6 = vcombine.low %v2729_v9, %v2733_v24  ;;  %v7790_v16 = vcombine.high %v2736_v31, %v2740_v20 }
 0x245   : > { %v2298_v17 = vpop.f32.mrb[39].mxu1  ;;  %v2748_v23 = vld [vmem:[%s11839_s4 + $0x560] sm:$0xff] }
 0x246   : > { %v2450_v56 = vrot.slane %v2434_v4, %v9426_v13  ;;  %v2744_v4 = vld [vmem:[%s11839_s4 + $0x540] sm:$0xff]  ;;  %v2745_v17 = vld [vmem:[%s11839_s4 + $0x548] sm:$0xff] }
 0x248   : > { %v2465_v63 = vcombine.low %v2443_v18, %v2450_v56  ;;  %v7792_v18 = vcombine.high %v2737_v15, %v2741_v32  ;;  %v2749_v56 = vld [vmem:[%s11839_s4 + $0x568] sm:$0xff] }
 0x24a   : > { %v2473_v36 = vrot.slane %v2465_v63, %v9426_v13  ;;  %v7789_v63 = vcombine.low %v2736_v31, %v2740_v20  ;;  %v2784_v20 = vld [vmem:[%s11839_s4 + $0x680] sm:$0xff] }
 0x273   : > { %v2334_v39 = vpop.f32.mrb[40].mxu1 }
 0x274   : > { %v2336_v55 = vpop.f32.mrb[41].mxu1 }
 0x275   : > { %v2435_v44 = vcombine.low %v2334_v39, %v2336_v55  ;;  %v2338_v28 = vpop.f32.mrb[42].mxu1  ;;  %v7791_v39 = vcombine.low %v2737_v15, %v2741_v32  ;;  %v7798_v55 = vcombine.high %v2744_v4, %v2748_v23  ;;  %v2788_v32 = vld [vmem:[%s11839_s4 + $0x6a0] sm:$0xff] }
 0x276   : > { %v2339_v27 = vpop.f32.mrb[43].mxu1  ;;  %v2752_v28 = vld [vmem:[%s11839_s4 + $0x580] sm:$0xff] }
 0x277   : > { %v2457_v22 = vrot.slane %v2435_v44, %v9426_v13  ;;  %v7800_v44 = vcombine.high %v2745_v17, %v2749_v56  ;;  %v2756_v27 = vld [vmem:[%s11839_s4 + $0x5a0] sm:$0xff] }
 0x278   : > { %v7805_v49 = vcombine.low %v2752_v28, %v2756_v27 }
 0x283   : > { %v2375_v60 = vpop.f32.mrb[44].mxu1 }
 0x284   : > { %v2377_v10 = vpop.f32.mrb[45].mxu1 }
 0x285   : > { %v2436_v0 = vcombine.low %v2375_v60, %v2377_v10  ;;  %v2379_v11 = vpop.f32.mrb[46].mxu1  ;;  %v2753_v60 = vld [vmem:[%s11839_s4 + $0x588] sm:$0xff] }
 0x286   : > { %v2380_v1 = vpop.f32.mrb[47].mxu1  ;;  %v2757_v10 = vld [vmem:[%s11839_s4 + $0x5a8] sm:$0xff]  ;;  %v7799_v11 = vcombine.low %v2745_v17, %v2749_v56  ;;  %v7838_v17 = vcombine.high %v2784_v20, %v2788_v32 }
 0x287   : > { %v2464_v33 = vrot.slane %v2436_v0, %v9426_v13  ;;  %v7797_v0 = vcombine.low %v2744_v4, %v2748_v23  ;;  %v7806_v1 = vcombine.high %v2752_v28, %v2756_v27  ;;  %v7837_v28 = vcombine.low %v2784_v20, %v2788_v32  ;;  %v2837_v20 = vld [vmem:[%s11839_s4 + $0x828] sm:$0xff] }
 0x289   : > { %v2466_v46 = vcombine.low %v2457_v22, %v2464_v33  ;;  %v7808_v22 = vcombine.high %v2753_v60, %v2757_v10  ;;  %v2760_v33 = vld [vmem:[%s11839_s4 + $0x5c0] sm:$0xff] }
 0x28b   : > { %v2480_v50 = vrot.slane %v2466_v46, %v9426_v13 }
 0x28d   : > { %v2481_v51 = vcombine.low %v2473_v36, %v2480_v50  ;;  %v2764_v36 = vld [vmem:[%s11839_s4 + $0x5e0] sm:$0xff]  ;;  %v2761_v50 = vld [vmem:[%s11839_s4 + $0x5c8] sm:$0xff] }
 0x28e   : > { %v7814_v30 = vcombine.high %v2760_v33, %v2764_v36 }
 0x28f   : > { %v9958_v37 = vmul.f32 0.015625, %v2481_v51  ;;  %v2765_v51 = vld [vmem:[%s11839_s4 + $0x5e8] sm:$0xff] }
 0x291   : > { %v2523_v57 = vrot.slane %v9958_v37, %v9955_v52  ;;  %v2519_v47 = vrot.slane %v9958_v37, %v9438_v54  ;;  %v2531_v53 = vrot.slane %v9958_v37, %v2530_v3 }
 0x293   : > { %v9979_v38 = vpack.c.bf16 %v2523_v57, %v2523_v57  ;;  %v9981_v40 = vpack.c.bf16 %v2519_v47, %v2519_v47  ;;  %v9999_v29 = vpack.c.bf16 %v2531_v53, %v2531_v53  ;;  %v8810_v57 = vmov 0.0  }
 0x294   : > { %292 = vst.msk [vmem:[#allocation2 + $0x8] sm:$0x3] %vm10055_vm1, %v8810_v57  ;;  %v7807_v47 = vcombine.low %v2753_v60, %v2757_v10  ;;  %v7816_v53 = vcombine.high %v2761_v50, %v2765_v51  ;;  %v2812_v57 = vld [vmem:[%s11839_s4 + $0x760] sm:$0xff] }
 0x295   : > { %6490 = vmatprep.mubr.bf16.mxu1 %v9979_v38  ;;  %6695 = vmatprep.mubr.bf16.mxu0 %v9979_v38 }
 0x296   : > { %6491 = vmatmul.mubr.bf16.vlgmr.msra.gmra.mrb[48].mxu1 %v9981_v40  ;;  %6696 = vmatmul.mubr.bf16.vlgmr.msra.gmra.mrb[52].mxu0 %v9981_v40 }
 0x297   : > { %6500 = vmatpush1.bf16.msra.mxu1 %v7757_v34  ;;  %6705 = vmatpush1.bf16.msra.mxu0 %v7759_v48  ;;  %v7775_v34 = vcombine.low %v2721_v7, %v2725_v62  ;;  %v7782_v48 = vcombine.high %v2728_v12, %v2732_v14  ;;  %v7822_v7 = vcombine.high %v2768_v61, %v2772_v25  ;;  %v2781_v12 = vld [vmem:[%s11839_s4 + $0x668] sm:$0xff] }
 0x298   : > { %6531 = vmatprep.mubr.bf16.mxu1 %v9999_v29  ;;  %6736 = vmatprep.mubr.bf16.mxu0 %v9999_v29  ;;  %v7824_v62 = vcombine.high %v2769_v43, %v2773_v45 }
 0x299   : > { %6501 = vmatprep.subr.bf16.mxu1 %v7766_v26  ;;  %6706 = vmatprep.subr.bf16.mxu0 %v7768_v35  ;;  %v7813_v26 = vcombine.low %v2760_v33, %v2764_v36  ;;  %v7815_v35 = vcombine.low %v2761_v50, %v2765_v51  ;;  %v2808_v51 = vld [vmem:[%s11839_s4 + $0x740] sm:$0xff] }
 0x29b   : > { %6502 = vmatpush1.bf16.msra.mxu1 %v7765_v59  ;;  %6707 = vmatpush1.bf16.msra.mxu0 %v7767_v2  ;;  %v2776_v59 = vld [vmem:[%s11839_s4 + $0x640] sm:$0xff]  ;;  %v2212_v15 = vld [vmem:[#allocation2 + $0x8] sm:$0x3] }
 0x29c   : > { %6503 = vmatprep.subr.bf16.mxu1 %v7774_v5  ;;  %6708 = vmatprep.subr.bf16.mxu0 %v7776_v42  ;;  %v2780_v5 = vld [vmem:[%s11839_s4 + $0x660] sm:$0xff]  ;;  %v2777_v42 = vld [vmem:[%s11839_s4 + $0x648] sm:$0xff] }
 0x29d   : > { %v7832_v31 = vcombine.high %v2777_v42, %v2781_v12  ;;  %v7831_v4 = vcombine.low %v2777_v42, %v2781_v12  ;;  %v2825_v42 = vld [vmem:[%s11839_s4 + $0x7c8] sm:$0xff] }
 0x29e   : > { %v2829_v12 = vld [vmem:[%s11839_s4 + $0x7e8] sm:$0xff] }
 0x29f   : > { %6504 = vmatpush1.bf16.msra.mxu1 %v7773_v21  ;;  %6709 = vmatpush1.bf16.msra.mxu0 %v7775_v34  ;;  %v7821_v21 = vcombine.low %v2768_v61, %v2772_v25  ;;  %v7823_v34 = vcombine.low %v2769_v43, %v2773_v45  ;;  %v7862_v61 = vcombine.high %v2808_v51, %v2812_v57  ;;  %v2816_v43 = vld [vmem:[%s11839_s4 + $0x780] sm:$0xff] }
 0x2a0   : > { %6505 = vmatprep.subr.bf16.mxu1 %v7782_v48  ;;  %6710 = vmatprep.subr.bf16.mxu0 %v7784_v19  ;;  %v7830_v19 = vcombine.high %v2776_v59, %v2780_v5  ;;  %v2820_v45 = vld [vmem:[%s11839_s4 + $0x7a0] sm:$0xff] }
 0x2a3   : > { %6506 = vmatpush1.bf16.msra.mxu1 %v7781_v58  ;;  %6711 = vmatpush1.bf16.msra.mxu0 %v7783_v6  ;;  %v2785_v58 = vld [vmem:[%s11839_s4 + $0x688] sm:$0xff] }
 0x2a4   : > { %6507 = vmatprep.subr.bf16.mxu1 %v7790_v16  ;;  %6712 = vmatprep.subr.bf16.mxu0 %v7792_v18  ;;  %v2789_v6 = vld [vmem:[%s11839_s4 + $0x6a8] sm:$0xff]  ;;  %v7829_v18 = vcombine.low %v2776_v59, %v2780_v5  ;;  %v2828_v5 = vld [vmem:[%s11839_s4 + $0x7e0] sm:$0xff] }
 0x2a5   : > { %v7840_v56 = vcombine.high %v2785_v58, %v2789_v6  ;;  %v7839_v27 = vcombine.low %v2785_v58, %v2789_v6  ;;  %v7879_v58 = vcombine.low %v2825_v42, %v2829_v12 }
 0x2a7   : > { %6508 = vmatpush1.bf16.msra.mxu1 %v7789_v63  ;;  %6713 = vmatpush1.bf16.msra.mxu0 %v7791_v39  ;;  %v2792_v63 = vld [vmem:[%s11839_s4 + $0x6c0] sm:$0xff] }
 0x2a8   : > { %6509 = vmatprep.subr.bf16.mxu1 %v7798_v55  ;;  %6714 = vmatprep.subr.bf16.mxu0 %v7800_v44  ;;  %v2796_v39 = vld [vmem:[%s11839_s4 + $0x6e0] sm:$0xff]  ;;  %v2793_v55 = vld [vmem:[%s11839_s4 + $0x6c8] sm:$0xff] }
 0x2a9   : > { %v2797_v44 = vld [vmem:[%s11839_s4 + $0x6e8] sm:$0xff]  ;;  %v7846_v60 = vcombine.high %v2792_v63, %v2796_v39  ;;  %v7845_v33 = vcombine.low %v2792_v63, %v2796_v39 }
 0x2aa   : > { %v7848_v10 = vcombine.high %v2793_v55, %v2797_v44  ;;  %v7847_v46 = vcombine.low %v2793_v55, %v2797_v44  ;;  %v2845_v63 = vld [vmem:[%s11839_s4 + $0x868] sm:$0xff] }
 0x2ab   : > { %6510 = vmatpush1.bf16.msra.mxu1 %v7797_v0  ;;  %6715 = vmatpush1.bf16.msra.mxu0 %v7799_v11  ;;  %v2800_v0 = vld [vmem:[%s11839_s4 + $0x700] sm:$0xff] }
 0x2ac   : > { %6511 = vmatprep.subr.bf16.mxu1 %v7806_v1  ;;  %6716 = vmatprep.subr.bf16.mxu0 %v7808_v22  ;;  %v2804_v11 = vld [vmem:[%s11839_s4 + $0x720] sm:$0xff]  ;;  %v2801_v1 = vld [vmem:[%s11839_s4 + $0x708] sm:$0xff] }
 0x2ad   : > { %v2805_v22 = vld [vmem:[%s11839_s4 + $0x728] sm:$0xff]  ;;  %v7854_v36 = vcombine.high %v2800_v0, %v2804_v11 }
 0x2ae   : > { %v7856_v50 = vcombine.high %v2801_v1, %v2805_v22 }
 0x2af   : > { %6512 = vmatpush1.bf16.msra.mxu1 %v7805_v49  ;;  %6717 = vmatpush1.bf16.msra.mxu0 %v7807_v47  ;;  %v2809_v49 = vld [vmem:[%s11839_s4 + $0x748] sm:$0xff] }
 0x2b0   : > { %6513 = vmatprep.subr.bf16.mxu1 %v7814_v30  ;;  %6718 = vmatprep.subr.bf16.mxu0 %v7816_v53  ;;  %v2813_v47 = vld [vmem:[%s11839_s4 + $0x768] sm:$0xff]  ;;  %v7853_v30 = vcombine.low %v2800_v0, %v2804_v11  ;;  %v7855_v53 = vcombine.low %v2801_v1, %v2805_v22  ;;  %v2852_v0 = vld [vmem:[%s11839_s4 + $0x8a0] sm:$0xff] }
 0x2b1   : > { %v7864_v25 = vcombine.high %v2809_v49, %v2813_v47  ;;  %v2849_v11 = vld [vmem:[%s11839_s4 + $0x888] sm:$0xff] }
 0x2b2   : > { %v2416_v41 = vpop.f32.mrb[48].mxu0  ;;  %v2853_v1 = vld [vmem:[%s11839_s4 + $0x8a8] sm:$0xff] }
 0x2b3   : > { %v2418_v2 = vpop.f32.mrb[49].mxu0  ;;  %6514 = vmatpush1.bf16.msra.mxu1 %v7813_v26  ;;  %6719 = vmatpush1.bf16.msra.mxu0 %v7815_v35  ;;  %v2817_v26 = vld [vmem:[%s11839_s4 + $0x788] sm:$0xff] }
 0x2b4   : > { %v2482_v14 = vcombine.low %v2416_v41, %v2418_v2  ;;  %v2420_v9 = vpop.f32.mrb[50].mxu0  ;;  %6515 = vmatprep.subr.bf16.mxu1 %v7822_v7  ;;  %6720 = vmatprep.subr.bf16.mxu0 %v7824_v62  ;;  %v2821_v35 = vld [vmem:[%s11839_s4 + $0x7a8] sm:$0xff]  ;;  %v7861_v41 = vcombine.low %v2808_v51, %v2812_v57  ;;  %v7863_v7 = vcombine.low %v2809_v49, %v2813_v47  ;;  %v2824_v2 = vld [vmem:[%s11839_s4 + $0x7c0] sm:$0xff] }
 0x2b5   : > { %v2421_v24 = vpop.f32.mrb[51].mxu0  ;;  %v7870_v62 = vcombine.high %v2816_v43, %v2820_v45  ;;  %v7872_v59 = vcombine.high %v2817_v26, %v2821_v35  ;;  %v7871_v9 = vcombine.low %v2817_v26, %v2821_v35  ;;  %v7877_v32 = vcombine.low %v2824_v2, %v2828_v5  ;;  %v2860_v51 = vld [vmem:[%s11839_s4 + $0x8e0] sm:$0xff]  ;;  %v2857_v57 = vld [vmem:[%s11839_s4 + $0x8c8] sm:$0xff] }
 0x2b6   : > { %v2489_v48 = vrot.slane %v2482_v14, %v9426_v13  ;;  %v7869_v14 = vcombine.low %v2816_v43, %v2820_v45  ;;  %v7878_v24 = vcombine.high %v2824_v2, %v2828_v5  ;;  %v2861_v49 = vld [vmem:[%s11839_s4 + $0x8e8] sm:$0xff]  ;;  %v2868_v43 = vld [vmem:[%s11839_s4 + $0x920] sm:$0xff] }
 0x2b7   : > { %6516 = vmatpush1.bf16.msra.mxu1 %v7821_v21  ;;  %6721 = vmatpush1.bf16.msra.mxu0 %v7823_v34  ;;  %v7880_v21 = vcombine.high %v2825_v42, %v2829_v12  ;;  %v2526_v34 = vsub.s32 2, %v9423_v8  ;;  %v2865_v45 = vld [vmem:[%s11839_s4 + $0x908] sm:$0xff]  ;;  %v2876_v2 = vld [vmem:[%s11839_s4 + $0x960] sm:$0xff] }
 0x2b8   : > { %v2496_v16 = vrot.slane %v2489_v48, %v9426_v13  ;;  %6517 = vmatprep.subr.bf16.mxu1 %v7830_v19  ;;  %6722 = vmatprep.subr.bf16.mxu0 %v7832_v31  ;;  %v2832_v48 = vld [vmem:[%s11839_s4 + $0x800] sm:$0xff]  ;;  %v2833_v31 = vld [vmem:[%s11839_s4 + $0x808] sm:$0xff] }
 0x2b9   : > { %v2836_v19 = vld [vmem:[%s11839_s4 + $0x820] sm:$0xff]  ;;  %v2527_v6 = vrot.slane %v9958_v37, %v2526_v34  ;;  %v7887_v44 = vcombine.low %v2833_v31, %v2837_v20  ;;  %v2869_v26 = vld [vmem:[%s11839_s4 + $0x928] sm:$0xff] }
 0x2ba   : > { %v2500_v23 = vadd.f32 %v2496_v16, %v2212_v15  ;;  %v2538_v15 = vsub.s32 5, %v9423_v8  ;;  %v7886_v16 = vcombine.high %v2832_v48, %v2836_v19  ;;  %v7885_v39 = vcombine.low %v2832_v48, %v2836_v19  ;;  %v2873_v5 = vld [vmem:[%s11839_s4 + $0x948] sm:$0xff]  ;;  %v2884_v48 = vld [vmem:[%s11839_s4 + $0x9a0] sm:$0xff] }
 0x2bb   : > { %6518 = vmatpush1.bf16.msra.mxu1 %v7829_v18  ;;  %6723 = vmatpush1.bf16.msra.mxu0 %v7831_v4  ;;  %v7888_v18 = vcombine.high %v2833_v31, %v2837_v20  ;;  %v10202_v55 = vpack.c.bf16 %v2527_v6, %v2527_v6  ;;  %v2877_v42 = vld [vmem:[%s11839_s4 + $0x968] sm:$0xff] }
 0x2bc   : > { %2506 = vst.msk [vmem:[#allocation2 + $0x8] sm:$0x3] %vm10055_vm1, %v2500_v23  ;;  %6519 = vmatprep.subr.bf16.mxu1 %v7838_v17  ;;  %6724 = vmatprep.subr.bf16.mxu0 %v7840_v56  ;;  %v2539_v4 = vrot.slane %v9958_v37, %v2538_v15  ;;  %v2840_v23 = vld [vmem:[%s11839_s4 + $0x840] sm:$0xff]  ;;  %v2841_v56 = vld [vmem:[%s11839_s4 + $0x848] sm:$0xff] }
 0x2bd   : > { %v2844_v17 = vld [vmem:[%s11839_s4 + $0x860] sm:$0xff]  ;;  %v2881_v19 = vld [vmem:[%s11839_s4 + $0x988] sm:$0xff] }
 0x2be   : > { %v7893_v22 = vcombine.low %v2840_v23, %v2844_v17  ;;  %v2885_v31 = vld [vmem:[%s11839_s4 + $0x9a8] sm:$0xff] }
 0x2bf   : > { %6520 = vmatpush1.bf16.msra.mxu1 %v7837_v28  ;;  %6725 = vmatpush1.bf16.msra.mxu0 %v7839_v27  ;;  %v10204_v28 = vpack.c.bf16 %v2539_v4, %v2539_v4  ;;  %v7894_v27 = vcombine.high %v2840_v23, %v2844_v17  ;;  %v7936_v6 = vcombine.high %v2881_v19, %v2885_v31  ;;  %v2889_v4 = vld [vmem:[%s11839_s4 + $0x9c8] sm:$0xff] }
 0x2c0   : > { %6521 = vmatprep.subr.bf16.mxu1 %v7846_v60  ;;  %6726 = vmatprep.subr.bf16.mxu0 %v7848_v10  ;;  %v7896_v60 = vcombine.high %v2841_v56, %v2845_v63  ;;  %v2848_v10 = vld [vmem:[%s11839_s4 + $0x880] sm:$0xff]  ;;  %v2893_v23 = vld [vmem:[%s11839_s4 + $0x9e8] sm:$0xff] }
 0x2c1   : > { %v7901_v47 = vcombine.low %v2848_v10, %v2852_v0 }
 0x2c3   : > { %6522 = vmatpush1.bf16.msra.mxu1 %v7845_v33  ;;  %6727 = vmatpush1.bf16.msra.mxu0 %v7847_v46  ;;  %v7895_v33 = vcombine.low %v2841_v56, %v2845_v63  ;;  %v7902_v46 = vcombine.high %v2848_v10, %v2852_v0  ;;  %v7935_v56 = vcombine.low %v2881_v19, %v2885_v31  ;;  %v2901_v10 = vld [vmem:[%s11839_s4 + $0xa28] sm:$0xff] }
 0x2c4   : > { %6523 = vmatprep.subr.bf16.mxu1 %v7854_v36  ;;  %6728 = vmatprep.subr.bf16.mxu0 %v7856_v50  ;;  %v7904_v36 = vcombine.high %v2849_v11, %v2853_v1  ;;  %v2856_v50 = vld [vmem:[%s11839_s4 + $0x8c0] sm:$0xff] }
 0x2c5   : > { %v7909_v35 = vcombine.low %v2856_v50, %v2860_v51 }
 0x2c7   : > { %6524 = vmatpush1.bf16.msra.mxu1 %v7853_v30  ;;  %6729 = vmatpush1.bf16.msra.mxu0 %v7855_v53  ;;  %v7903_v30 = vcombine.low %v2849_v11, %v2853_v1  ;;  %v7910_v53 = vcombine.high %v2856_v50, %v2860_v51  ;;  %v7943_v11 = vcombine.low %v2889_v4, %v2893_v23  ;;  %v2909_v50 = vld [vmem:[%s11839_s4 + $0xa68] sm:$0xff] }
 0x2c8   : > { %6525 = vmatprep.subr.bf16.mxu1 %v7862_v61  ;;  %6730 = vmatprep.subr.bf16.mxu0 %v7864_v25  ;;  %v7912_v61 = vcombine.high %v2857_v57, %v2861_v49  ;;  %v2864_v25 = vld [vmem:[%s11839_s4 + $0x900] sm:$0xff] }
 0x2c9   : > { %v7917_v12 = vcombine.low %v2864_v25, %v2868_v43 }
 0x2cb   : > { %6526 = vmatpush1.bf16.msra.mxu1 %v7861_v41  ;;  %6731 = vmatpush1.bf16.msra.mxu0 %v7863_v7  ;;  %v7911_v41 = vcombine.low %v2857_v57, %v2861_v49  ;;  %v7918_v7 = vcombine.high %v2864_v25, %v2868_v43  ;;  %v2917_v25 = vld [vmem:[%s11839_s4 + $0xaa8] sm:$0xff] }
 0x2cc   : > { %6527 = vmatprep.subr.bf16.mxu1 %v7870_v62  ;;  %6732 = vmatprep.subr.bf16.mxu0 %v7872_v59  ;;  %v7920_v62 = vcombine.high %v2865_v45, %v2869_v26  ;;  %v2872_v59 = vld [vmem:[%s11839_s4 + $0x940] sm:$0xff] }
 0x2cd   : > { %v7925_v20 = vcombine.low %v2872_v59, %v2876_v2 }
 0x2cf   : > { %6528 = vmatpush1.bf16.msra.mxu1 %v7869_v14  ;;  %6733 = vmatpush1.bf16.msra.mxu0 %v7871_v9  ;;  %v7919_v14 = vcombine.low %v2865_v45, %v2869_v26  ;;  %v7926_v9 = vcombine.high %v2872_v59, %v2876_v2  ;;  %v2925_v59 = vld [vmem:[%s11839_s4 + $0xae8] sm:$0xff] }
 0x2d0   : > { %6529 = vmatprep.subr.bf16.mxu1 %v7878_v24  ;;  %6734 = vmatprep.subr.bf16.mxu0 %v7880_v21  ;;  %v7928_v24 = vcombine.high %v2873_v5, %v2877_v42  ;;  %v2880_v21 = vld [vmem:[%s11839_s4 + $0x980] sm:$0xff] }
 0x2d1   : > { %v7933_v17 = vcombine.low %v2880_v21, %v2884_v48 }
 0x2d3   : > { %6530 = vmatpush1.bf16.msra.mxu1 %v7877_v32  ;;  %6735 = vmatpush1.bf16.msra.mxu0 %v7879_v58  ;;  %v7927_v32 = vcombine.low %v2873_v5, %v2877_v42  ;;  %v7934_v58 = vcombine.high %v2880_v21, %v2884_v48  ;;  %v2933_v21 = vld [vmem:[%s11839_s4 + $0xb28] sm:$0xff] }
 0x2d4   : > { %6540 = vmatprep.subr.bf16.mxu1 %v7886_v16  ;;  %6745 = vmatprep.subr.bf16.mxu0 %v7888_v18  ;;  %v2888_v16 = vld [vmem:[%s11839_s4 + $0x9c0] sm:$0xff] }
 0x2d5   : > { %v2892_v18 = vld [vmem:[%s11839_s4 + $0x9e0] sm:$0xff] }
 0x2d6   : > { %6532 = vmatmul.mubr.bf16.vlgmr.msra.gmra.mrb[48].mxu1 %v10202_v55  ;;  %6737 = vmatmul.mubr.bf16.vlgmr.msra.gmra.mrb[52].mxu0 %v10202_v55  ;;  %v7942_v63 = vcombine.high %v2888_v16, %v2892_v18  ;;  %v7941_v0 = vcombine.low %v2888_v16, %v2892_v18  ;;  %v2941_v16 = vld [vmem:[%s11839_s4 + $0xb68] sm:$0xff] }
 0x2d7   : > { %6541 = vmatpush1.bf16.msra.mxu1 %v7885_v39  ;;  %6572 = vmatprep.mubr.bf16.mxu1 %v10204_v28  ;;  %v7944_v39 = vcombine.high %v2889_v4, %v2893_v23 }
 0x2d8   : > { %6746 = vmatpush1.bf16.msra.mxu0 %v7887_v44  ;;  %6777 = vmatprep.mubr.bf16.mxu0 %v10204_v28  ;;  %v2896_v44 = vld [vmem:[%s11839_s4 + $0xa00] sm:$0xff] }
 0x2d9   : > { %6542 = vmatprep.subr.bf16.mxu1 %v7894_v27  ;;  %6747 = vmatprep.subr.bf16.mxu0 %v7896_v60  ;;  %v2900_v27 = vld [vmem:[%s11839_s4 + $0xa20] sm:$0xff]  ;;  %v2897_v60 = vld [vmem:[%s11839_s4 + $0xa08] sm:$0xff] }
 0x2da   : > { %v7950_v1 = vcombine.high %v2896_v44, %v2900_v27  ;;  %v7949_v51 = vcombine.low %v2896_v44, %v2900_v27  ;;  %v7951_v57 = vcombine.low %v2897_v60, %v2901_v10  ;;  %v2949_v44 = vld [vmem:[%s11839_s4 + $0xba8] sm:$0xff] }
 0x2db   : > { %6543 = vmatpush1.bf16.msra.mxu1 %v7893_v22  ;;  %v7952_v22 = vcombine.high %v2897_v60, %v2901_v10 }
 0x2dc   : > { %6748 = vmatpush1.bf16.msra.mxu0 %v7895_v33  ;;  %6544 = vmatprep.subr.bf16.mxu1 %v7902_v46  ;;  %v2904_v33 = vld [vmem:[%s11839_s4 + $0xa40] sm:$0xff] }
 0x2dd   : > { %6749 = vmatprep.subr.bf16.mxu0 %v7904_v36  ;;  %v2908_v46 = vld [vmem:[%s11839_s4 + $0xa60] sm:$0xff]  ;;  %v2905_v36 = vld [vmem:[%s11839_s4 + $0xa48] sm:$0xff] }
 0x2de   : > { %v7958_v49 = vcombine.high %v2904_v33, %v2908_v46  ;;  %v7957_v43 = vcombine.low %v2904_v33, %v2908_v46  ;;  %v7959_v45 = vcombine.low %v2905_v36, %v2909_v50  ;;  %v2957_v33 = vld [vmem:[%s11839_s4 + $0xbe8] sm:$0xff] }
 0x2df   : > { %6545 = vmatpush1.bf16.msra.mxu1 %v7901_v47  ;;  %v7960_v47 = vcombine.high %v2905_v36, %v2909_v50 }
 0x2e0   : > { %6750 = vmatpush1.bf16.msra.mxu0 %v7903_v30  ;;  %6546 = vmatprep.subr.bf16.mxu1 %v7910_v53  ;;  %v2912_v30 = vld [vmem:[%s11839_s4 + $0xa80] sm:$0xff] }
 0x2e1   : > { %6751 = vmatprep.subr.bf16.mxu0 %v7912_v61  ;;  %v2916_v53 = vld [vmem:[%s11839_s4 + $0xaa0] sm:$0xff]  ;;  %v2913_v61 = vld [vmem:[%s11839_s4 + $0xa88] sm:$0xff] }
 0x2e2   : > { %v7966_v26 = vcombine.high %v2912_v30, %v2916_v53  ;;  %v7965_v2 = vcombine.low %v2912_v30, %v2916_v53  ;;  %v7967_v5 = vcombine.low %v2913_v61, %v2917_v25  ;;  %v2961_v30 = vld [vmem:[%s11839_s4 + $0xc08] sm:$0xff] }
 0x2e3   : > { %6547 = vmatpush1.bf16.msra.mxu1 %v7909_v35  ;;  %v7968_v35 = vcombine.high %v2913_v61, %v2917_v25  ;;  %v2965_v53 = vld [vmem:[%s11839_s4 + $0xc28] sm:$0xff]  ;;  %v2546_v61 = vsub.s32 7, %v9423_v8 }
 0x2e4   : > { %6752 = vmatpush1.bf16.msra.mxu0 %v7911_v41  ;;  %6548 = vmatprep.subr.bf16.mxu1 %v7918_v7  ;;  %v2920_v41 = vld [vmem:[%s11839_s4 + $0xac0] sm:$0xff] }
 0x2e5   : > { %6753 = vmatprep.subr.bf16.mxu0 %v7920_v62  ;;  %v2924_v7 = vld [vmem:[%s11839_s4 + $0xae0] sm:$0xff]  ;;  %v2921_v62 = vld [vmem:[%s11839_s4 + $0xac8] sm:$0xff] }
 0x2e6   : > { %v7974_v42 = vcombine.high %v2920_v41, %v2924_v7  ;;  %v7973_v48 = vcombine.low %v2920_v41, %v2924_v7  ;;  %v7975_v19 = vcombine.low %v2921_v62, %v2925_v59  ;;  %v2547_v41 = vrot.slane %v9958_v37, %v2546_v61  ;;  %v2968_v7 = vld [vmem:[%s11839_s4 + $0xc40] sm:$0xff] }
 0x2e7   : > { %6549 = vmatpush1.bf16.msra.mxu1 %v7917_v12  ;;  %v7976_v12 = vcombine.high %v2921_v62, %v2925_v59  ;;  %v2972_v62 = vld [vmem:[%s11839_s4 + $0xc60] sm:$0xff] }
 0x2e8   : > { %6754 = vmatpush1.bf16.msra.mxu0 %v7919_v14  ;;  %6550 = vmatprep.subr.bf16.mxu1 %v7926_v9  ;;  %v2928_v14 = vld [vmem:[%s11839_s4 + $0xb00] sm:$0xff] }
 0x2e9   : > { %6755 = vmatprep.subr.bf16.mxu0 %v7928_v24  ;;  %v2932_v9 = vld [vmem:[%s11839_s4 + $0xb20] sm:$0xff]  ;;  %v2929_v24 = vld [vmem:[%s11839_s4 + $0xb08] sm:$0xff] }
 0x2ea   : > { %v7982_v31 = vcombine.high %v2928_v14, %v2932_v9  ;;  %v7981_v18 = vcombine.low %v2928_v14, %v2932_v9  ;;  %v7983_v4 = vcombine.low %v2929_v24, %v2933_v21  ;;  %v8022_v14 = vcombine.high %v2968_v7, %v2972_v62  ;;  %v2976_v9 = vld [vmem:[%s11839_s4 + $0xc80] sm:$0xff] }
 0x2eb   : > { %6551 = vmatpush1.bf16.msra.mxu1 %v7925_v20  ;;  %v7984_v20 = vcombine.high %v2929_v24, %v2933_v21  ;;  %v2980_v24 = vld [vmem:[%s11839_s4 + $0xca0] sm:$0xff]  ;;  %v10419_v21 = vpack.c.bf16 %v2547_v41, %v2547_v41 }
 0x2ec   : > { %6756 = vmatpush1.bf16.msra.mxu0 %v7927_v32  ;;  %6552 = vmatprep.subr.bf16.mxu1 %v7934_v58  ;;  %v2936_v32 = vld [vmem:[%s11839_s4 + $0xb40] sm:$0xff] }
 0x2ed   : > { %6757 = vmatprep.subr.bf16.mxu0 %v7936_v6  ;;  %v2940_v58 = vld [vmem:[%s11839_s4 + $0xb60] sm:$0xff]  ;;  %v2937_v6 = vld [vmem:[%s11839_s4 + $0xb48] sm:$0xff] }
 0x2ee   : > { %v7990_v23 = vcombine.high %v2936_v32, %v2940_v58  ;;  %v7989_v27 = vcombine.low %v2936_v32, %v2940_v58  ;;  %v7991_v60 = vcombine.low %v2937_v6, %v2941_v16  ;;  %v8030_v58 = vcombine.high %v2976_v9, %v2980_v24 }
 0x2ef   : > { %6553 = vmatpush1.bf16.msra.mxu1 %v7933_v17  ;;  %v7992_v17 = vcombine.high %v2937_v6, %v2941_v16  ;;  %v2984_v16 = vld [vmem:[%s11839_s4 + $0xcc0] sm:$0xff] }
 0x2f0   : > { %6758 = vmatpush1.bf16.msra.mxu0 %v7935_v56  ;;  %6554 = vmatprep.subr.bf16.mxu1 %v7942_v63  ;;  %v2944_v56 = vld [vmem:[%s11839_s4 + $0xb80] sm:$0xff] }
 0x2f1   : > { %6759 = vmatprep.subr.bf16.mxu0 %v7944_v39  ;;  %v2948_v63 = vld [vmem:[%s11839_s4 + $0xba0] sm:$0xff]  ;;  %v2945_v39 = vld [vmem:[%s11839_s4 + $0xb88] sm:$0xff] }
 0x2f2   : > { %v7998_v10 = vcombine.high %v2944_v56, %v2948_v63  ;;  %v7997_v46 = vcombine.low %v2944_v56, %v2948_v63  ;;  %v7999_v36 = vcombine.low %v2945_v39, %v2949_v44 }
 0x2f3   : > { %6555 = vmatpush1.bf16.msra.mxu1 %v7941_v0  ;;  %v8000_v0 = vcombine.high %v2945_v39, %v2949_v44  ;;  %v2992_v44 = vld [vmem:[%s11839_s4 + $0xd00] sm:$0xff] }
 0x2f4   : > { %6760 = vmatpush1.bf16.msra.mxu0 %v7943_v11  ;;  %6556 = vmatprep.subr.bf16.mxu1 %v7950_v1  ;;  %v2952_v11 = vld [vmem:[%s11839_s4 + $0xbc0] sm:$0xff] }
 0x2f5   : > { %6761 = vmatprep.subr.bf16.mxu0 %v7952_v22  ;;  %v2956_v1 = vld [vmem:[%s11839_s4 + $0xbe0] sm:$0xff]  ;;  %v2953_v22 = vld [vmem:[%s11839_s4 + $0xbc8] sm:$0xff] }
 0x2f6   : > { %v8006_v50 = vcombine.high %v2952_v11, %v2956_v1  ;;  %v8005_v25 = vcombine.low %v2952_v11, %v2956_v1 }
 0x2f7   : > { %6557 = vmatpush1.bf16.msra.mxu1 %v7949_v51  ;;  %v2534_v51 = vsub.s32 4, %v9423_v8 }
 0x2f8   : > { %6762 = vmatpush1.bf16.msra.mxu0 %v7951_v57  ;;  %6558 = vmatprep.subr.bf16.mxu1 %v7958_v49  ;;  %v8008_v57 = vcombine.high %v2953_v22, %v2957_v33  ;;  %v2960_v49 = vld [vmem:[%s11839_s4 + $0xc00] sm:$0xff] }
 0x2f9   : > { %6763 = vmatprep.subr.bf16.mxu0 %v7960_v47  ;;  %v2964_v47 = vld [vmem:[%s11839_s4 + $0xc20] sm:$0xff] }
 0x2fa   : > { %v8013_v59 = vcombine.low %v2960_v49, %v2964_v47 }
 0x2fb   : > { %6559 = vmatpush1.bf16.msra.mxu1 %v7957_v43  ;;  %v8007_v43 = vcombine.low %v2953_v22, %v2957_v33  ;;  %v3000_v33 = vld [vmem:[%s11839_s4 + $0xd40] sm:$0xff] }
 0x2fc   : > { %6764 = vmatpush1.bf16.msra.mxu0 %v7959_v45  ;;  %6560 = vmatprep.subr.bf16.mxu1 %v7966_v26  ;;  %v2535_v45 = vrot.slane %v9958_v37, %v2534_v51  ;;  %v8014_v26 = vcombine.high %v2960_v49, %v2964_v47 }
 0x2fd   : > { %6765 = vmatprep.subr.bf16.mxu0 %v7968_v35  ;;  %v8016_v35 = vcombine.high %v2961_v30, %v2965_v53 }
 0x2ff   : > { %6561 = vmatpush1.bf16.msra.mxu1 %v7965_v2  ;;  %v2969_v2 = vld [vmem:[%s11839_s4 + $0xc48] sm:$0xff] }
 0x300   : > { %6766 = vmatpush1.bf16.msra.mxu0 %v7967_v5  ;;  %6562 = vmatprep.subr.bf16.mxu1 %v7974_v42  ;;  %v2973_v5 = vld [vmem:[%s11839_s4 + $0xc68] sm:$0xff]  ;;  %v10410_v42 = vpack.c.bf16 %v2535_v45, %v2535_v45 }
 0x301   : > { %6767 = vmatprep.subr.bf16.mxu0 %v7976_v12  ;;  %v8015_v12 = vcombine.low %v2961_v30, %v2965_v53  ;;  %v8023_v32 = vcombine.low %v2969_v2, %v2973_v5  ;;  %v3008_v53 = vld [vmem:[%s11839_s4 + $0xd80] sm:$0xff]  ;;  %v3013_v45 = vld [vmem:[%s11839_s4 + $0xda8] sm:$0xff] }
 0x303   : > { %6563 = vmatpush1.bf16.msra.mxu1 %v7973_v48  ;;  %v8024_v48 = vcombine.high %v2969_v2, %v2973_v5  ;;  %v3017_v2 = vld [vmem:[%s11839_s4 + $0xdc8] sm:$0xff] }
 0x304   : > { %6768 = vmatpush1.bf16.msra.mxu0 %v7975_v19  ;;  %6564 = vmatprep.subr.bf16.mxu1 %v7982_v31  ;;  %v2977_v19 = vld [vmem:[%s11839_s4 + $0xc88] sm:$0xff] }
 0x305   : > { %6769 = vmatprep.subr.bf16.mxu0 %v7984_v20  ;;  %v2981_v31 = vld [vmem:[%s11839_s4 + $0xca8] sm:$0xff]  ;;  %v8021_v20 = vcombine.low %v2968_v7, %v2972_v62  ;;  %v3016_v62 = vld [vmem:[%s11839_s4 + $0xdc0] sm:$0xff] }
 0x306   : > { %v8032_v6 = vcombine.high %v2977_v19, %v2981_v31  ;;  %v8031_v56 = vcombine.low %v2977_v19, %v2981_v31  ;;  %v3021_v5 = vld [vmem:[%s11839_s4 + $0xde8] sm:$0xff]  ;;  %v3028_v19 = vld [vmem:[%s11839_s4 + $0xe20] sm:$0xff] }
 0x307   : > { %6565 = vmatpush1.bf16.msra.mxu1 %v7981_v18  ;;  %v2988_v18 = vld [vmem:[%s11839_s4 + $0xce0] sm:$0xff]  ;;  %v3025_v31 = vld [vmem:[%s11839_s4 + $0xe08] sm:$0xff] }
 0x308   : > { %6770 = vmatpush1.bf16.msra.mxu0 %v7983_v4  ;;  %6566 = vmatprep.subr.bf16.mxu1 %v7990_v23  ;;  %v2985_v4 = vld [vmem:[%s11839_s4 + $0xcc8] sm:$0xff]  ;;  %v8038_v63 = vcombine.high %v2984_v16, %v2988_v18 }
 0x309   : > { %6771 = vmatprep.subr.bf16.mxu0 %v7992_v17  ;;  %v2989_v23 = vld [vmem:[%s11839_s4 + $0xce8] sm:$0xff]  ;;  %v8029_v17 = vcombine.low %v2976_v9, %v2980_v24  ;;  %v8072_v24 = vcombine.high %v3017_v2, %v3021_v5 }
 0x30a   : > { %v8040_v39 = vcombine.high %v2985_v4, %v2989_v23  ;;  %v8039_v11 = vcombine.low %v2985_v4, %v2989_v23  ;;  %v3036_v4 = vld [vmem:[%s11839_s4 + $0xe60] sm:$0xff]  ;;  %v3033_v23 = vld [vmem:[%s11839_s4 + $0xe48] sm:$0xff] }
 0x30b   : > { %6567 = vmatpush1.bf16.msra.mxu1 %v7989_v27  ;;  %v2996_v27 = vld [vmem:[%s11839_s4 + $0xd20] sm:$0xff] }
 0x30c   : > { %6772 = vmatpush1.bf16.msra.mxu0 %v7991_v60  ;;  %6568 = vmatprep.subr.bf16.mxu1 %v7998_v10  ;;  %v2993_v60 = vld [vmem:[%s11839_s4 + $0xd08] sm:$0xff]  ;;  %v8046_v1 = vcombine.high %v2992_v44, %v2996_v27 }
 0x30d   : > { %6773 = vmatprep.subr.bf16.mxu0 %v8000_v0  ;;  %v2997_v10 = vld [vmem:[%s11839_s4 + $0xd28] sm:$0xff]  ;;  %v8037_v0 = vcombine.low %v2984_v16, %v2988_v18  ;;  %v3032_v18 = vld [vmem:[%s11839_s4 + $0xe40] sm:$0xff] }
 0x30e   : > { %v8048_v22 = vcombine.high %v2993_v60, %v2997_v10  ;;  %v8047_v49 = vcombine.low %v2993_v60, %v2997_v10  ;;  %v3044_v60 = vld [vmem:[%s11839_s4 + $0xea0] sm:$0xff]  ;;  %v3041_v10 = vld [vmem:[%s11839_s4 + $0xe88] sm:$0xff] }
 0x30f   : > { %6569 = vmatpush1.bf16.msra.mxu1 %v7997_v46  ;;  %v3004_v46 = vld [vmem:[%s11839_s4 + $0xd60] sm:$0xff] }
 0x310   : > { %6774 = vmatpush1.bf16.msra.mxu0 %v7999_v36  ;;  %6570 = vmatprep.subr.bf16.mxu1 %v8006_v50  ;;  %v3001_v36 = vld [vmem:[%s11839_s4 + $0xd48] sm:$0xff]  ;;  %v8054_v47 = vcombine.high %v3000_v33, %v3004_v46 }
 0x311   : > { %6775 = vmatprep.subr.bf16.mxu0 %v8008_v57  ;;  %v3005_v50 = vld [vmem:[%s11839_s4 + $0xd68] sm:$0xff]  ;;  %v8045_v57 = vcombine.low %v2992_v44, %v2996_v27  ;;  %v3040_v27 = vld [vmem:[%s11839_s4 + $0xe80] sm:$0xff] }
 0x312   : > { %v8056_v30 = vcombine.high %v3001_v36, %v3005_v50 }
 0x313   : > { %6571 = vmatpush1.bf16.msra.mxu1 %v8005_v25  ;;  %v3012_v25 = vld [vmem:[%s11839_s4 + $0xda0] sm:$0xff] }
 0x314   : > { %6776 = vmatpush1.bf16.msra.mxu0 %v8007_v43  ;;  %6581 = vmatprep.subr.bf16.mxu1 %v8014_v26  ;;  %v3009_v43 = vld [vmem:[%s11839_s4 + $0xd88] sm:$0xff]  ;;  %v8053_v26 = vcombine.low %v3000_v33, %v3004_v46  ;;  %v8062_v41 = vcombine.high %v3008_v53, %v3012_v25  ;;  %v3048_v46 = vld [vmem:[%s11839_s4 + $0xec0] sm:$0xff] }
 0x315   : > { %6786 = vmatprep.subr.bf16.mxu0 %v8016_v35  ;;  %v8055_v35 = vcombine.low %v3001_v36, %v3005_v50  ;;  %v8064_v7 = vcombine.high %v3009_v43, %v3013_v45  ;;  %v3052_v36 = vld [vmem:[%s11839_s4 + $0xee0] sm:$0xff]  ;;  %v3049_v50 = vld [vmem:[%s11839_s4 + $0xec8] sm:$0xff] }
 0x316   : > { %6573 = vmatmul.mubr.bf16.vlgmr.msra.gmra.mrb[48].mxu1 %v10410_v42 }
 0x317   : > { %6778 = vmatmul.mubr.bf16.vlgmr.msra.gmra.mrb[52].mxu0 %v10410_v42  ;;  %6582 = vmatpush1.bf16.msra.mxu1 %v8013_v59  ;;  %v3020_v59 = vld [vmem:[%s11839_s4 + $0xde0] sm:$0xff] }
 0x318   : > { %6613 = vmatprep.mubr.bf16.mxu1 %v10419_v21  ;;  %6787 = vmatpush1.bf16.msra.mxu0 %v8015_v12  ;;  %v8061_v12 = vcombine.low %v3008_v53, %v3012_v25  ;;  %v8070_v9 = vcombine.high %v3016_v62, %v3020_v59  ;;  %v3056_v25 = vld [vmem:[%s11839_s4 + $0xf00] sm:$0xff] }
 0x319   : > { %6818 = vmatprep.mubr.bf16.mxu0 %v10419_v21  ;;  %6583 = vmatprep.subr.bf16.mxu1 %v8022_v14  ;;  %v8063_v14 = vcombine.low %v3009_v43, %v3013_v45  ;;  %v3060_v43 = vld [vmem:[%s11839_s4 + $0xf20] sm:$0xff]  ;;  %v3057_v45 = vld [vmem:[%s11839_s4 + $0xf08] sm:$0xff] }
 0x31a   : > { %6788 = vmatprep.subr.bf16.mxu0 %v8024_v48  ;;  %v3024_v48 = vld [vmem:[%s11839_s4 + $0xe00] sm:$0xff] }
 0x31b   : > { %6584 = vmatpush1.bf16.msra.mxu1 %v8021_v20  ;;  %v3029_v20 = vld [vmem:[%s11839_s4 + $0xe28] sm:$0xff] }
 0x31c   : > { %6789 = vmatpush1.bf16.msra.mxu0 %v8023_v32  ;;  %6585 = vmatprep.subr.bf16.mxu1 %v8030_v58  ;;  %v8069_v32 = vcombine.low %v3016_v62, %v3020_v59  ;;  %v8071_v58 = vcombine.low %v3017_v2, %v3021_v5  ;;  %v8080_v16 = vcombine.high %v3025_v31, %v3029_v20  ;;  %v3064_v59 = vld [vmem:[%s11839_s4 + $0xf40] sm:$0xff]  ;;  %v3065_v5 = vld [vmem:[%s11839_s4 + $0xf48] sm:$0xff] }
 0x31d   : > { %6790 = vmatprep.subr.bf16.mxu0 %v8032_v6  ;;  %v8078_v6 = vcombine.high %v3024_v48, %v3028_v19  ;;  %v3068_v2 = vld [vmem:[%s11839_s4 + $0xf60] sm:$0xff] }
 0x31f   : > { %6586 = vmatpush1.bf16.msra.mxu1 %v8029_v17  ;;  %v3037_v17 = vld [vmem:[%s11839_s4 + $0xe68] sm:$0xff] }
 0x320   : > { %6791 = vmatpush1.bf16.msra.mxu0 %v8031_v56  ;;  %6587 = vmatprep.subr.bf16.mxu1 %v8038_v63  ;;  %v8077_v56 = vcombine.low %v3024_v48, %v3028_v19  ;;  %v8079_v63 = vcombine.low %v3025_v31, %v3029_v20  ;;  %v8088_v44 = vcombine.high %v3033_v23, %v3037_v17  ;;  %v3072_v19 = vld [vmem:[%s11839_s4 + $0xf80] sm:$0xff]  ;;  %v3073_v20 = vld [vmem:[%s11839_s4 + $0xf88] sm:$0xff] }
 0x321   : > { %6792 = vmatprep.subr.bf16.mxu0 %v8040_v39  ;;  %v8086_v39 = vcombine.high %v3032_v18, %v3036_v4  ;;  %v3076_v31 = vld [vmem:[%s11839_s4 + $0xfa0] sm:$0xff] }
 0x323   : > { %6588 = vmatpush1.bf16.msra.mxu1 %v8037_v0  ;;  %v3045_v0 = vld [vmem:[%s11839_s4 + $0xea8] sm:$0xff] }
 0x324   : > { %6793 = vmatpush1.bf16.msra.mxu0 %v8039_v11  ;;  %6589 = vmatprep.subr.bf16.mxu1 %v8046_v1  ;;  %v8085_v11 = vcombine.low %v3032_v18, %v3036_v4  ;;  %v8087_v1 = vcombine.low %v3033_v23, %v3037_v17  ;;  %v8096_v33 = vcombine.high %v3041_v10, %v3045_v0  ;;  %v3080_v4 = vld [vmem:[%s11839_s4 + $0xfc0] sm:$0xff]  ;;  %v3081_v17 = vld [vmem:[%s11839_s4 + $0xfc8] sm:$0xff] }
 0x325   : > { %6794 = vmatprep.subr.bf16.mxu0 %v8048_v22  ;;  %v8094_v22 = vcombine.high %v3040_v27, %v3044_v60  ;;  %v3084_v23 = vld [vmem:[%s11839_s4 + $0xfe0] sm:$0xff] }
 0x327   : > { %6590 = vmatpush1.bf16.msra.mxu1 %v8045_v57  ;;  %v3053_v57 = vld [vmem:[%s11839_s4 + $0xee8] sm:$0xff] }
 0x328   : > { %6795 = vmatpush1.bf16.msra.mxu0 %v8047_v49  ;;  %6591 = vmatprep.subr.bf16.mxu1 %v8054_v47  ;;  %v8093_v49 = vcombine.low %v3040_v27, %v3044_v60  ;;  %v8095_v47 = vcombine.low %v3041_v10, %v3045_v0  ;;  %v8104_v53 = vcombine.high %v3049_v50, %v3053_v57  ;;  %v2542_v60 = vsub.s32 6, %v9423_v8  ;;  %v3088_v0 = vld [vmem:[%s11839_s4 + $0x1000] sm:$0xff] }
 0x329   : > { %6796 = vmatprep.subr.bf16.mxu0 %v8056_v30  ;;  %v8102_v30 = vcombine.high %v3048_v46, %v3052_v36  ;;  %v8134_v27 = vcombine.high %v3080_v4, %v3084_v23 }
 0x32b   : > { %6592 = vmatpush1.bf16.msra.mxu1 %v8053_v26  ;;  %v3061_v26 = vld [vmem:[%s11839_s4 + $0xf28] sm:$0xff] }
 0x32c   : > { %6797 = vmatpush1.bf16.msra.mxu0 %v8055_v35  ;;  %6593 = vmatprep.subr.bf16.mxu1 %v8062_v41  ;;  %v8101_v35 = vcombine.low %v3048_v46, %v3052_v36  ;;  %v8103_v41 = vcombine.low %v3049_v50, %v3053_v57  ;;  %v8112_v62 = vcombine.high %v3057_v45, %v3061_v26 }
 0x32d   : > { %6798 = vmatprep.subr.bf16.mxu0 %v8064_v7  ;;  %v8110_v7 = vcombine.high %v3056_v25, %v3060_v43  ;;  %v8133_v46 = vcombine.low %v3080_v4, %v3084_v23  ;;  %v2543_v50 = vrot.slane %v9958_v37, %v2542_v60  ;;  %v3097_v37 = vld [vmem:[%s11839_s4 + $0x1048] sm:$0xff]  ;;  %v3124_v4 = vld [vmem:[%s11839_s4 + $0x1120] sm:$0xff] }
 0x32e   : > { %v3121_v23 = vld [vmem:[%s11839_s4 + $0x1108] sm:$0xff] }
 0x32f   : > { %6594 = vmatpush1.bf16.msra.mxu1 %v8061_v12  ;;  %v3069_v12 = vld [vmem:[%s11839_s4 + $0xf68] sm:$0xff] }
 0x330   : > { %6799 = vmatpush1.bf16.msra.mxu0 %v8063_v14  ;;  %6595 = vmatprep.subr.bf16.mxu1 %v8070_v9  ;;  %v8109_v14 = vcombine.low %v3056_v25, %v3060_v43  ;;  %v8111_v9 = vcombine.low %v3057_v45, %v3061_v26  ;;  %v8120_v48 = vcombine.high %v3065_v5, %v3069_v12  ;;  %v3101_v43 = vld [vmem:[%s11839_s4 + $0x1068] sm:$0xff] }
 0x331   : > { %6800 = vmatprep.subr.bf16.mxu0 %v8072_v24  ;;  %v8118_v24 = vcombine.high %v3064_v59, %v3068_v2  ;;  %v10618_v45 = vpack.c.bf16 %v2543_v50, %v2543_v50  ;;  %v3136_v50 = vld [vmem:[%s11839_s4 + $0x1180] sm:$0xff] }
 0x333   : > { %6596 = vmatpush1.bf16.msra.mxu1 %v8069_v32  ;;  %v3077_v32 = vld [vmem:[%s11839_s4 + $0xfa8] sm:$0xff] }
 0x334   : > { %6801 = vmatpush1.bf16.msra.mxu0 %v8071_v58  ;;  %6597 = vmatprep.subr.bf16.mxu1 %v8078_v6  ;;  %v8117_v58 = vcombine.low %v3064_v59, %v3068_v2  ;;  %v8119_v6 = vcombine.low %v3065_v5, %v3069_v12  ;;  %v8128_v18 = vcombine.high %v3073_v20, %v3077_v32  ;;  %v3105_v2 = vld [vmem:[%s11839_s4 + $0x1088] sm:$0xff] }
 0x335   : > { %6802 = vmatprep.subr.bf16.mxu0 %v8080_v16  ;;  %v8126_v16 = vcombine.high %v3072_v19, %v3076_v31  ;;  %v8152_v59 = vcombine.high %v3097_v37, %v3101_v43  ;;  %v3109_v5 = vld [vmem:[%s11839_s4 + $0x10a8] sm:$0xff] }
 0x337   : > { %6598 = vmatpush1.bf16.msra.mxu1 %v8077_v56  ;;  %v3085_v56 = vld [vmem:[%s11839_s4 + $0xfe8] sm:$0xff] }
 0x338   : > { %6803 = vmatpush1.bf16.msra.mxu0 %v8079_v63  ;;  %6599 = vmatprep.subr.bf16.mxu1 %v8086_v39  ;;  %v8125_v63 = vcombine.low %v3072_v19, %v3076_v31  ;;  %v2511_v39 = vld [vmem:[#allocation2 + $0x8] sm:$0x3]  ;;  %v8136_v10 = vcombine.high %v3081_v17, %v3085_v56  ;;  %v8135_v36 = vcombine.low %v3081_v17, %v3085_v56  ;;  %v3116_v19 = vld [vmem:[%s11839_s4 + $0x10e0] sm:$0xff] }
 0x339   : > { %6804 = vmatprep.subr.bf16.mxu0 %v8088_v44  ;;  %v8127_v44 = vcombine.low %v3073_v20, %v3077_v32  ;;  %v3113_v31 = vld [vmem:[%s11839_s4 + $0x10c8] sm:$0xff] }
 0x33a   : > { %v3117_v20 = vld [vmem:[%s11839_s4 + $0x10e8] sm:$0xff] }
 0x33b   : > { %6600 = vmatpush1.bf16.msra.mxu1 %v8085_v11  ;;  %v3092_v11 = vld [vmem:[%s11839_s4 + $0x1020] sm:$0xff]  ;;  %v3125_v17 = vld [vmem:[%s11839_s4 + $0x1128] sm:$0xff] }
 0x33c   : > { %6805 = vmatpush1.bf16.msra.mxu0 %v8087_v1  ;;  %6601 = vmatprep.subr.bf16.mxu1 %v8094_v22  ;;  %v3089_v1 = vld [vmem:[%s11839_s4 + $0x1008] sm:$0xff]  ;;  %v8142_v57 = vcombine.high %v3088_v0, %v3092_v11  ;;  %v8141_v25 = vcombine.low %v3088_v0, %v3092_v11 }
 0x33d   : > { %6806 = vmatprep.subr.bf16.mxu0 %v8096_v33  ;;  %v3093_v22 = vld [vmem:[%s11839_s4 + $0x1028] sm:$0xff]  ;;  %v10599_v33 = vmul.f32 0.015625, %v2511_v39 }
 0x33e   : > { %v8143_v26 = vcombine.low %v3089_v1, %v3093_v22  ;;  %v3129_v0 = vld [vmem:[%s11839_s4 + $0x1148] sm:$0xff] }
 0x33f   : > { %6602 = vmatpush1.bf16.msra.mxu1 %v8093_v49  ;;  %v8144_v49 = vcombine.high %v3089_v1, %v3093_v22  ;;  %v3133_v11 = vld [vmem:[%s11839_s4 + $0x1168] sm:$0xff]  ;;  %v8175_v22 = vcombine.low %v3121_v23, %v3125_v17 }
 0x340   : > { %6807 = vmatpush1.bf16.msra.mxu0 %v8095_v47  ;;  %6603 = vmatprep.subr.bf16.mxu1 %v8102_v30  ;;  %v2555_v47 = vrot.slane %v10599_v33, %v9955_v52  ;;  %v3096_v30 = vld [vmem:[%s11839_s4 + $0x1040] sm:$0xff] }
 0x341   : > { %6808 = vmatprep.subr.bf16.mxu0 %v8104_v53  ;;  %v3100_v53 = vld [vmem:[%s11839_s4 + $0x1060] sm:$0xff] }
 0x342   : > { %v8149_v12 = vcombine.low %v3096_v30, %v3100_v53 }
 0x343   : > { %6604 = vmatpush1.bf16.msra.mxu1 %v8101_v35  ;;  %v8150_v35 = vcombine.high %v3096_v30, %v3100_v53  ;;  %v8183_v53 = vcombine.low %v3129_v0, %v3133_v11 }
 0x344   : > { %6809 = vmatpush1.bf16.msra.mxu0 %v8103_v41  ;;  %6605 = vmatprep.subr.bf16.mxu1 %v8110_v7  ;;  %v3104_v41 = vld [vmem:[%s11839_s4 + $0x1080] sm:$0xff] }
 0x345   : > { %6810 = vmatprep.subr.bf16.mxu0 %v8112_v62  ;;  %v3108_v7 = vld [vmem:[%s11839_s4 + $0x10a0] sm:$0xff]  ;;  %v10627_v62 = vpack.c.bf16 %v2555_v47, %v2555_v47  ;;  %v3141_v47 = vld [vmem:[%s11839_s4 + $0x11a8] sm:$0xff] }
 0x346   : > { %v8157_v32 = vcombine.low %v3104_v41, %v3108_v7 }
 0x347   : > { %6606 = vmatpush1.bf16.msra.mxu1 %v8109_v14  ;;  %v8151_v14 = vcombine.low %v3097_v37, %v3101_v43  ;;  %v3144_v43 = vld [vmem:[%s11839_s4 + $0x11c0] sm:$0xff] }
 0x348   : > { %6811 = vmatpush1.bf16.msra.mxu0 %v8111_v9  ;;  %6607 = vmatprep.subr.bf16.mxu1 %v8118_v24  ;;  %v8158_v9 = vcombine.high %v3104_v41, %v3108_v7  ;;  %v8160_v24 = vcombine.high %v3105_v2, %v3109_v5  ;;  %v3149_v41 = vld [vmem:[%s11839_s4 + $0x11e8] sm:$0xff] }
 0x349   : > { %6812 = vmatprep.subr.bf16.mxu0 %v8120_v48  ;;  %v3112_v48 = vld [vmem:[%s11839_s4 + $0x10c0] sm:$0xff] }
 0x34a   : > { %v8165_v56 = vcombine.low %v3112_v48, %v3116_v19 }
 0x34b   : > { %6608 = vmatpush1.bf16.msra.mxu1 %v8117_v58  ;;  %v8159_v58 = vcombine.low %v3105_v2, %v3109_v5 }
 0x34c   : > { %6813 = vmatpush1.bf16.msra.mxu0 %v8119_v6  ;;  %6609 = vmatprep.subr.bf16.mxu1 %v8126_v16  ;;  %v8166_v6 = vcombine.high %v3112_v48, %v3116_v19  ;;  %v8168_v16 = vcombine.high %v3113_v31, %v3117_v20 }
 0x34d   : > { %6814 = vmatprep.subr.bf16.mxu0 %v8128_v18  ;;  %v3120_v18 = vld [vmem:[%s11839_s4 + $0x1100] sm:$0xff] }
 0x34e   : > { %v8174_v39 = vcombine.high %v3120_v18, %v3124_v4  ;;  %v8173_v1 = vcombine.low %v3120_v18, %v3124_v4 }
 0x34f   : > { %6610 = vmatpush1.bf16.msra.mxu1 %v8125_v63  ;;  %v8167_v63 = vcombine.low %v3113_v31, %v3117_v20 }
 0x350   : > { %6815 = vmatpush1.bf16.msra.mxu0 %v8127_v44  ;;  %6611 = vmatprep.subr.bf16.mxu1 %v8134_v27  ;;  %v8176_v44 = vcombine.high %v3121_v23, %v3125_v17  ;;  %v3128_v27 = vld [vmem:[%s11839_s4 + $0x1140] sm:$0xff] }
 0x351   : > { %6816 = vmatprep.subr.bf16.mxu0 %v8136_v10  ;;  %v3132_v10 = vld [vmem:[%s11839_s4 + $0x1160] sm:$0xff] }
 0x352   : > { %v8181_v30 = vcombine.low %v3128_v27, %v3132_v10 }
 0x353   : > { %6612 = vmatpush1.bf16.msra.mxu1 %v8133_v46  ;;  %v8182_v46 = vcombine.high %v3128_v27, %v3132_v10 }
 0x354   : > { %6817 = vmatpush1.bf16.msra.mxu0 %v8135_v36  ;;  %6622 = vmatprep.subr.bf16.mxu1 %v8142_v57  ;;  %v8184_v36 = vcombine.high %v3129_v0, %v3133_v11  ;;  %v3140_v57 = vld [vmem:[%s11839_s4 + $0x11a0] sm:$0xff] }
 0x355   : > { %6827 = vmatprep.subr.bf16.mxu0 %v8144_v49  ;;  %v3137_v49 = vld [vmem:[%s11839_s4 + $0x1188] sm:$0xff]  ;;  %v8189_v7 = vcombine.low %v3136_v50, %v3140_v57 }
 0x356   : > { %6614 = vmatmul.mubr.bf16.vlgmr.msra.gmra.mrb[48].mxu1 %v10618_v45  ;;  %v8192_v37 = vcombine.high %v3137_v49, %v3141_v47 }
 0x357   : > { %6819 = vmatmul.mubr.bf16.vlgmr.msra.gmra.mrb[52].mxu0 %v10618_v45  ;;  %6623 = vmatpush1.bf16.msra.mxu1 %v8141_v25  ;;  %v8190_v25 = vcombine.high %v3136_v50, %v3140_v57 }
 0x358   : > { %6654 = vmatprep.mubr.bf16.mxu1 %v10627_v62  ;;  %6828 = vmatpush1.bf16.msra.mxu0 %v8143_v26  ;;  %v3148_v26 = vld [vmem:[%s11839_s4 + $0x11e0] sm:$0xff] }
 0x359   : > { %6859 = vmatprep.mubr.bf16.mxu0 %v10627_v62  ;;  %6624 = vmatprep.subr.bf16.mxu1 %v8150_v35  ;;  %v3145_v35 = vld [vmem:[%s11839_s4 + $0x11c8] sm:$0xff]  ;;  %v8198_v2 = vcombine.high %v3144_v43, %v3148_v26  ;;  %v8197_v48 = vcombine.low %v3144_v43, %v3148_v26 }
 0x35a   : > { %6829 = vmatprep.subr.bf16.mxu0 %v8152_v59  ;;  %v8191_v59 = vcombine.low %v3137_v49, %v3141_v47  ;;  %v8200_v5 = vcombine.high %v3145_v35, %v3149_v41  ;;  %v8199_v19 = vcombine.low %v3145_v35, %v3149_v41 }
 0x35b   : > { %6625 = vmatpush1.bf16.msra.mxu1 %v8149_v12  ;;  %v3152_v12 = vld [vmem:[%s11839_s4 + $0x1200] sm:$0xff] }
 0x35c   : > { %6830 = vmatpush1.bf16.msra.mxu0 %v8151_v14  ;;  %6626 = vmatprep.subr.bf16.mxu1 %v8158_v9  ;;  %v3156_v14 = vld [vmem:[%s11839_s4 + $0x1220] sm:$0xff]  ;;  %v3153_v9 = vld [vmem:[%s11839_s4 + $0x1208] sm:$0xff] }
 0x35d   : > { %6831 = vmatprep.subr.bf16.mxu0 %v8160_v24  ;;  %v3157_v24 = vld [vmem:[%s11839_s4 + $0x1228] sm:$0xff]  ;;  %v8206_v31 = vcombine.high %v3152_v12, %v3156_v14  ;;  %v8205_v18 = vcombine.low %v3152_v12, %v3156_v14 }
 0x35e   : > { %v8208_v20 = vcombine.high %v3153_v9, %v3157_v24  ;;  %v8207_v4 = vcombine.low %v3153_v9, %v3157_v24 }
 0x35f   : > { %6627 = vmatpush1.bf16.msra.mxu1 %v8157_v32  ;;  %v3160_v32 = vld [vmem:[%s11839_s4 + $0x1240] sm:$0xff] }
 0x360   : > { %6832 = vmatpush1.bf16.msra.mxu0 %v8159_v58  ;;  %6628 = vmatprep.subr.bf16.mxu1 %v8166_v6  ;;  %v3164_v58 = vld [vmem:[%s11839_s4 + $0x1260] sm:$0xff]  ;;  %v3161_v6 = vld [vmem:[%s11839_s4 + $0x1248] sm:$0xff] }
 0x361   : > { %6833 = vmatprep.subr.bf16.mxu0 %v8168_v16  ;;  %v3165_v16 = vld [vmem:[%s11839_s4 + $0x1268] sm:$0xff]  ;;  %v8214_v23 = vcombine.high %v3160_v32, %v3164_v58  ;;  %v8213_v27 = vcombine.low %v3160_v32, %v3164_v58 }
 0x362   : > { %v8216_v17 = vcombine.high %v3161_v6, %v3165_v16  ;;  %v8215_v10 = vcombine.low %v3161_v6, %v3165_v16 }
 0x363   : > { %6629 = vmatpush1.bf16.msra.mxu1 %v8165_v56  ;;  %v3168_v56 = vld [vmem:[%s11839_s4 + $0x1280] sm:$0xff] }
 0x364   : > { %6834 = vmatpush1.bf16.msra.mxu0 %v8167_v63  ;;  %6630 = vmatprep.subr.bf16.mxu1 %v8174_v39  ;;  %v3172_v63 = vld [vmem:[%s11839_s4 + $0x12a0] sm:$0xff]  ;;  %v3169_v39 = vld [vmem:[%s11839_s4 + $0x1288] sm:$0xff] }
 0x365   : > { %6835 = vmatprep.subr.bf16.mxu0 %v8176_v44  ;;  %v3173_v44 = vld [vmem:[%s11839_s4 + $0x12a8] sm:$0xff]  ;;  %v8222_v0 = vcombine.high %v3168_v56, %v3172_v63  ;;  %v8221_v50 = vcombine.low %v3168_v56, %v3172_v63 }
 0x366   : > { %v8224_v11 = vcombine.high %v3169_v39, %v3173_v44  ;;  %v8223_v57 = vcombine.low %v3169_v39, %v3173_v44 }
 0x367   : > { %6631 = vmatpush1.bf16.msra.mxu1 %v8173_v1  ;;  %v3176_v1 = vld [vmem:[%s11839_s4 + $0x12c0] sm:$0xff] }
 0x368   : > { %6836 = vmatpush1.bf16.msra.mxu0 %v8175_v22  ;;  %6632 = vmatprep.subr.bf16.mxu1 %v8182_v46  ;;  %v3180_v22 = vld [vmem:[%s11839_s4 + $0x12e0] sm:$0xff]  ;;  %v3177_v46 = vld [vmem:[%s11839_s4 + $0x12c8] sm:$0xff] }
 0x369   : > { %6837 = vmatprep.subr.bf16.mxu0 %v8184_v36  ;;  %v3181_v36 = vld [vmem:[%s11839_s4 + $0x12e8] sm:$0xff]  ;;  %v8230_v49 = vcombine.high %v3176_v1, %v3180_v22  ;;  %v8229_v43 = vcombine.low %v3176_v1, %v3180_v22 }
 0x36a   : > { %v8232_v47 = vcombine.high %v3177_v46, %v3181_v36  ;;  %v8231_v26 = vcombine.low %v3177_v46, %v3181_v36  ;;  %v2551_v46 = vrot.slane %v10599_v33, %v9438_v54  ;;  %v2591_v33 = vld [vmem:[%s11839_s4 + $0x78] sm:$0xff] }
 0x36b   : > { %6633 = vmatpush1.bf16.msra.mxu1 %v8181_v30  ;;  %v3184_v30 = vld [vmem:[%s11839_s4 + $0x1300] sm:$0xff] }
 0x36c   : > { %6838 = vmatpush1.bf16.msra.mxu0 %v8183_v53  ;;  %6634 = vmatprep.subr.bf16.mxu1 %v8190_v25  ;;  %v3188_v53 = vld [vmem:[%s11839_s4 + $0x1320] sm:$0xff]  ;;  %v3185_v25 = vld [vmem:[%s11839_s4 + $0x1308] sm:$0xff] }
 0x36d   : > { %6839 = vmatprep.subr.bf16.mxu0 %v8192_v37  ;;  %v3189_v37 = vld [vmem:[%s11839_s4 + $0x1328] sm:$0xff]  ;;  %v8238_v35 = vcombine.high %v3184_v30, %v3188_v53  ;;  %v8237_v12 = vcombine.low %v3184_v30, %v3188_v53  ;;  %v2587_v30 = vld [vmem:[%s11839_s4 + $0x58] sm:$0xff]  ;;  %v10820_v53 = vpack.c.bf16 %v2551_v46, %v2551_v46 }
 0x36e   : > { %v8240_v41 = vcombine.high %v3185_v25, %v3189_v37  ;;  %v8239_v14 = vcombine.low %v3185_v25, %v3189_v37  ;;  %v2627_v46 = vld [vmem:[%s11839_s4 + $0x198] sm:$0xff] }
 0x36f   : > { %6635 = vmatpush1.bf16.msra.mxu1 %v8189_v7  ;;  %v3192_v7 = vld [vmem:[%s11839_s4 + $0x1340] sm:$0xff] }
 0x370   : > { %6840 = vmatpush1.bf16.msra.mxu0 %v8191_v59  ;;  %6636 = vmatprep.subr.bf16.mxu1 %v8198_v2  ;;  %v3196_v59 = vld [vmem:[%s11839_s4 + $0x1360] sm:$0xff]  ;;  %v3193_v2 = vld [vmem:[%s11839_s4 + $0x1348] sm:$0xff] }
 0x371   : > { %6841 = vmatprep.subr.bf16.mxu0 %v8200_v5  ;;  %v3197_v5 = vld [vmem:[%s11839_s4 + $0x1368] sm:$0xff]  ;;  %v8246_v9 = vcombine.high %v3192_v7, %v3196_v59  ;;  %v8245_v32 = vcombine.low %v3192_v7, %v3196_v59  ;;  %v2599_v7 = vld [vmem:[%s11839_s4 + $0xb8] sm:$0xff] }
 0x372   : > { %v8248_v24 = vcombine.high %v3193_v2, %v3197_v5  ;;  %v8247_v58 = vcombine.low %v3193_v2, %v3197_v5  ;;  %v7643_v2 = vcombine.low %v2587_v30, %v2591_v33 }
 0x373   : > { %6637 = vmatpush1.bf16.msra.mxu1 %v8197_v48  ;;  %v3200_v48 = vld [vmem:[%s11839_s4 + $0x1380] sm:$0xff] }
 0x374   : > { %6842 = vmatpush1.bf16.msra.mxu0 %v8199_v19  ;;  %6638 = vmatprep.subr.bf16.mxu1 %v8206_v31  ;;  %v3204_v19 = vld [vmem:[%s11839_s4 + $0x13a0] sm:$0xff]  ;;  %v3201_v31 = vld [vmem:[%s11839_s4 + $0x1388] sm:$0xff] }
 0x375   : > { %6843 = vmatprep.subr.bf16.mxu0 %v8208_v20  ;;  %v3205_v20 = vld [vmem:[%s11839_s4 + $0x13a8] sm:$0xff]  ;;  %v8254_v6 = vcombine.high %v3200_v48, %v3204_v19  ;;  %v8253_v56 = vcombine.low %v3200_v48, %v3204_v19  ;;  %v2607_v48 = vld [vmem:[%s11839_s4 + $0xf8] sm:$0xff] }
 0x376   : > { %v8256_v16 = vcombine.high %v3201_v31, %v3205_v20  ;;  %v8255_v63 = vcombine.low %v3201_v31, %v3205_v20 }
 0x377   : > { %6639 = vmatpush1.bf16.msra.mxu1 %v8205_v18  ;;  %v3208_v18 = vld [vmem:[%s11839_s4 + $0x13c0] sm:$0xff] }
 0x378   : > { %6844 = vmatpush1.bf16.msra.mxu0 %v8207_v4  ;;  %6640 = vmatprep.subr.bf16.mxu1 %v8214_v23  ;;  %v3212_v4 = vld [vmem:[%s11839_s4 + $0x13e0] sm:$0xff]  ;;  %v3209_v23 = vld [vmem:[%s11839_s4 + $0x13c8] sm:$0xff] }
 0x379   : > { %6845 = vmatprep.subr.bf16.mxu0 %v8216_v17  ;;  %v3213_v17 = vld [vmem:[%s11839_s4 + $0x13e8] sm:$0xff]  ;;  %v8262_v39 = vcombine.high %v3208_v18, %v3212_v4  ;;  %v8261_v1 = vcombine.low %v3208_v18, %v3212_v4 }
 0x37a   : > { %v8264_v44 = vcombine.high %v3209_v23, %v3213_v17  ;;  %v8263_v22 = vcombine.low %v3209_v23, %v3213_v17 }
 0x37b   : > { %6641 = vmatpush1.bf16.msra.mxu1 %v8213_v27  ;;  %v2578_v27 = vld [vmem:[%s11839_s4 + $0x10] sm:$0xff] }
 0x37c   : > { %6846 = vmatpush1.bf16.msra.mxu0 %v8215_v10  ;;  %6642 = vmatprep.subr.bf16.mxu1 %v8222_v0  ;;  %v2582_v10 = vld [vmem:[%s11839_s4 + $0x30] sm:$0xff]  ;;  %v2579_v0 = vld [vmem:[%s11839_s4 + $0x18] sm:$0xff] }
 0x37d   : > { %6847 = vmatprep.subr.bf16.mxu0 %v8224_v11  ;;  %v2583_v11 = vld [vmem:[%s11839_s4 + $0x38] sm:$0xff]  ;;  %v7634_v36 = vcombine.high %v2578_v27, %v2582_v10 }
 0x37e   : > { %v7635_v25 = vcombine.low %v2579_v0, %v2583_v11 }
 0x37f   : > { %6643 = vmatpush1.bf16.msra.mxu1 %v8221_v50  ;;  %v7636_v50 = vcombine.high %v2579_v0, %v2583_v11 }
 0x380   : > { %6848 = vmatpush1.bf16.msra.mxu0 %v8223_v57  ;;  %6644 = vmatprep.subr.bf16.mxu1 %v8230_v49  ;;  %v2586_v57 = vld [vmem:[%s11839_s4 + $0x50] sm:$0xff] }
 0x381   : > { %6849 = vmatprep.subr.bf16.mxu0 %v8232_v47  ;;  %v2590_v49 = vld [vmem:[%s11839_s4 + $0x70] sm:$0xff]  ;;  %v7633_v47 = vcombine.low %v2578_v27, %v2582_v10 }
 0x382   : > { %v7642_v37 = vcombine.high %v2586_v57, %v2590_v49  ;;  %v7641_v59 = vcombine.low %v2586_v57, %v2590_v49 }
 0x383   : > { %6645 = vmatpush1.bf16.msra.mxu1 %v8229_v43  ;;  %v2594_v43 = vld [vmem:[%s11839_s4 + $0x90] sm:$0xff] }
 0x384   : > { %6850 = vmatpush1.bf16.msra.mxu0 %v8231_v26  ;;  %6646 = vmatprep.subr.bf16.mxu1 %v8238_v35  ;;  %v2598_v26 = vld [vmem:[%s11839_s4 + $0xb0] sm:$0xff]  ;;  %v7644_v35 = vcombine.high %v2587_v30, %v2591_v33 }
 0x385   : > { %6851 = vmatprep.subr.bf16.mxu0 %v8240_v41  ;;  %v2595_v41 = vld [vmem:[%s11839_s4 + $0x98] sm:$0xff]  ;;  %v7650_v5 = vcombine.high %v2594_v43, %v2598_v26  ;;  %v2634_v30 = vld [vmem:[%s11839_s4 + $0x1d0] sm:$0xff] }
 0x386   : > { %v7651_v19 = vcombine.low %v2595_v41, %v2599_v7  ;;  %v2638_v33 = vld [vmem:[%s11839_s4 + $0x1f0] sm:$0xff] }
 0x387   : > { %6647 = vmatpush1.bf16.msra.mxu1 %v8237_v12  ;;  %v7652_v12 = vcombine.high %v2595_v41, %v2599_v7  ;;  %v2642_v7 = vld [vmem:[%s11839_s4 + $0x210] sm:$0xff] }
 0x388   : > { %6852 = vmatpush1.bf16.msra.mxu0 %v8239_v14  ;;  %6648 = vmatprep.subr.bf16.mxu1 %v8246_v9  ;;  %v2602_v14 = vld [vmem:[%s11839_s4 + $0xd0] sm:$0xff] }
 0x389   : > { %6853 = vmatprep.subr.bf16.mxu0 %v8248_v24  ;;  %v2606_v9 = vld [vmem:[%s11839_s4 + $0xf0] sm:$0xff]  ;;  %v2603_v24 = vld [vmem:[%s11839_s4 + $0xd8] sm:$0xff] }
 0x38a   : > { %v7658_v31 = vcombine.high %v2602_v14, %v2606_v9  ;;  %v7660_v20 = vcombine.high %v2603_v24, %v2607_v48  ;;  %v7657_v18 = vcombine.low %v2602_v14, %v2606_v9  ;;  %v7659_v4 = vcombine.low %v2603_v24, %v2607_v48  ;;  %v2650_v48 = vld [vmem:[%s11839_s4 + $0x250] sm:$0xff] }
 0x38b   : > { %6649 = vmatpush1.bf16.msra.mxu1 %v8245_v32  ;;  %v2610_v32 = vld [vmem:[%s11839_s4 + $0x110] sm:$0xff] }
 0x38c   : > { %6854 = vmatpush1.bf16.msra.mxu0 %v8247_v58  ;;  %6650 = vmatprep.subr.bf16.mxu1 %v8254_v6  ;;  %v2614_v58 = vld [vmem:[%s11839_s4 + $0x130] sm:$0xff]  ;;  %v2611_v6 = vld [vmem:[%s11839_s4 + $0x118] sm:$0xff] }
 0x38d   : > { %6855 = vmatprep.subr.bf16.mxu0 %v8256_v16  ;;  %v2615_v16 = vld [vmem:[%s11839_s4 + $0x138] sm:$0xff]  ;;  %v7666_v23 = vcombine.high %v2610_v32, %v2614_v58  ;;  %v7665_v27 = vcombine.low %v2610_v32, %v2614_v58 }
 0x38e   : > { %v7668_v17 = vcombine.high %v2611_v6, %v2615_v16  ;;  %v7667_v10 = vcombine.low %v2611_v6, %v2615_v16  ;;  %v2658_v16 = vld [vmem:[%s11839_s4 + $0x290] sm:$0xff] }
 0x38f   : > { %6651 = vmatpush1.bf16.msra.mxu1 %v8253_v56  ;;  %v2618_v56 = vld [vmem:[%s11839_s4 + $0x150] sm:$0xff] }
 0x390   : > { %6856 = vmatpush1.bf16.msra.mxu0 %v8255_v63  ;;  %6652 = vmatprep.subr.bf16.mxu1 %v8262_v39  ;;  %v2622_v63 = vld [vmem:[%s11839_s4 + $0x170] sm:$0xff]  ;;  %v2619_v39 = vld [vmem:[%s11839_s4 + $0x158] sm:$0xff] }
 0x391   : > { %6857 = vmatprep.subr.bf16.mxu0 %v8264_v44  ;;  %v2623_v44 = vld [vmem:[%s11839_s4 + $0x178] sm:$0xff]  ;;  %v7674_v0 = vcombine.high %v2618_v56, %v2622_v63 }
 0x392   : > { %v7676_v11 = vcombine.high %v2619_v39, %v2623_v44  ;;  %v7675_v57 = vcombine.low %v2619_v39, %v2623_v44  ;;  %v2666_v44 = vld [vmem:[%s11839_s4 + $0x2d0] sm:$0xff] }
 0x393   : > { %6653 = vmatpush1.bf16.msra.mxu1 %v8261_v1  ;;  %v2626_v1 = vld [vmem:[%s11839_s4 + $0x190] sm:$0xff] }
 0x394   : > { %6858 = vmatpush1.bf16.msra.mxu0 %v8263_v22  ;;  %6868 = vmatprep.subr.bf16.mxu1 %v7634_v36  ;;  %v2630_v22 = vld [vmem:[%s11839_s4 + $0x1b0] sm:$0xff]  ;;  %v2631_v36 = vld [vmem:[%s11839_s4 + $0x1b8] sm:$0xff] }
 0x395   : > { %7073 = vmatprep.subr.bf16.mxu0 %v7636_v50  ;;  %v7673_v50 = vcombine.low %v2618_v56, %v2622_v63  ;;  %v7682_v49 = vcombine.high %v2626_v1, %v2630_v22 }
 0x396   : > { %6655 = vmatmul.mubr.bf16.vlgmr.msra.gmra.mrb[48].mxu1 %v10820_v53 }
 0x397   : > { %6860 = vmatmul.mubr.bf16.vlgmr.msra.gmra.mrb[52].mxu0 %v10820_v53  ;;  %6869 = vmatpush1.bf16.msra.mxu1 %v7633_v47  ;;  %v7684_v47 = vcombine.high %v2627_v46, %v2631_v36 }
 0x398   : > { %6900 = vmatprep.mubr.bf16.mxu1 %v9979_v38  ;;  %7074 = vmatpush1.bf16.msra.mxu0 %v7635_v25  ;;  %v2635_v25 = vld [vmem:[%s11839_s4 + $0x1d8] sm:$0xff] }
 0x399   : > { %7105 = vmatprep.mubr.bf16.mxu0 %v9979_v38  ;;  %6870 = vmatprep.subr.bf16.mxu1 %v7642_v37  ;;  %v7649_v38 = vcombine.low %v2594_v43, %v2598_v26  ;;  %v2639_v37 = vld [vmem:[%s11839_s4 + $0x1f8] sm:$0xff]  ;;  %v7681_v43 = vcombine.low %v2626_v1, %v2630_v22  ;;  %v7683_v26 = vcombine.low %v2627_v46, %v2631_v36  ;;  %v2674_v36 = vld [vmem:[%s11839_s4 + $0x310] sm:$0xff] }
 0x39a   : > { %7075 = vmatprep.subr.bf16.mxu0 %v7644_v35  ;;  %v7690_v35 = vcombine.high %v2634_v30, %v2638_v33  ;;  %v7692_v41 = vcombine.high %v2635_v25, %v2639_v37  ;;  %v7691_v14 = vcombine.low %v2635_v25, %v2639_v37  ;;  %v2682_v37 = vld [vmem:[%s11839_s4 + $0x350] sm:$0xff] }
 0x39b   : > { %6871 = vmatpush1.bf16.msra.mxu1 %v7641_v59  ;;  %v2646_v59 = vld [vmem:[%s11839_s4 + $0x230] sm:$0xff] }
 0x39c   : > { %7076 = vmatpush1.bf16.msra.mxu0 %v7643_v2  ;;  %6872 = vmatprep.subr.bf16.mxu1 %v7650_v5  ;;  %v2643_v2 = vld [vmem:[%s11839_s4 + $0x218] sm:$0xff]  ;;  %v7698_v9 = vcombine.high %v2642_v7, %v2646_v59 }
 0x39d   : > { %7077 = vmatprep.subr.bf16.mxu0 %v7652_v12  ;;  %v2647_v5 = vld [vmem:[%s11839_s4 + $0x238] sm:$0xff]  ;;  %v7689_v12 = vcombine.low %v2634_v30, %v2638_v33 }
 0x39e   : > { %v7700_v24 = vcombine.high %v2643_v2, %v2647_v5  ;;  %v7699_v32 = vcombine.low %v2643_v2, %v2647_v5  ;;  %v2690_v5 = vld [vmem:[%s11839_s4 + $0x390] sm:$0xff] }
 0x39f   : > { %6873 = vmatpush1.bf16.msra.mxu1 %v7649_v38  ;;  %v2654_v38 = vld [vmem:[%s11839_s4 + $0x270] sm:$0xff] }
 0x3a0   : > { %7078 = vmatpush1.bf16.msra.mxu0 %v7651_v19  ;;  %6874 = vmatprep.subr.bf16.mxu1 %v7658_v31  ;;  %v2651_v19 = vld [vmem:[%s11839_s4 + $0x258] sm:$0xff]  ;;  %v7706_v58 = vcombine.high %v2650_v48, %v2654_v38 }
 0x3a1   : > { %7079 = vmatprep.subr.bf16.mxu0 %v7660_v20  ;;  %v2655_v31 = vld [vmem:[%s11839_s4 + $0x278] sm:$0xff]  ;;  %v7697_v20 = vcombine.low %v2642_v7, %v2646_v59 }
 0x3a2   : > { %v7708_v6 = vcombine.high %v2651_v19, %v2655_v31  ;;  %v7707_v56 = vcombine.low %v2651_v19, %v2655_v31  ;;  %v2698_v31 = vld [vmem:[%s11839_s4 + $0x3d0] sm:$0xff] }
 0x3a3   : > { %6875 = vmatpush1.bf16.msra.mxu1 %v7657_v18  ;;  %v2662_v18 = vld [vmem:[%s11839_s4 + $0x2b0] sm:$0xff] }
 0x3a4   : > { %7080 = vmatpush1.bf16.msra.mxu0 %v7659_v4  ;;  %6876 = vmatprep.subr.bf16.mxu1 %v7666_v23  ;;  %v2659_v4 = vld [vmem:[%s11839_s4 + $0x298] sm:$0xff]  ;;  %v7714_v63 = vcombine.high %v2658_v16, %v2662_v18 }
 0x3a5   : > { %7081 = vmatprep.subr.bf16.mxu0 %v7668_v17  ;;  %v2663_v23 = vld [vmem:[%s11839_s4 + $0x2b8] sm:$0xff]  ;;  %v7705_v17 = vcombine.low %v2650_v48, %v2654_v38 }
 0x3a6   : > { %v7716_v39 = vcombine.high %v2659_v4, %v2663_v23  ;;  %v7715_v1 = vcombine.low %v2659_v4, %v2663_v23  ;;  %v2706_v23 = vld [vmem:[%s11839_s4 + $0x410] sm:$0xff] }
 0x3a7   : > { %6877 = vmatpush1.bf16.msra.mxu1 %v7665_v27  ;;  %v2670_v27 = vld [vmem:[%s11839_s4 + $0x2f0] sm:$0xff] }
 0x3a8   : > { %7082 = vmatpush1.bf16.msra.mxu0 %v7667_v10  ;;  %6878 = vmatprep.subr.bf16.mxu1 %v7674_v0  ;;  %v2667_v10 = vld [vmem:[%s11839_s4 + $0x2d8] sm:$0xff]  ;;  %v7722_v22 = vcombine.high %v2666_v44, %v2670_v27 }
 0x3a9   : > { %7083 = vmatprep.subr.bf16.mxu0 %v7676_v11  ;;  %v2671_v0 = vld [vmem:[%s11839_s4 + $0x2f8] sm:$0xff]  ;;  %v7713_v11 = vcombine.low %v2658_v16, %v2662_v18 }
 0x3aa   : > { %v7724_v46 = vcombine.high %v2667_v10, %v2671_v0  ;;  %v7723_v30 = vcombine.low %v2667_v10, %v2671_v0  ;;  %v2714_v0 = vld [vmem:[%s11839_s4 + $0x450] sm:$0xff] }
 0x3ab   : > { %6879 = vmatpush1.bf16.msra.mxu1 %v7673_v50  ;;  %v2678_v50 = vld [vmem:[%s11839_s4 + $0x330] sm:$0xff] }
 0x3ac   : > { %7084 = vmatpush1.bf16.msra.mxu0 %v7675_v57  ;;  %6880 = vmatprep.subr.bf16.mxu1 %v7682_v49  ;;  %v2675_v57 = vld [vmem:[%s11839_s4 + $0x318] sm:$0xff]  ;;  %v7730_v33 = vcombine.high %v2674_v36, %v2678_v50 }
 0x3ad   : > { %7085 = vmatprep.subr.bf16.mxu0 %v7684_v47  ;;  %v2679_v49 = vld [vmem:[%s11839_s4 + $0x338] sm:$0xff]  ;;  %v7721_v47 = vcombine.low %v2666_v44, %v2670_v27 }
 0x3ae   : > { %v7732_v25 = vcombine.high %v2675_v57, %v2679_v49  ;;  %v7731_v7 = vcombine.low %v2675_v57, %v2679_v49  ;;  %v2722_v57 = vld [vmem:[%s11839_s4 + $0x490] sm:$0xff] }
 0x3af   : > { %6881 = vmatpush1.bf16.msra.mxu1 %v7681_v43  ;;  %v2686_v43 = vld [vmem:[%s11839_s4 + $0x370] sm:$0xff] }
 0x3b0   : > { %7086 = vmatpush1.bf16.msra.mxu0 %v7683_v26  ;;  %6882 = vmatprep.subr.bf16.mxu1 %v7690_v35  ;;  %v2683_v26 = vld [vmem:[%s11839_s4 + $0x358] sm:$0xff]  ;;  %v7738_v59 = vcombine.high %v2682_v37, %v2686_v43  ;;  %v2726_v49 = vld [vmem:[%s11839_s4 + $0x4b0] sm:$0xff] }
 0x3b1   : > { %7087 = vmatprep.subr.bf16.mxu0 %v7692_v41  ;;  %v2687_v35 = vld [vmem:[%s11839_s4 + $0x378] sm:$0xff]  ;;  %v7729_v41 = vcombine.low %v2674_v36, %v2678_v50 }
 0x3b2   : > { %v7740_v2 = vcombine.high %v2683_v26, %v2687_v35  ;;  %v7739_v48 = vcombine.low %v2683_v26, %v2687_v35  ;;  %v2730_v35 = vld [vmem:[%s11839_s4 + $0x4d0] sm:$0xff] }
 0x3b3   : > { %6883 = vmatpush1.bf16.msra.mxu1 %v7689_v12  ;;  %v2694_v12 = vld [vmem:[%s11839_s4 + $0x3b0] sm:$0xff] }
 0x3b4   : > { %7088 = vmatpush1.bf16.msra.mxu0 %v7691_v14  ;;  %6884 = vmatprep.subr.bf16.mxu1 %v7698_v9  ;;  %v2691_v14 = vld [vmem:[%s11839_s4 + $0x398] sm:$0xff]  ;;  %v7746_v38 = vcombine.high %v2690_v5, %v2694_v12 }
 0x3b5   : > { %7089 = vmatprep.subr.bf16.mxu0 %v7700_v24  ;;  %v2695_v9 = vld [vmem:[%s11839_s4 + $0x3b8] sm:$0xff]  ;;  %v7737_v24 = vcombine.low %v2682_v37, %v2686_v43  ;;  %v7778_v43 = vcombine.high %v2722_v57, %v2726_v49 }
 0x3b6   : > { %v7748_v19 = vcombine.high %v2691_v14, %v2695_v9  ;;  %v7747_v16 = vcombine.low %v2691_v14, %v2695_v9  ;;  %v2742_v14 = vld [vmem:[%s11839_s4 + $0x530] sm:$0xff]  ;;  %v2739_v9 = vld [vmem:[%s11839_s4 + $0x518] sm:$0xff] }
 0x3b7   : > { %6885 = vmatpush1.bf16.msra.mxu1 %v7697_v20  ;;  %v2702_v20 = vld [vmem:[%s11839_s4 + $0x3f0] sm:$0xff] }
 0x3b8   : > { %7090 = vmatpush1.bf16.msra.mxu0 %v7699_v32  ;;  %6886 = vmatprep.subr.bf16.mxu1 %v7706_v58  ;;  %v2699_v32 = vld [vmem:[%s11839_s4 + $0x3d8] sm:$0xff]  ;;  %v7754_v18 = vcombine.high %v2698_v31, %v2702_v20 }
 0x3b9   : > { %7091 = vmatprep.subr.bf16.mxu0 %v7708_v6  ;;  %v2703_v58 = vld [vmem:[%s11839_s4 + $0x3f8] sm:$0xff]  ;;  %v7745_v6 = vcombine.low %v2690_v5, %v2694_v12  ;;  %v2738_v12 = vld [vmem:[%s11839_s4 + $0x510] sm:$0xff] }
 0x3ba   : > { %v7756_v4 = vcombine.high %v2699_v32, %v2703_v58  ;;  %v7755_v44 = vcombine.low %v2699_v32, %v2703_v58  ;;  %v2750_v32 = vld [vmem:[%s11839_s4 + $0x570] sm:$0xff]  ;;  %v2747_v58 = vld [vmem:[%s11839_s4 + $0x558] sm:$0xff] }
 0x3bb   : > { %6887 = vmatpush1.bf16.msra.mxu1 %v7705_v17  ;;  %v2710_v17 = vld [vmem:[%s11839_s4 + $0x430] sm:$0xff] }
 0x3bc   : > { %7092 = vmatpush1.bf16.msra.mxu0 %v7707_v56  ;;  %6888 = vmatprep.subr.bf16.mxu1 %v7714_v63  ;;  %v2707_v56 = vld [vmem:[%s11839_s4 + $0x418] sm:$0xff]  ;;  %v7762_v27 = vcombine.high %v2706_v23, %v2710_v17 }
 0x3bd   : > { %7093 = vmatprep.subr.bf16.mxu0 %v7716_v39  ;;  %v2711_v63 = vld [vmem:[%s11839_s4 + $0x438] sm:$0xff]  ;;  %v7753_v39 = vcombine.low %v2698_v31, %v2702_v20  ;;  %v2746_v20 = vld [vmem:[%s11839_s4 + $0x550] sm:$0xff] }
 0x3be   : > { %v7764_v10 = vcombine.high %v2707_v56, %v2711_v63  ;;  %v7763_v36 = vcombine.low %v2707_v56, %v2711_v63  ;;  %v2758_v56 = vld [vmem:[%s11839_s4 + $0x5b0] sm:$0xff]  ;;  %v2755_v63 = vld [vmem:[%s11839_s4 + $0x598] sm:$0xff] }
 0x3bf   : > { %6889 = vmatpush1.bf16.msra.mxu1 %v7713_v11  ;;  %v2718_v11 = vld [vmem:[%s11839_s4 + $0x470] sm:$0xff] }
 0x3c0   : > { %7094 = vmatpush1.bf16.msra.mxu0 %v7715_v1  ;;  %6890 = vmatprep.subr.bf16.mxu1 %v7722_v22  ;;  %v7761_v1 = vcombine.low %v2706_v23, %v2710_v17  ;;  %v2715_v22 = vld [vmem:[%s11839_s4 + $0x458] sm:$0xff]  ;;  %v7770_v50 = vcombine.high %v2714_v0, %v2718_v11  ;;  %v2754_v17 = vld [vmem:[%s11839_s4 + $0x590] sm:$0xff] }
 0x3c1   : > { %7095 = vmatprep.subr.bf16.mxu0 %v7724_v46  ;;  %v2719_v46 = vld [vmem:[%s11839_s4 + $0x478] sm:$0xff] }
 0x3c2   : > { %v7771_v37 = vcombine.low %v2715_v22, %v2719_v46 }
 0x3c3   : > { %6891 = vmatpush1.bf16.msra.mxu1 %v7721_v47  ;;  %v7772_v47 = vcombine.high %v2715_v22, %v2719_v46  ;;  %v2763_v22 = vld [vmem:[%s11839_s4 + $0x5d8] sm:$0xff] }
 0x3c4   : > { %7096 = vmatpush1.bf16.msra.mxu0 %v7723_v30  ;;  %6892 = vmatprep.subr.bf16.mxu1 %v7730_v33  ;;  %v2723_v30 = vld [vmem:[%s11839_s4 + $0x498] sm:$0xff] }
 0x3c5   : > { %7097 = vmatprep.subr.bf16.mxu0 %v7732_v25  ;;  %v2727_v33 = vld [vmem:[%s11839_s4 + $0x4b8] sm:$0xff]  ;;  %v7769_v25 = vcombine.low %v2714_v0, %v2718_v11  ;;  %v2762_v11 = vld [vmem:[%s11839_s4 + $0x5d0] sm:$0xff] }
 0x3c6   : > { %v7780_v26 = vcombine.high %v2723_v30, %v2727_v33  ;;  %v2767_v46 = vld [vmem:[%s11839_s4 + $0x5f8] sm:$0xff] }
 0x3c7   : > { %6893 = vmatpush1.bf16.msra.mxu1 %v7729_v41  ;;  %v2734_v41 = vld [vmem:[%s11839_s4 + $0x4f0] sm:$0xff] }
 0x3c8   : > { %7098 = vmatpush1.bf16.msra.mxu0 %v7731_v7  ;;  %6894 = vmatprep.subr.bf16.mxu1 %v7738_v59  ;;  %v2735_v7 = vld [vmem:[%s11839_s4 + $0x4f8] sm:$0xff]  ;;  %v7779_v59 = vcombine.low %v2723_v30, %v2727_v33  ;;  %v2774_v30 = vld [vmem:[%s11839_s4 + $0x630] sm:$0xff] }
 0x3c9   : > { %7099 = vmatprep.subr.bf16.mxu0 %v7740_v2  ;;  %v7786_v2 = vcombine.high %v2730_v35, %v2734_v41  ;;  %v2771_v33 = vld [vmem:[%s11839_s4 + $0x618] sm:$0xff] }
 0x3cb   : > { %6895 = vmatpush1.bf16.msra.mxu1 %v7737_v24  ;;  %v2743_v24 = vld [vmem:[%s11839_s4 + $0x538] sm:$0xff] }
 0x3cc   : > { %7100 = vmatpush1.bf16.msra.mxu0 %v7739_v48  ;;  %6896 = vmatprep.subr.bf16.mxu1 %v7746_v38  ;;  %v7785_v48 = vcombine.low %v2730_v35, %v2734_v41  ;;  %v7796_v31 = vcombine.high %v2739_v9, %v2743_v24  ;;  %v2778_v41 = vld [vmem:[%s11839_s4 + $0x650] sm:$0xff] }
 0x3cd   : > { %7101 = vmatprep.subr.bf16.mxu0 %v7748_v19  ;;  %v7794_v19 = vcombine.high %v2738_v12, %v2742_v14 }
 0x3cf   : > { %6897 = vmatpush1.bf16.msra.mxu1 %v7745_v6  ;;  %v2751_v6 = vld [vmem:[%s11839_s4 + $0x578] sm:$0xff] }
 0x3d0   : > { %7102 = vmatpush1.bf16.msra.mxu0 %v7747_v16  ;;  %6898 = vmatprep.subr.bf16.mxu1 %v7754_v18  ;;  %v7793_v16 = vcombine.low %v2738_v12, %v2742_v14  ;;  %v7795_v18 = vcombine.low %v2739_v9, %v2743_v24  ;;  %v7804_v23 = vcombine.high %v2747_v58, %v2751_v6  ;;  %v2786_v14 = vld [vmem:[%s11839_s4 + $0x690] sm:$0xff]  ;;  %v2787_v24 = vld [vmem:[%s11839_s4 + $0x698] sm:$0xff] }
 0x3d1   : > { %7103 = vmatprep.subr.bf16.mxu0 %v7756_v4  ;;  %v7802_v4 = vcombine.high %v2746_v20, %v2750_v32  ;;  %v2790_v9 = vld [vmem:[%s11839_s4 + $0x6b0] sm:$0xff] }
 0x3d3   : > { %6899 = vmatpush1.bf16.msra.mxu1 %v7753_v39  ;;  %v2759_v39 = vld [vmem:[%s11839_s4 + $0x5b8] sm:$0xff] }
 0x3d4   : > { %7104 = vmatpush1.bf16.msra.mxu0 %v7755_v44  ;;  %6909 = vmatprep.subr.bf16.mxu1 %v7762_v27  ;;  %v7801_v44 = vcombine.low %v2746_v20, %v2750_v32  ;;  %v7803_v27 = vcombine.low %v2747_v58, %v2751_v6  ;;  %v7812_v0 = vcombine.high %v2755_v63, %v2759_v39  ;;  %v2794_v32 = vld [vmem:[%s11839_s4 + $0x6d0] sm:$0xff]  ;;  %v2795_v6 = vld [vmem:[%s11839_s4 + $0x6d8] sm:$0xff] }
 0x3d5   : > { %7114 = vmatprep.subr.bf16.mxu0 %v7764_v10  ;;  %v7810_v10 = vcombine.high %v2754_v17, %v2758_v56  ;;  %v2798_v58 = vld [vmem:[%s11839_s4 + $0x6f0] sm:$0xff] }
 0x3d6   : > { %6901 = vmatmul.mubr.bf16.vlgmr.msra.gmra.mrb[52].mxu1 %v9981_v40 }
 0x3d7   : > { %7106 = vmatmul.mubr.bf16.vlgmr.msra.gmra.mrb[56].mxu0 %v9981_v40  ;;  %6910 = vmatpush1.bf16.msra.mxu1 %v7761_v1  ;;  %v2731_v40 = vld [vmem:[%s11839_s4 + $0x4d8] sm:$0xff]  ;;  %v2766_v1 = vld [vmem:[%s11839_s4 + $0x5f0] sm:$0xff] }
 0x3d8   : > { %6941 = vmatprep.mubr.bf16.mxu1 %v9999_v29  ;;  %7115 = vmatpush1.bf16.msra.mxu0 %v7763_v36  ;;  %v7788_v5 = vcombine.high %v2731_v40, %v2735_v7  ;;  %v7787_v38 = vcombine.low %v2731_v40, %v2735_v7  ;;  %v7809_v36 = vcombine.low %v2754_v17, %v2758_v56  ;;  %v2782_v40 = vld [vmem:[%s11839_s4 + $0x670] sm:$0xff]  ;;  %v2779_v7 = vld [vmem:[%s11839_s4 + $0x658] sm:$0xff] }
 0x3d9   : > { %7146 = vmatprep.mubr.bf16.mxu0 %v9999_v29  ;;  %6911 = vmatprep.subr.bf16.mxu1 %v7770_v50  ;;  %v7777_v29 = vcombine.low %v2722_v57, %v2726_v49  ;;  %v7811_v50 = vcombine.low %v2755_v63, %v2759_v39  ;;  %v7818_v57 = vcombine.high %v2762_v11, %v2766_v1  ;;  %v2802_v56 = vld [vmem:[%s11839_s4 + $0x710] sm:$0xff]  ;;  %v2803_v39 = vld [vmem:[%s11839_s4 + $0x718] sm:$0xff] }
 0x3da   : > { %7116 = vmatprep.subr.bf16.mxu0 %v7772_v47  ;;  %v7820_v49 = vcombine.high %v2763_v22, %v2767_v46  ;;  %v2770_v47 = vld [vmem:[%s11839_s4 + $0x610] sm:$0xff] }
 0x3db   : > { %6912 = vmatpush1.bf16.msra.mxu1 %v7769_v25  ;;  %v2775_v25 = vld [vmem:[%s11839_s4 + $0x638] sm:$0xff]  ;;  %v2806_v63 = vld [vmem:[%s11839_s4 + $0x730] sm:$0xff] }
 0x3dc   : > { %7117 = vmatpush1.bf16.msra.mxu0 %v7771_v37  ;;  %6913 = vmatprep.subr.bf16.mxu1 %v7778_v43  ;;  %v7817_v37 = vcombine.low %v2762_v11, %v2766_v1  ;;  %v7819_v43 = vcombine.low %v2763_v22, %v2767_v46  ;;  %v7828_v35 = vcombine.high %v2771_v33, %v2775_v25  ;;  %v2810_v1 = vld [vmem:[%s11839_s4 + $0x750] sm:$0xff]  ;;  %v2811_v46 = vld [vmem:[%s11839_s4 + $0x758] sm:$0xff] }
 0x3dd   : > { %7118 = vmatprep.subr.bf16.mxu0 %v7780_v26  ;;  %v7826_v26 = vcombine.high %v2770_v47, %v2774_v30  ;;  %v2814_v22 = vld [vmem:[%s11839_s4 + $0x770] sm:$0xff] }
 0x3df   : > { %6914 = vmatpush1.bf16.msra.mxu1 %v7777_v29  ;;  %v2783_v29 = vld [vmem:[%s11839_s4 + $0x678] sm:$0xff] }
 0x3e0   : > { %7119 = vmatpush1.bf16.msra.mxu0 %v7779_v59  ;;  %6915 = vmatprep.subr.bf16.mxu1 %v7786_v2  ;;  %v7825_v59 = vcombine.low %v2770_v47, %v2774_v30  ;;  %v7827_v2 = vcombine.low %v2771_v33, %v2775_v25  ;;  %v7836_v12 = vcombine.high %v2779_v7, %v2783_v29  ;;  %v2818_v30 = vld [vmem:[%s11839_s4 + $0x790] sm:$0xff]  ;;  %v2819_v25 = vld [vmem:[%s11839_s4 + $0x798] sm:$0xff] }
 0x3e1   : > { %7120 = vmatprep.subr.bf16.mxu0 %v7788_v5  ;;  %v7834_v5 = vcombine.high %v2778_v41, %v2782_v40  ;;  %v2822_v33 = vld [vmem:[%s11839_s4 + $0x7b0] sm:$0xff] }
 0x3e3   : > { %6916 = vmatpush1.bf16.msra.mxu1 %v7785_v48  ;;  %v2791_v48 = vld [vmem:[%s11839_s4 + $0x6b8] sm:$0xff] }
 0x3e4   : > { %7121 = vmatpush1.bf16.msra.mxu0 %v7787_v38  ;;  %6917 = vmatprep.subr.bf16.mxu1 %v7794_v19  ;;  %v7833_v38 = vcombine.low %v2778_v41, %v2782_v40  ;;  %v7835_v19 = vcombine.low %v2779_v7, %v2783_v29  ;;  %v7844_v20 = vcombine.high %v2787_v24, %v2791_v48  ;;  %v2826_v40 = vld [vmem:[%s11839_s4 + $0x7d0] sm:$0xff]  ;;  %v2827_v29 = vld [vmem:[%s11839_s4 + $0x7d8] sm:$0xff] }
 0x3e5   : > { %7122 = vmatprep.subr.bf16.mxu0 %v7796_v31  ;;  %v7842_v31 = vcombine.high %v2786_v14, %v2790_v9  ;;  %v2830_v7 = vld [vmem:[%s11839_s4 + $0x7f0] sm:$0xff] }
 0x3e7   : > { %6918 = vmatpush1.bf16.msra.mxu1 %v7793_v16  ;;  %v2799_v16 = vld [vmem:[%s11839_s4 + $0x6f8] sm:$0xff] }
 0x3e8   : > { %7123 = vmatpush1.bf16.msra.mxu0 %v7795_v18  ;;  %6919 = vmatprep.subr.bf16.mxu1 %v7802_v4  ;;  %v7841_v18 = vcombine.low %v2786_v14, %v2790_v9  ;;  %v7843_v4 = vcombine.low %v2787_v24, %v2791_v48  ;;  %v7852_v17 = vcombine.high %v2795_v6, %v2799_v16  ;;  %v2834_v9 = vld [vmem:[%s11839_s4 + $0x810] sm:$0xff]  ;;  %v2835_v48 = vld [vmem:[%s11839_s4 + $0x818] sm:$0xff] }
 0x3e9   : > { %7124 = vmatprep.subr.bf16.mxu0 %v7804_v23  ;;  %v7850_v23 = vcombine.high %v2794_v32, %v2798_v58  ;;  %v2838_v24 = vld [vmem:[%s11839_s4 + $0x830] sm:$0xff] }
 0x3eb   : > { %6920 = vmatpush1.bf16.msra.mxu1 %v7801_v44  ;;  %v2807_v44 = vld [vmem:[%s11839_s4 + $0x738] sm:$0xff] }
 0x3ec   : > { %7125 = vmatpush1.bf16.msra.mxu0 %v7803_v27  ;;  %6921 = vmatprep.subr.bf16.mxu1 %v7810_v10  ;;  %v7849_v27 = vcombine.low %v2794_v32, %v2798_v58  ;;  %v7851_v10 = vcombine.low %v2795_v6, %v2799_v16  ;;  %v7860_v11 = vcombine.high %v2803_v39, %v2807_v44  ;;  %v2842_v58 = vld [vmem:[%s11839_s4 + $0x850] sm:$0xff] }
 0x3ed   : > { %7126 = vmatprep.subr.bf16.mxu0 %v7812_v0  ;;  %v7858_v0 = vcombine.high %v2802_v56, %v2806_v63  ;;  %v2846_v6 = vld [vmem:[%s11839_s4 + $0x870] sm:$0xff]  ;;  %v7889_v16 = vcombine.low %v2834_v9, %v2838_v24 }
 0x3ef   : > { %6922 = vmatpush1.bf16.msra.mxu1 %v7809_v36  ;;  %v2815_v36 = vld [vmem:[%s11839_s4 + $0x778] sm:$0xff] }
 0x3f0   : > { %7127 = vmatpush1.bf16.msra.mxu0 %v7811_v50  ;;  %6923 = vmatprep.subr.bf16.mxu1 %v7818_v57  ;;  %v7857_v50 = vcombine.low %v2802_v56, %v2806_v63  ;;  %v7859_v57 = vcombine.low %v2803_v39, %v2807_v44  ;;  %v7868_v47 = vcombine.high %v2811_v46, %v2815_v36  ;;  %v2850_v56 = vld [vmem:[%s11839_s4 + $0x890] sm:$0xff]  ;;  %v2851_v44 = vld [vmem:[%s11839_s4 + $0x898] sm:$0xff] }
 0x3f1   : > { %7128 = vmatprep.subr.bf16.mxu0 %v7820_v49  ;;  %v7866_v49 = vcombine.high %v2810_v1, %v2814_v22  ;;  %v2854_v63 = vld [vmem:[%s11839_s4 + $0x8b0] sm:$0xff] }
 0x3f3   : > { %6924 = vmatpush1.bf16.msra.mxu1 %v7817_v37  ;;  %v2823_v37 = vld [vmem:[%s11839_s4 + $0x7b8] sm:$0xff] }
 0x3f4   : > { %7129 = vmatpush1.bf16.msra.mxu0 %v7819_v43  ;;  %6925 = vmatprep.subr.bf16.mxu1 %v7826_v26  ;;  %v7865_v43 = vcombine.low %v2810_v1, %v2814_v22  ;;  %v7867_v26 = vcombine.low %v2811_v46, %v2815_v36  ;;  %v7876_v41 = vcombine.high %v2819_v25, %v2823_v37  ;;  %v2858_v22 = vld [vmem:[%s11839_s4 + $0x8d0] sm:$0xff]  ;;  %v2863_v36 = vld [vmem:[%s11839_s4 + $0x8f8] sm:$0xff] }
 0x3f5   : > { %7130 = vmatprep.subr.bf16.mxu0 %v7828_v35  ;;  %v7874_v35 = vcombine.high %v2818_v30, %v2822_v33  ;;  %v2862_v46 = vld [vmem:[%s11839_s4 + $0x8f0] sm:$0xff] }
 0x3f7   : > { %6926 = vmatpush1.bf16.msra.mxu1 %v7825_v59  ;;  %v2831_v59 = vld [vmem:[%s11839_s4 + $0x7f8] sm:$0xff] }
 0x3f8   : > { %7131 = vmatpush1.bf16.msra.mxu0 %v7827_v2  ;;  %6927 = vmatprep.subr.bf16.mxu1 %v7834_v5  ;;  %v7873_v2 = vcombine.low %v2818_v30, %v2822_v33  ;;  %v7875_v5 = vcombine.low %v2819_v25, %v2823_v37  ;;  %v7884_v14 = vcombine.high %v2827_v29, %v2831_v59  ;;  %v2870_v30 = vld [vmem:[%s11839_s4 + $0x930] sm:$0xff]  ;;  %v2867_v33 = vld [vmem:[%s11839_s4 + $0x918] sm:$0xff] }
 0x3f9   : > { %7132 = vmatprep.subr.bf16.mxu0 %v7836_v12  ;;  %v7882_v12 = vcombine.high %v2826_v40, %v2830_v7  ;;  %v2871_v25 = vld [vmem:[%s11839_s4 + $0x938] sm:$0xff]  ;;  %v7913_v37 = vcombine.low %v2858_v22, %v2862_v46 }
 0x3fb   : > { %6928 = vmatpush1.bf16.msra.mxu1 %v7833_v38  ;;  %v2839_v38 = vld [vmem:[%s11839_s4 + $0x838] sm:$0xff] }
 0x3fc   : > { %7133 = vmatpush1.bf16.msra.mxu0 %v7835_v19  ;;  %6929 = vmatprep.subr.bf16.mxu1 %v7842_v31  ;;  %v7881_v19 = vcombine.low %v2826_v40, %v2830_v7  ;;  %v7883_v31 = vcombine.low %v2827_v29, %v2831_v59  ;;  %v7892_v32 = vcombine.high %v2835_v48, %v2839_v38  ;;  %v2878_v40 = vld [vmem:[%s11839_s4 + $0x970] sm:$0xff]  ;;  %v2875_v7 = vld [vmem:[%s11839_s4 + $0x958] sm:$0xff] }
 0x3fd   : > { %7134 = vmatprep.subr.bf16.mxu0 %v7844_v20  ;;  %v7890_v20 = vcombine.high %v2834_v9, %v2838_v24  ;;  %v2879_v29 = vld [vmem:[%s11839_s4 + $0x978] sm:$0xff]  ;;  %v2886_v9 = vld [vmem:[%s11839_s4 + $0x9b0] sm:$0xff] }
 0x3fe   : > { %v2883_v24 = vld [vmem:[%s11839_s4 + $0x998] sm:$0xff] }
 0x3ff   : > { %6930 = vmatpush1.bf16.msra.mxu1 %v7841_v18  ;;  %v2843_v18 = vld [vmem:[%s11839_s4 + $0x858] sm:$0xff] }
 0x400   : > { %7135 = vmatpush1.bf16.msra.mxu0 %v7843_v4  ;;  %6931 = vmatprep.subr.bf16.mxu1 %v7850_v23  ;;  %v2847_v4 = vld [vmem:[%s11839_s4 + $0x878] sm:$0xff]  ;;  %v7891_v23 = vcombine.low %v2835_v48, %v2839_v38 }
 0x401   : > { %7136 = vmatprep.subr.bf16.mxu0 %v7852_v17  ;;  %v7898_v17 = vcombine.high %v2842_v58, %v2846_v6  ;;  %v7900_v39 = vcombine.high %v2843_v18, %v2847_v4  ;;  %v2887_v48 = vld [vmem:[%s11839_s4 + $0x9b8] sm:$0xff] }
 0x403   : > { %6932 = vmatpush1.bf16.msra.mxu1 %v7849_v27  ;;  %v2855_v27 = vld [vmem:[%s11839_s4 + $0x8b8] sm:$0xff] }
 0x404   : > { %7137 = vmatpush1.bf16.msra.mxu0 %v7851_v10  ;;  %6933 = vmatprep.subr.bf16.mxu1 %v7858_v0  ;;  %v7897_v10 = vcombine.low %v2842_v58, %v2846_v6  ;;  %v7899_v0 = vcombine.low %v2843_v18, %v2847_v4  ;;  %v7908_v1 = vcombine.high %v2851_v44, %v2855_v27  ;;  %v2894_v58 = vld [vmem:[%s11839_s4 + $0x9f0] sm:$0xff]  ;;  %v2891_v6 = vld [vmem:[%s11839_s4 + $0x9d8] sm:$0xff] }
 0x405   : > { %7138 = vmatprep.subr.bf16.mxu0 %v7860_v11  ;;  %v7906_v11 = vcombine.high %v2850_v56, %v2854_v63  ;;  %v7939_v4 = vcombine.low %v2883_v24, %v2887_v48 }
 0x407   : > { %6934 = vmatpush1.bf16.msra.mxu1 %v7857_v50  ;;  %v7907_v50 = vcombine.low %v2851_v44, %v2855_v27  ;;  %v2903_v44 = vld [vmem:[%s11839_s4 + $0xa38] sm:$0xff] }
 0x408   : > { %7139 = vmatpush1.bf16.msra.mxu0 %v7859_v57  ;;  %6935 = vmatprep.subr.bf16.mxu1 %v7866_v49  ;;  %v7914_v57 = vcombine.high %v2858_v22, %v2862_v46  ;;  %v2910_v22 = vld [vmem:[%s11839_s4 + $0xa70] sm:$0xff]  ;;  %v2907_v46 = vld [vmem:[%s11839_s4 + $0xa58] sm:$0xff] }
 0x409   : > { %7140 = vmatprep.subr.bf16.mxu0 %v7868_v47  ;;  %v2866_v47 = vld [vmem:[%s11839_s4 + $0x910] sm:$0xff] }
 0x40a   : > { %v7921_v59 = vcombine.low %v2866_v47, %v2870_v30 }
 0x40b   : > { %6936 = vmatpush1.bf16.msra.mxu1 %v7865_v43 }
 0x40c   : > { %7141 = vmatpush1.bf16.msra.mxu0 %v7867_v26  ;;  %6937 = vmatprep.subr.bf16.mxu1 %v7874_v35  ;;  %v7922_v26 = vcombine.high %v2866_v47, %v2870_v30  ;;  %v7924_v35 = vcombine.high %v2867_v33, %v2871_v25  ;;  %v2918_v47 = vld [vmem:[%s11839_s4 + $0xab0] sm:$0xff]  ;;  %v2915_v30 = vld [vmem:[%s11839_s4 + $0xa98] sm:$0xff] }
 0x40d   : > { %7142 = vmatprep.subr.bf16.mxu0 %v7876_v41  ;;  %v2874_v41 = vld [vmem:[%s11839_s4 + $0x950] sm:$0xff] }
 0x40e   : > { %v7929_v38 = vcombine.low %v2874_v41, %v2878_v40 }
 0x40f   : > { %6938 = vmatpush1.bf16.msra.mxu1 %v7873_v2  ;;  %v7923_v2 = vcombine.low %v2867_v33, %v2871_v25  ;;  %v2919_v33 = vld [vmem:[%s11839_s4 + $0xab8] sm:$0xff] }
 0x410   : > { %7143 = vmatpush1.bf16.msra.mxu0 %v7875_v5  ;;  %6939 = vmatprep.subr.bf16.mxu1 %v7882_v12  ;;  %v7930_v5 = vcombine.high %v2874_v41, %v2878_v40  ;;  %v7932_v12 = vcombine.high %v2875_v7, %v2879_v29  ;;  %v2926_v41 = vld [vmem:[%s11839_s4 + $0xaf0] sm:$0xff]  ;;  %v2923_v40 = vld [vmem:[%s11839_s4 + $0xad8] sm:$0xff] }
 0x411   : > { %7144 = vmatprep.subr.bf16.mxu0 %v7884_v14  ;;  %v2882_v14 = vld [vmem:[%s11839_s4 + $0x990] sm:$0xff] }
 0x412   : > { %v7937_v18 = vcombine.low %v2882_v14, %v2886_v9 }
 0x413   : > { %6940 = vmatpush1.bf16.msra.mxu1 %v7881_v19  ;;  %v7931_v19 = vcombine.low %v2875_v7, %v2879_v29  ;;  %v2927_v7 = vld [vmem:[%s11839_s4 + $0xaf8] sm:$0xff] }
 0x414   : > { %7145 = vmatpush1.bf16.msra.mxu0 %v7883_v31  ;;  %6950 = vmatprep.subr.bf16.mxu1 %v7890_v20  ;;  %v7938_v31 = vcombine.high %v2882_v14, %v2886_v9  ;;  %v7940_v20 = vcombine.high %v2883_v24, %v2887_v48  ;;  %v2934_v14 = vld [vmem:[%s11839_s4 + $0xb30] sm:$0xff]  ;;  %v2931_v9 = vld [vmem:[%s11839_s4 + $0xb18] sm:$0xff] }
 0x415   : > { %7155 = vmatprep.subr.bf16.mxu0 %v7892_v32  ;;  %v2890_v32 = vld [vmem:[%s11839_s4 + $0x9d0] sm:$0xff]  ;;  %v2935_v24 = vld [vmem:[%s11839_s4 + $0xb38] sm:$0xff] }
 0x416   : > { %6942 = vmatmul.mubr.bf16.vlgmr.msra.gmra.mrb[52].mxu1 %v10202_v55  ;;  %v7945_v27 = vcombine.low %v2890_v32, %v2894_v58 }
 0x417   : > { %7147 = vmatmul.mubr.bf16.vlgmr.msra.gmra.mrb[56].mxu0 %v10202_v55  ;;  %6951 = vmatpush1.bf16.msra.mxu1 %v7889_v16  ;;  %v2859_v55 = vld [vmem:[%s11839_s4 + $0x8d8] sm:$0xff] }
 0x418   : > { %6982 = vmatprep.mubr.bf16.mxu1 %v10204_v28  ;;  %7156 = vmatpush1.bf16.msra.mxu0 %v7891_v23  ;;  %v7916_v49 = vcombine.high %v2859_v55, %v2863_v36  ;;  %v7915_v43 = vcombine.low %v2859_v55, %v2863_v36  ;;  %v2895_v16 = vld [vmem:[%s11839_s4 + $0x9f8] sm:$0xff]  ;;  %v7946_v23 = vcombine.high %v2890_v32, %v2894_v58  ;;  %v2942_v32 = vld [vmem:[%s11839_s4 + $0xb70] sm:$0xff] }
 0x419   : > { %7187 = vmatprep.mubr.bf16.mxu0 %v10204_v28  ;;  %6952 = vmatprep.subr.bf16.mxu1 %v7898_v17  ;;  %v7905_v28 = vcombine.low %v2850_v56, %v2854_v63  ;;  %v7948_v17 = vcombine.high %v2891_v6, %v2895_v16  ;;  %v2898_v56 = vld [vmem:[%s11839_s4 + $0xa10] sm:$0xff]  ;;  %v2911_v55 = vld [vmem:[%s11839_s4 + $0xa78] sm:$0xff] }
 0x41a   : > { %7157 = vmatprep.subr.bf16.mxu0 %v7900_v39  ;;  %v2902_v63 = vld [vmem:[%s11839_s4 + $0xa30] sm:$0xff]  ;;  %v2899_v39 = vld [vmem:[%s11839_s4 + $0xa18] sm:$0xff] }
 0x41b   : > { %6953 = vmatpush1.bf16.msra.mxu1 %v7897_v10  ;;  %v7947_v10 = vcombine.low %v2891_v6, %v2895_v16  ;;  %v7953_v36 = vcombine.low %v2898_v56, %v2902_v63  ;;  %v2939_v58 = vld [vmem:[%s11839_s4 + $0xb58] sm:$0xff] }
 0x41c   : > { %7158 = vmatpush1.bf16.msra.mxu0 %v7899_v0  ;;  %6954 = vmatprep.subr.bf16.mxu1 %v7906_v11  ;;  %v7954_v0 = vcombine.high %v2898_v56, %v2902_v63  ;;  %v7956_v11 = vcombine.high %v2899_v39, %v2903_v44  ;;  %v2943_v6 = vld [vmem:[%s11839_s4 + $0xb78] sm:$0xff]  ;;  %v2950_v56 = vld [vmem:[%s11839_s4 + $0xbb0] sm:$0xff] }
 0x41d   : > { %7159 = vmatprep.subr.bf16.mxu0 %v7908_v1  ;;  %v2906_v1 = vld [vmem:[%s11839_s4 + $0xa50] sm:$0xff]  ;;  %v2947_v63 = vld [vmem:[%s11839_s4 + $0xb98] sm:$0xff] }
 0x41e   : > { %v7961_v25 = vcombine.low %v2906_v1, %v2910_v22 }
 0x41f   : > { %6955 = vmatpush1.bf16.msra.mxu1 %v7905_v28  ;;  %v7955_v28 = vcombine.low %v2899_v39, %v2903_v44  ;;  %v2951_v39 = vld [vmem:[%s11839_s4 + $0xbb8] sm:$0xff] }
 0x420   : > { %7160 = vmatpush1.bf16.msra.mxu0 %v7907_v50  ;;  %6956 = vmatprep.subr.bf16.mxu1 %v7914_v57  ;;  %v7962_v50 = vcombine.high %v2906_v1, %v2910_v22  ;;  %v7964_v57 = vcombine.high %v2907_v46, %v2911_v55  ;;  %v2958_v1 = vld [vmem:[%s11839_s4 + $0xbf0] sm:$0xff]  ;;  %v2955_v22 = vld [vmem:[%s11839_s4 + $0xbd8] sm:$0xff] }
 0x421   : > { %7161 = vmatprep.subr.bf16.mxu0 %v7916_v49  ;;  %v2914_v49 = vld [vmem:[%s11839_s4 + $0xa90] sm:$0xff] }
 0x422   : > { %v7969_v29 = vcombine.low %v2914_v49, %v2918_v47 }
 0x423   : > { %6957 = vmatpush1.bf16.msra.mxu1 %v7913_v37  ;;  %v7963_v37 = vcombine.low %v2907_v46, %v2911_v55  ;;  %v2959_v46 = vld [vmem:[%s11839_s4 + $0xbf8] sm:$0xff] }
 0x424   : > { %7162 = vmatpush1.bf16.msra.mxu0 %v7915_v43  ;;  %6958 = vmatprep.subr.bf16.mxu1 %v7922_v26  ;;  %v7970_v43 = vcombine.high %v2914_v49, %v2918_v47  ;;  %v7972_v26 = vcombine.high %v2915_v30, %v2919_v33  ;;  %v2966_v49 = vld [vmem:[%s11839_s4 + $0xc30] sm:$0xff]  ;;  %v2963_v47 = vld [vmem:[%s11839_s4 + $0xc18] sm:$0xff] }
 0x425   : > { %7163 = vmatprep.subr.bf16.mxu0 %v7924_v35  ;;  %v2922_v35 = vld [vmem:[%s11839_s4 + $0xad0] sm:$0xff] }
 0x426   : > { %v7977_v48 = vcombine.low %v2922_v35, %v2926_v41 }
 0x427   : > { %6959 = vmatpush1.bf16.msra.mxu1 %v7921_v59  ;;  %v7971_v59 = vcombine.low %v2915_v30, %v2919_v33  ;;  %v2967_v30 = vld [vmem:[%s11839_s4 + $0xc38] sm:$0xff] }
 0x428   : > { %7164 = vmatpush1.bf16.msra.mxu0 %v7923_v2  ;;  %6960 = vmatprep.subr.bf16.mxu1 %v7930_v5  ;;  %v7978_v2 = vcombine.high %v2922_v35, %v2926_v41  ;;  %v7980_v5 = vcombine.high %v2923_v40, %v2927_v7  ;;  %v2974_v35 = vld [vmem:[%s11839_s4 + $0xc70] sm:$0xff] }
 0x429   : > { %7165 = vmatprep.subr.bf16.mxu0 %v7932_v12  ;;  %v2930_v12 = vld [vmem:[%s11839_s4 + $0xb10] sm:$0xff] }
 0x42a   : > { %v7985_v16 = vcombine.low %v2930_v12, %v2934_v14 }
 0x42b   : > { %6961 = vmatpush1.bf16.msra.mxu1 %v7929_v38  ;;  %v7979_v38 = vcombine.low %v2923_v40, %v2927_v7  ;;  %v2971_v40 = vld [vmem:[%s11839_s4 + $0xc58] sm:$0xff] }
 0x42c   : > { %7166 = vmatpush1.bf16.msra.mxu0 %v7931_v19  ;;  %6962 = vmatprep.subr.bf16.mxu1 %v7938_v31  ;;  %v7986_v19 = vcombine.high %v2930_v12, %v2934_v14  ;;  %v7988_v31 = vcombine.high %v2931_v9, %v2935_v24  ;;  %v2975_v7 = vld [vmem:[%s11839_s4 + $0xc78] sm:$0xff] }
 0x42d   : > { %7167 = vmatprep.subr.bf16.mxu0 %v7940_v20  ;;  %v2938_v20 = vld [vmem:[%s11839_s4 + $0xb50] sm:$0xff]  ;;  %v8028_v12 = vcombine.high %v2971_v40, %v2975_v7  ;;  %v2979_v14 = vld [vmem:[%s11839_s4 + $0xc98] sm:$0xff] }
 0x42e   : > { %v7993_v44 = vcombine.low %v2938_v20, %v2942_v32 }
 0x42f   : > { %6963 = vmatpush1.bf16.msra.mxu1 %v7937_v18  ;;  %v7987_v18 = vcombine.low %v2931_v9, %v2935_v24  ;;  %v2983_v9 = vld [vmem:[%s11839_s4 + $0xcb8] sm:$0xff] }
 0x430   : > { %7168 = vmatpush1.bf16.msra.mxu0 %v7939_v4  ;;  %6964 = vmatprep.subr.bf16.mxu1 %v7946_v23  ;;  %v7994_v4 = vcombine.high %v2938_v20, %v2942_v32  ;;  %v7996_v23 = vcombine.high %v2939_v58, %v2943_v6  ;;  %v2990_v20 = vld [vmem:[%s11839_s4 + $0xcf0] sm:$0xff]  ;;  %v2991_v32 = vld [vmem:[%s11839_s4 + $0xcf8] sm:$0xff] }
 0x431   : > { %7169 = vmatprep.subr.bf16.mxu0 %v7948_v17  ;;  %v2946_v17 = vld [vmem:[%s11839_s4 + $0xb90] sm:$0xff] }
 0x432   : > { %v8001_v55 = vcombine.low %v2946_v17, %v2950_v56 }
 0x433   : > { %6965 = vmatpush1.bf16.msra.mxu1 %v7945_v27  ;;  %v7995_v27 = vcombine.low %v2939_v58, %v2943_v6  ;;  %v8035_v58 = vcombine.low %v2979_v14, %v2983_v9 }
 0x434   : > { %7170 = vmatpush1.bf16.msra.mxu0 %v7947_v10  ;;  %6966 = vmatprep.subr.bf16.mxu1 %v7954_v0  ;;  %v8002_v10 = vcombine.high %v2946_v17, %v2950_v56  ;;  %v8004_v0 = vcombine.high %v2947_v63, %v2951_v39  ;;  %v2999_v17 = vld [vmem:[%s11839_s4 + $0xd38] sm:$0xff] }
 0x435   : > { %7171 = vmatprep.subr.bf16.mxu0 %v7956_v11  ;;  %v2954_v11 = vld [vmem:[%s11839_s4 + $0xbd0] sm:$0xff] }
 0x436   : > { %v8009_v33 = vcombine.low %v2954_v11, %v2958_v1 }
 0x437   : > { %6967 = vmatpush1.bf16.msra.mxu1 %v7953_v36  ;;  %v8003_v36 = vcombine.low %v2947_v63, %v2951_v39 }
 0x438   : > { %7172 = vmatpush1.bf16.msra.mxu0 %v7955_v28  ;;  %6968 = vmatprep.subr.bf16.mxu1 %v7962_v50  ;;  %v8010_v28 = vcombine.high %v2954_v11, %v2958_v1  ;;  %v8012_v50 = vcombine.high %v2955_v22, %v2959_v46  ;;  %v3007_v11 = vld [vmem:[%s11839_s4 + $0xd78] sm:$0xff] }
 0x439   : > { %7173 = vmatprep.subr.bf16.mxu0 %v7964_v57  ;;  %v2962_v57 = vld [vmem:[%s11839_s4 + $0xc10] sm:$0xff] }
 0x43a   : > { %v8017_v41 = vcombine.low %v2962_v57, %v2966_v49 }
 0x43b   : > { %6969 = vmatpush1.bf16.msra.mxu1 %v7961_v25  ;;  %v8011_v25 = vcombine.low %v2955_v22, %v2959_v46  ;;  %v11465_v22 = vld [vmem:[%s11840_s5] sm:$0xff] }
 0x43c   : > { %7174 = vmatpush1.bf16.msra.mxu0 %v7963_v37  ;;  %6970 = vmatprep.subr.bf16.mxu1 %v7970_v43  ;;  %v8018_v37 = vcombine.high %v2962_v57, %v2966_v49  ;;  %v8020_v43 = vcombine.high %v2963_v47, %v2967_v30  ;;  %v6421_v57 = vrot.slane %v11465_v22, %v9438_v54  ;;  %v3011_v49 = vld [vmem:[%s11839_s4 + $0xd98] sm:$0xff] }
 0x43d   : > { %7175 = vmatprep.subr.bf16.mxu0 %v7972_v26  ;;  %v2970_v26 = vld [vmem:[%s11839_s4 + $0xc50] sm:$0xff]  ;;  %v6433_v54 = vrot.slane %v11465_v22, %v2530_v3  ;;  %v3019_v3 = vld [vmem:[%s11839_s4 + $0xdd8] sm:$0xff] }
 0x43e   : > { %v8025_v24 = vcombine.low %v2970_v26, %v2974_v35 }
 0x43f   : > { %6971 = vmatpush1.bf16.msra.mxu1 %v7969_v29  ;;  %v8019_v29 = vcombine.low %v2963_v47, %v2967_v30  ;;  %v3015_v47 = vld [vmem:[%s11839_s4 + $0xdb8] sm:$0xff]  ;;  %v6429_v30 = vrot.slane %v11465_v22, %v2526_v34 }
 0x440   : > { %7176 = vmatpush1.bf16.msra.mxu0 %v7971_v59  ;;  %6972 = vmatprep.subr.bf16.mxu1 %v7978_v2  ;;  %v8026_v59 = vcombine.high %v2970_v26, %v2974_v35  ;;  %v2978_v2 = vld [vmem:[%s11839_s4 + $0xc90] sm:$0xff]  ;;  %v8068_v35 = vcombine.high %v3011_v49, %v3015_v47 }
 0x441   : > { %7177 = vmatprep.subr.bf16.mxu0 %v7980_v5  ;;  %v2982_v5 = vld [vmem:[%s11839_s4 + $0xcb0] sm:$0xff] }
 0x443   : > { %6973 = vmatpush1.bf16.msra.mxu1 %v7977_v48  ;;  %v8027_v48 = vcombine.low %v2971_v40, %v2975_v7 }
 0x444   : > { %7178 = vmatpush1.bf16.msra.mxu0 %v7979_v38  ;;  %6974 = vmatprep.subr.bf16.mxu1 %v7986_v19  ;;  %v8034_v38 = vcombine.high %v2978_v2, %v2982_v5  ;;  %v8036_v19 = vcombine.high %v2979_v14, %v2983_v9 }
 0x445   : > { %7179 = vmatprep.subr.bf16.mxu0 %v7988_v31  ;;  %v2986_v31 = vld [vmem:[%s11839_s4 + $0xcd0] sm:$0xff] }
 0x446   : > { %v8042_v6 = vcombine.high %v2986_v31, %v2990_v20  ;;  %v8041_v56 = vcombine.low %v2986_v31, %v2990_v20 }
 0x447   : > { %6975 = vmatpush1.bf16.msra.mxu1 %v7985_v16 }
 0x448   : > { %7180 = vmatpush1.bf16.msra.mxu0 %v7987_v18  ;;  %6976 = vmatprep.subr.bf16.mxu1 %v7994_v4  ;;  %v2994_v18 = vld [vmem:[%s11839_s4 + $0xd10] sm:$0xff] }
 0x449   : > { %7181 = vmatprep.subr.bf16.mxu0 %v7996_v23  ;;  %v2998_v4 = vld [vmem:[%s11839_s4 + $0xd30] sm:$0xff]  ;;  %v2995_v23 = vld [vmem:[%s11839_s4 + $0xd18] sm:$0xff] }
 0x44a   : > { %v8050_v39 = vcombine.high %v2994_v18, %v2998_v4  ;;  %v8049_v1 = vcombine.low %v2994_v18, %v2998_v4  ;;  %v8051_v46 = vcombine.low %v2995_v23, %v2999_v17 }
 0x44b   : > { %6977 = vmatpush1.bf16.msra.mxu1 %v7993_v44  ;;  %v8052_v44 = vcombine.high %v2995_v23, %v2999_v17 }
 0x44c   : > { %7182 = vmatpush1.bf16.msra.mxu0 %v7995_v27  ;;  %6978 = vmatprep.subr.bf16.mxu1 %v8002_v10  ;;  %v3002_v27 = vld [vmem:[%s11839_s4 + $0xd50] sm:$0xff] }
 0x44d   : > { %7183 = vmatprep.subr.bf16.mxu0 %v8004_v0  ;;  %v3006_v10 = vld [vmem:[%s11839_s4 + $0xd70] sm:$0xff]  ;;  %v3003_v0 = vld [vmem:[%s11839_s4 + $0xd58] sm:$0xff] }
 0x44f   : > { %6979 = vmatpush1.bf16.msra.mxu1 %v8001_v55  ;;  %v8058_v55 = vcombine.high %v3002_v27, %v3006_v10 }
 0x450   : > { %7184 = vmatpush1.bf16.msra.mxu0 %v8003_v36  ;;  %6980 = vmatprep.subr.bf16.mxu1 %v8010_v28  ;;  %v8060_v36 = vcombine.high %v3003_v0, %v3007_v11  ;;  %v3010_v28 = vld [vmem:[%s11839_s4 + $0xd90] sm:$0xff] }
 0x451   : > { %7185 = vmatprep.subr.bf16.mxu0 %v8012_v50  ;;  %v3014_v50 = vld [vmem:[%s11839_s4 + $0xdb0] sm:$0xff] }
 0x452   : > { %v8065_v14 = vcombine.low %v3010_v28, %v3014_v50 }
 0x453   : > { %6981 = vmatpush1.bf16.msra.mxu1 %v8009_v33  ;;  %v6425_v33 = vrot.slane %v11465_v22, %v9955_v52  ;;  %v3022_v52 = vld [vmem:[%s11839_s4 + $0xdf0] sm:$0xff] }
 0x454   : > { %7186 = vmatpush1.bf16.msra.mxu0 %v8011_v25  ;;  %6991 = vmatprep.subr.bf16.mxu1 %v8018_v37  ;;  %v8057_v25 = vcombine.low %v3002_v27, %v3006_v10  ;;  %v8059_v37 = vcombine.low %v3003_v0, %v3007_v11  ;;  %v3035_v10 = vld [vmem:[%s11839_s4 + $0xe58] sm:$0xff] }
 0x455   : > { %7196 = vmatprep.subr.bf16.mxu0 %v8020_v43  ;;  %v8066_v43 = vcombine.high %v3010_v28, %v3014_v50  ;;  %v3039_v0 = vld [vmem:[%s11839_s4 + $0xe78] sm:$0xff]  ;;  %v3046_v28 = vld [vmem:[%s11839_s4 + $0xeb0] sm:$0xff] }
 0x456   : > { %6983 = vmatmul.mubr.bf16.vlgmr.msra.gmra.mrb[52].mxu1 %v10410_v42  ;;  %v3043_v50 = vld [vmem:[%s11839_s4 + $0xe98] sm:$0xff] }
 0x457   : > { %7188 = vmatmul.mubr.bf16.vlgmr.msra.gmra.mrb[56].mxu0 %v10410_v42  ;;  %6992 = vmatpush1.bf16.msra.mxu1 %v8017_v41  ;;  %v2987_v42 = vld [vmem:[%s11839_s4 + $0xcd8] sm:$0xff]  ;;  %v3018_v41 = vld [vmem:[%s11839_s4 + $0xdd0] sm:$0xff] }
 0x458   : > { %7023 = vmatprep.mubr.bf16.mxu1 %v10419_v21  ;;  %7197 = vmatpush1.bf16.msra.mxu0 %v8019_v29  ;;  %v8044_v16 = vcombine.high %v2987_v42, %v2991_v32  ;;  %v8043_v63 = vcombine.low %v2987_v42, %v2991_v32  ;;  %v3023_v29 = vld [vmem:[%s11839_s4 + $0xdf8] sm:$0xff]  ;;  %v3026_v32 = vld [vmem:[%s11839_s4 + $0xe10] sm:$0xff]  ;;  %v8073_v4 = vcombine.low %v3018_v41, %v3022_v52 }
 0x459   : > { %7228 = vmatprep.mubr.bf16.mxu0 %v10419_v21  ;;  %6993 = vmatprep.subr.bf16.mxu1 %v8026_v59  ;;  %v8033_v21 = vcombine.low %v2978_v2, %v2982_v5  ;;  %v8076_v42 = vcombine.high %v3019_v3, %v3023_v29  ;;  %v8075_v17 = vcombine.low %v3019_v3, %v3023_v29  ;;  %v3063_v3 = vld [vmem:[%s11839_s4 + $0xf38] sm:$0xff] }
 0x45a   : > { %7198 = vmatprep.subr.bf16.mxu0 %v8028_v12 }
 0x45b   : > { %6994 = vmatpush1.bf16.msra.mxu1 %v8025_v24 }
 0x45c   : > { %7199 = vmatpush1.bf16.msra.mxu0 %v8027_v48  ;;  %6995 = vmatprep.subr.bf16.mxu1 %v8034_v38  ;;  %v8067_v38 = vcombine.low %v3011_v49, %v3015_v47  ;;  %v8091_v47 = vcombine.low %v3035_v10, %v3039_v0 }
 0x45d   : > { %7200 = vmatprep.subr.bf16.mxu0 %v8036_v19  ;;  %v8074_v19 = vcombine.high %v3018_v41, %v3022_v52 }
 0x45f   : > { %6996 = vmatpush1.bf16.msra.mxu1 %v8033_v21  ;;  %v3030_v21 = vld [vmem:[%s11839_s4 + $0xe30] sm:$0xff] }
 0x460   : > { %7201 = vmatpush1.bf16.msra.mxu0 %v8035_v58  ;;  %6997 = vmatprep.subr.bf16.mxu1 %v8042_v6  ;;  %v3027_v6 = vld [vmem:[%s11839_s4 + $0xe18] sm:$0xff]  ;;  %v8081_v11 = vcombine.low %v3026_v32, %v3030_v21 }
 0x461   : > { %7202 = vmatprep.subr.bf16.mxu0 %v8044_v16  ;;  %v3031_v16 = vld [vmem:[%s11839_s4 + $0xe38] sm:$0xff] }
 0x463   : > { %6998 = vmatpush1.bf16.msra.mxu1 %v8041_v56  ;;  %v8082_v56 = vcombine.high %v3026_v32, %v3030_v21  ;;  %v3075_v32 = vld [vmem:[%s11839_s4 + $0xf98] sm:$0xff] }
 0x464   : > { %7203 = vmatpush1.bf16.msra.mxu0 %v8043_v63  ;;  %6999 = vmatprep.subr.bf16.mxu1 %v8050_v39  ;;  %v8084_v63 = vcombine.high %v3027_v6, %v3031_v16  ;;  %v3034_v39 = vld [vmem:[%s11839_s4 + $0xe50] sm:$0xff]  ;;  %v3079_v21 = vld [vmem:[%s11839_s4 + $0xfb8] sm:$0xff] }
 0x465   : > { %7204 = vmatprep.subr.bf16.mxu0 %v8052_v44  ;;  %v3038_v44 = vld [vmem:[%s11839_s4 + $0xe70] sm:$0xff] }
 0x466   : > { %v8089_v49 = vcombine.low %v3034_v39, %v3038_v44 }
 0x467   : > { %7000 = vmatpush1.bf16.msra.mxu1 %v8049_v1  ;;  %v8083_v1 = vcombine.low %v3027_v6, %v3031_v16 }
 0x468   : > { %7205 = vmatpush1.bf16.msra.mxu0 %v8051_v46  ;;  %7001 = vmatprep.subr.bf16.mxu1 %v8058_v55  ;;  %v8090_v46 = vcombine.high %v3034_v39, %v3038_v44  ;;  %v8092_v55 = vcombine.high %v3035_v10, %v3039_v0  ;;  %v3087_v39 = vld [vmem:[%s11839_s4 + $0xff8] sm:$0xff]  ;;  %v8131_v10 = vcombine.low %v3075_v32, %v3079_v21 }
 0x469   : > { %v6656_v26 = vpop.f32.mrb[48].mxu1  ;;  %7206 = vmatprep.subr.bf16.mxu0 %v8060_v36  ;;  %v3042_v36 = vld [vmem:[%s11839_s4 + $0xe90] sm:$0xff] }
 0x46a   : > { %v8272_v34 = vadd.f32 %v6656_v26, %v6421_v57  ;;  %v6861_v40 = vpop.f32.mrb[52].mxu0  ;;  %v6658_v7 = vpop.f32.mrb[49].mxu1  ;;  %v3047_v57 = vld [vmem:[%s11839_s4 + $0xeb8] sm:$0xff]  ;;  %v8097_v26 = vcombine.low %v3042_v36, %v3046_v28 }
 0x46b   : > { %v8274_v59 = vadd.f32 %v6861_v40, %v6429_v30  ;;  %v8273_v2 = vadd.f32 %v6658_v7, %v6425_v33  ;;  %v6863_v5 = vpop.f32.mrb[53].mxu0  ;;  %v6660_v12 = vpop.f32.mrb[50].mxu1  ;;  %7002 = vmatpush1.bf16.msra.mxu1 %v8057_v25  ;;  %v8098_v30 = vcombine.high %v3042_v36, %v3046_v28  ;;  %v8100_v33 = vcombine.high %v3043_v50, %v3047_v57  ;;  %v3050_v25 = vld [vmem:[%s11839_s4 + $0xed0] sm:$0xff]  ;;  %v3059_v7 = vld [vmem:[%s11839_s4 + $0xf18] sm:$0xff] }
 0x46c   : > { %v8275_v9 = vadd.f32 %v6863_v5, %v6433_v54  ;;  %v6865_v24 = vpop.f32.mrb[54].mxu0  ;;  %7207 = vmatpush1.bf16.msra.mxu0 %v8059_v37  ;;  %v6661_v48 = vpop.f32.mrb[51].mxu1  ;;  %7003 = vmatprep.subr.bf16.mxu1 %v8066_v43  ;;  %v3054_v54 = vld [vmem:[%s11839_s4 + $0xef0] sm:$0xff]  ;;  %v3051_v37 = vld [vmem:[%s11839_s4 + $0xed8] sm:$0xff]  ;;  %v8116_v5 = vcombine.high %v3059_v7, %v3063_v3 }
 0x46d   : > { %v7286_v31 = vcombine.low %v8272_v34, %v8273_v2  ;;  %v6866_v20 = vpop.f32.mrb[55].mxu0  ;;  %7208 = vmatprep.subr.bf16.mxu0 %v8068_v35  ;;  %v3055_v43 = vld [vmem:[%s11839_s4 + $0xef8] sm:$0xff]  ;;  %v8099_v35 = vcombine.low %v3043_v50, %v3047_v57  ;;  %v8106_v41 = vcombine.high %v3050_v25, %v3054_v54  ;;  %v3058_v34 = vld [vmem:[%s11839_s4 + $0xf10] sm:$0xff]  ;;  %v8105_v29 = vcombine.low %v3050_v25, %v3054_v54 }
 0x46e   : > { %v7287_v58 = vcombine.low %v8274_v59, %v8275_v9  ;;  %v8108_v52 = vcombine.high %v3051_v37, %v3055_v43  ;;  %v3062_v40 = vld [vmem:[%s11839_s4 + $0xf30] sm:$0xff]  ;;  %v8107_v59 = vcombine.low %v3051_v37, %v3055_v43  ;;  %v3067_v9 = vld [vmem:[%s11839_s4 + $0xf58] sm:$0xff] }
 0x46f   : > { %v11514_v18 = vrot.slane %v7286_v31, %v9426_v13  ;;  %7004 = vmatpush1.bf16.msra.mxu1 %v8065_v14  ;;  %v8114_v2 = vcombine.high %v3058_v34, %v3062_v40  ;;  %v3066_v12 = vld [vmem:[%s11839_s4 + $0xf50] sm:$0xff]  ;;  %v3071_v24 = vld [vmem:[%s11839_s4 + $0xf78] sm:$0xff]  ;;  %v8113_v48 = vcombine.low %v3058_v34, %v3062_v40 }
 0x470   : > { %v11517_v23 = vrot.slane %v7287_v58, %v9426_v13  ;;  %7209 = vmatpush1.bf16.msra.mxu0 %v8067_v38  ;;  %7005 = vmatprep.subr.bf16.mxu1 %v8074_v19  ;;  %v3070_v14 = vld [vmem:[%s11839_s4 + $0xf70] sm:$0xff]  ;;  %v8115_v38 = vcombine.low %v3059_v7, %v3063_v3  ;;  %v8124_v31 = vcombine.high %v3067_v9, %v3071_v24  ;;  %v3095_v36 = vld [vmem:[%s11839_s4 + $0x1038] sm:$0xff] }
 0x471   : > { %7210 = vmatprep.subr.bf16.mxu0 %v8076_v42  ;;  %v8122_v19 = vcombine.high %v3066_v12, %v3070_v14  ;;  %v3074_v20 = vld [vmem:[%s11839_s4 + $0xf90] sm:$0xff]  ;;  %v8121_v58 = vcombine.low %v3066_v12, %v3070_v14  ;;  %v8123_v6 = vcombine.low %v3067_v9, %v3071_v24  ;;  %v3099_v25 = vld [vmem:[%s11839_s4 + $0x1058] sm:$0xff] }
 0x472   : > { %v7318_v27 = vcombine.low %v11514_v18, %v11517_v23  ;;  %v3078_v42 = vld [vmem:[%s11839_s4 + $0xfb0] sm:$0xff]  ;;  %v3103_v54 = vld [vmem:[%s11839_s4 + $0x1078] sm:$0xff] }
 0x473   : > { %7006 = vmatpush1.bf16.msra.mxu1 %v8073_v4  ;;  %v8130_v16 = vcombine.high %v3074_v20, %v3078_v42  ;;  %v8132_v4 = vcombine.high %v3075_v32, %v3079_v21  ;;  %v8129_v44 = vcombine.low %v3074_v20, %v3078_v42  ;;  %v3111_v34 = vld [vmem:[%s11839_s4 + $0x10b8] sm:$0xff]  ;;  %v8155_v7 = vcombine.low %v3099_v25, %v3103_v54  ;;  %v3122_v24 = vld [vmem:[%s11839_s4 + $0x1110] sm:$0xff] }
 0x474   : > { %7211 = vmatpush1.bf16.msra.mxu0 %v8075_v17  ;;  %7007 = vmatprep.subr.bf16.mxu1 %v8082_v56  ;;  %v3082_v17 = vld [vmem:[%s11839_s4 + $0xfd0] sm:$0xff] }
 0x475   : > { %7212 = vmatprep.subr.bf16.mxu0 %v8084_v63  ;;  %v3086_v56 = vld [vmem:[%s11839_s4 + $0xff0] sm:$0xff]  ;;  %v3083_v63 = vld [vmem:[%s11839_s4 + $0xfd8] sm:$0xff] }
 0x476   : > { %v8138_v0 = vcombine.high %v3082_v17, %v3086_v56  ;;  %v8137_v28 = vcombine.low %v3082_v17, %v3086_v56  ;;  %v8139_v50 = vcombine.low %v3083_v63, %v3087_v39  ;;  %v3130_v21 = vld [vmem:[%s11839_s4 + $0x1150] sm:$0xff] }
 0x477   : > { %7008 = vmatpush1.bf16.msra.mxu1 %v8081_v11  ;;  %v8140_v11 = vcombine.high %v3083_v63, %v3087_v39  ;;  %v3138_v39 = vld [vmem:[%s11839_s4 + $0x1190] sm:$0xff] }
 0x478   : > { %7213 = vmatpush1.bf16.msra.mxu0 %v8083_v1  ;;  %7009 = vmatprep.subr.bf16.mxu1 %v8090_v46  ;;  %v3090_v1 = vld [vmem:[%s11839_s4 + $0x1010] sm:$0xff] }
 0x479   : > { %7214 = vmatprep.subr.bf16.mxu0 %v8092_v55  ;;  %v3094_v46 = vld [vmem:[%s11839_s4 + $0x1030] sm:$0xff]  ;;  %v3091_v55 = vld [vmem:[%s11839_s4 + $0x1018] sm:$0xff] }
 0x47a   : > { %v8146_v57 = vcombine.high %v3090_v1, %v3094_v46  ;;  %v8147_v37 = vcombine.low %v3091_v55, %v3095_v36 }
 0x47b   : > { %7010 = vmatpush1.bf16.msra.mxu1 %v8089_v49  ;;  %v8148_v49 = vcombine.high %v3091_v55, %v3095_v36  ;;  %v3146_v36 = vld [vmem:[%s11839_s4 + $0x11d0] sm:$0xff] }
 0x47c   : > { %7215 = vmatpush1.bf16.msra.mxu0 %v8091_v47  ;;  %7011 = vmatprep.subr.bf16.mxu1 %v8098_v30  ;;  %v3098_v47 = vld [vmem:[%s11839_s4 + $0x1050] sm:$0xff] }
 0x47d   : > { %7216 = vmatprep.subr.bf16.mxu0 %v8100_v33  ;;  %v3102_v30 = vld [vmem:[%s11839_s4 + $0x1070] sm:$0xff]  ;;  %v8145_v33 = vcombine.low %v3090_v1, %v3094_v46 }
 0x47e   : > { %v8154_v43 = vcombine.high %v3098_v47, %v3102_v30  ;;  %v8153_v40 = vcombine.low %v3098_v47, %v3102_v30 }
 0x47f   : > { %7012 = vmatpush1.bf16.msra.mxu1 %v8097_v26  ;;  %v3106_v26 = vld [vmem:[%s11839_s4 + $0x1090] sm:$0xff] }
 0x480   : > { %7217 = vmatpush1.bf16.msra.mxu0 %v8099_v35  ;;  %7013 = vmatprep.subr.bf16.mxu1 %v8106_v41  ;;  %v3110_v35 = vld [vmem:[%s11839_s4 + $0x10b0] sm:$0xff]  ;;  %v8156_v41 = vcombine.high %v3099_v25, %v3103_v54 }
 0x481   : > { %7218 = vmatprep.subr.bf16.mxu0 %v8108_v52  ;;  %v3107_v52 = vld [vmem:[%s11839_s4 + $0x1098] sm:$0xff]  ;;  %v8162_v3 = vcombine.high %v3106_v26, %v3110_v35  ;;  %v3154_v25 = vld [vmem:[%s11839_s4 + $0x1210] sm:$0xff] }
 0x482   : > { %v8163_v12 = vcombine.low %v3107_v52, %v3111_v34  ;;  %v3158_v54 = vld [vmem:[%s11839_s4 + $0x1230] sm:$0xff] }
 0x483   : > { %7014 = vmatpush1.bf16.msra.mxu1 %v8105_v29  ;;  %v8164_v29 = vcombine.high %v3107_v52, %v3111_v34  ;;  %v3162_v34 = vld [vmem:[%s11839_s4 + $0x1250] sm:$0xff] }
 0x484   : > { %7219 = vmatpush1.bf16.msra.mxu0 %v8107_v59  ;;  %7015 = vmatprep.subr.bf16.mxu1 %v8114_v2  ;;  %v3114_v59 = vld [vmem:[%s11839_s4 + $0x10d0] sm:$0xff] }
 0x485   : > { %7220 = vmatprep.subr.bf16.mxu0 %v8116_v5  ;;  %v3118_v2 = vld [vmem:[%s11839_s4 + $0x10f0] sm:$0xff]  ;;  %v3119_v5 = vld [vmem:[%s11839_s4 + $0x10f8] sm:$0xff] }
 0x486   : > { %v8170_v14 = vcombine.high %v3114_v59, %v3118_v2 }
 0x487   : > { %7016 = vmatpush1.bf16.msra.mxu1 %v8113_v48  ;;  %v3126_v48 = vld [vmem:[%s11839_s4 + $0x1130] sm:$0xff] }
 0x488   : > { %7221 = vmatpush1.bf16.msra.mxu0 %v8115_v38  ;;  %7017 = vmatprep.subr.bf16.mxu1 %v8122_v19  ;;  %v3123_v38 = vld [vmem:[%s11839_s4 + $0x1118] sm:$0xff]  ;;  %v8178_v42 = vcombine.high %v3122_v24, %v3126_v48 }
 0x489   : > { %7222 = vmatprep.subr.bf16.mxu0 %v8124_v31  ;;  %v3127_v19 = vld [vmem:[%s11839_s4 + $0x1138] sm:$0xff]  ;;  %v8169_v31 = vcombine.low %v3114_v59, %v3118_v2 }
 0x48a   : > { %v8180_v32 = vcombine.high %v3123_v38, %v3127_v19  ;;  %v8179_v17 = vcombine.low %v3123_v38, %v3127_v19  ;;  %v3178_v19 = vld [vmem:[%s11839_s4 + $0x12d0] sm:$0xff] }
 0x48b   : > { %7018 = vmatpush1.bf16.msra.mxu1 %v8121_v58  ;;  %v3134_v58 = vld [vmem:[%s11839_s4 + $0x1170] sm:$0xff] }
 0x48c   : > { %7223 = vmatpush1.bf16.msra.mxu0 %v8123_v6  ;;  %7019 = vmatprep.subr.bf16.mxu1 %v8130_v16  ;;  %v3131_v6 = vld [vmem:[%s11839_s4 + $0x1158] sm:$0xff]  ;;  %v8186_v56 = vcombine.high %v3130_v21, %v3134_v58 }
 0x48d   : > { %7224 = vmatprep.subr.bf16.mxu0 %v8132_v4  ;;  %v3135_v16 = vld [vmem:[%s11839_s4 + $0x1178] sm:$0xff]  ;;  %v8177_v4 = vcombine.low %v3122_v24, %v3126_v48 }
 0x48e   : > { %v8188_v63 = vcombine.high %v3131_v6, %v3135_v16  ;;  %v8187_v1 = vcombine.low %v3131_v6, %v3135_v16  ;;  %v3186_v16 = vld [vmem:[%s11839_s4 + $0x1310] sm:$0xff] }
 0x48f   : > { %7020 = vmatpush1.bf16.msra.mxu1 %v8129_v44  ;;  %v3142_v44 = vld [vmem:[%s11839_s4 + $0x11b0] sm:$0xff] }
 0x490   : > { %7225 = vmatpush1.bf16.msra.mxu0 %v8131_v10  ;;  %7021 = vmatprep.subr.bf16.mxu1 %v8138_v0  ;;  %v3139_v10 = vld [vmem:[%s11839_s4 + $0x1198] sm:$0xff]  ;;  %v8194_v46 = vcombine.high %v3138_v39, %v3142_v44 }
 0x491   : > { %7226 = vmatprep.subr.bf16.mxu0 %v8140_v11  ;;  %v3143_v0 = vld [vmem:[%s11839_s4 + $0x11b8] sm:$0xff]  ;;  %v8185_v11 = vcombine.low %v3130_v21, %v3134_v58 }
 0x492   : > { %v8196_v55 = vcombine.high %v3139_v10, %v3143_v0  ;;  %v8195_v47 = vcombine.low %v3139_v10, %v3143_v0  ;;  %v3194_v0 = vld [vmem:[%s11839_s4 + $0x1350] sm:$0xff] }
 0x493   : > { %7022 = vmatpush1.bf16.msra.mxu1 %v8137_v28  ;;  %v3150_v28 = vld [vmem:[%s11839_s4 + $0x11f0] sm:$0xff] }
 0x494   : > { %7227 = vmatpush1.bf16.msra.mxu0 %v8139_v50  ;;  %7032 = vmatprep.subr.bf16.mxu1 %v8146_v57  ;;  %v3147_v50 = vld [vmem:[%s11839_s4 + $0x11d8] sm:$0xff]  ;;  %v8202_v30 = vcombine.high %v3146_v36, %v3150_v28 }
 0x495   : > { %7237 = vmatprep.subr.bf16.mxu0 %v8148_v49  ;;  %v3151_v57 = vld [vmem:[%s11839_s4 + $0x11f8] sm:$0xff]  ;;  %v8193_v49 = vcombine.low %v3138_v39, %v3142_v44 }
 0x496   : > { %7024 = vmatmul.mubr.bf16.vlgmr.msra.gmra.mrb[52].mxu1 %v10618_v45 }
 0x497   : > { %7229 = vmatmul.mubr.bf16.vlgmr.msra.gmra.mrb[56].mxu0 %v10618_v45  ;;  %7033 = vmatpush1.bf16.msra.mxu1 %v8145_v33  ;;  %v3115_v45 = vld [vmem:[%s11839_s4 + $0x10d8] sm:$0xff]  ;;  %v8204_v33 = vcombine.high %v3147_v50, %v3151_v57 }
 0x498   : > { %7064 = vmatprep.mubr.bf16.mxu1 %v10627_v62  ;;  %7238 = vmatpush1.bf16.msra.mxu0 %v8147_v37  ;;  %v8172_v9 = vcombine.high %v3115_v45, %v3119_v5  ;;  %v8171_v20 = vcombine.low %v3115_v45, %v3119_v5  ;;  %v3155_v37 = vld [vmem:[%s11839_s4 + $0x1218] sm:$0xff]  ;;  %v3170_v5 = vld [vmem:[%s11839_s4 + $0x1290] sm:$0xff] }
 0x499   : > { %7269 = vmatprep.mubr.bf16.mxu0 %v10627_v62  ;;  %7034 = vmatprep.subr.bf16.mxu1 %v8154_v43  ;;  %v8161_v62 = vcombine.low %v3106_v26, %v3110_v35  ;;  %v3159_v43 = vld [vmem:[%s11839_s4 + $0x1238] sm:$0xff]  ;;  %v8201_v26 = vcombine.low %v3146_v36, %v3150_v28  ;;  %v8203_v35 = vcombine.low %v3147_v50, %v3151_v57  ;;  %v3202_v57 = vld [vmem:[%s11839_s4 + $0x1390] sm:$0xff] }
 0x49a   : > { %7239 = vmatprep.subr.bf16.mxu0 %v8156_v41  ;;  %v8210_v41 = vcombine.high %v3154_v25, %v3158_v54  ;;  %v8212_v52 = vcombine.high %v3155_v37, %v3159_v43  ;;  %v8211_v59 = vcombine.low %v3155_v37, %v3159_v43  ;;  %v3210_v43 = vld [vmem:[%s11839_s4 + $0x13d0] sm:$0xff] }
 0x49b   : > { %7035 = vmatpush1.bf16.msra.mxu1 %v8153_v40  ;;  %v3166_v40 = vld [vmem:[%s11839_s4 + $0x1270] sm:$0xff] }
 0x49c   : > { %7240 = vmatpush1.bf16.msra.mxu0 %v8155_v7  ;;  %7036 = vmatprep.subr.bf16.mxu1 %v8162_v3  ;;  %v3163_v7 = vld [vmem:[%s11839_s4 + $0x1258] sm:$0xff]  ;;  %v8218_v2 = vcombine.high %v3162_v34, %v3166_v40 }
 0x49d   : > { %7241 = vmatprep.subr.bf16.mxu0 %v8164_v29  ;;  %v3167_v3 = vld [vmem:[%s11839_s4 + $0x1278] sm:$0xff]  ;;  %v8209_v29 = vcombine.low %v3154_v25, %v3158_v54 }
 0x49e   : > { %v8220_v45 = vcombine.high %v3163_v7, %v3167_v3  ;;  %v8219_v24 = vcombine.low %v3163_v7, %v3167_v3 }
 0x49f   : > { %7037 = vmatpush1.bf16.msra.mxu1 %v8161_v62  ;;  %v3174_v62 = vld [vmem:[%s11839_s4 + $0x12b0] sm:$0xff] }
 0x4a0   : > { %7242 = vmatpush1.bf16.msra.mxu0 %v8163_v12  ;;  %7038 = vmatprep.subr.bf16.mxu1 %v8170_v14  ;;  %v3171_v12 = vld [vmem:[%s11839_s4 + $0x1298] sm:$0xff]  ;;  %v8226_v48 = vcombine.high %v3170_v5, %v3174_v62 }
 0x4a1   : > { %7243 = vmatprep.subr.bf16.mxu0 %v8172_v9  ;;  %v3175_v14 = vld [vmem:[%s11839_s4 + $0x12b8] sm:$0xff]  ;;  %v8217_v9 = vcombine.low %v3162_v34, %v3166_v40 }
 0x4a2   : > { %v8228_v38 = vcombine.high %v3171_v12, %v3175_v14  ;;  %v8227_v21 = vcombine.low %v3171_v12, %v3175_v14 }
 0x4a3   : > { %7039 = vmatpush1.bf16.msra.mxu1 %v8169_v31  ;;  %v3182_v31 = vld [vmem:[%s11839_s4 + $0x12f0] sm:$0xff] }
 0x4a4   : > { %7244 = vmatpush1.bf16.msra.mxu0 %v8171_v20  ;;  %7040 = vmatprep.subr.bf16.mxu1 %v8178_v42  ;;  %v3179_v20 = vld [vmem:[%s11839_s4 + $0x12d8] sm:$0xff]  ;;  %v8234_v58 = vcombine.high %v3178_v19, %v3182_v31 }
 0x4a5   : > { %7245 = vmatprep.subr.bf16.mxu0 %v8180_v32  ;;  %v3183_v42 = vld [vmem:[%s11839_s4 + $0x12f8] sm:$0xff]  ;;  %v8225_v32 = vcombine.low %v3170_v5, %v3174_v62  ;;  %v6449_v5 = vrot.slane %v11465_v22, %v2546_v61 }
 0x4a6   : > { %v8236_v6 = vcombine.high %v3179_v20, %v3183_v42  ;;  %v8235_v39 = vcombine.low %v3179_v20, %v3183_v42 }
 0x4a7   : > { %7041 = vmatpush1.bf16.msra.mxu1 %v8177_v4  ;;  %v3190_v4 = vld [vmem:[%s11839_s4 + $0x1330] sm:$0xff] }
 0x4a8   : > { %7246 = vmatpush1.bf16.msra.mxu0 %v8179_v17  ;;  %7042 = vmatprep.subr.bf16.mxu1 %v8186_v56  ;;  %v3187_v17 = vld [vmem:[%s11839_s4 + $0x1318] sm:$0xff]  ;;  %v8242_v44 = vcombine.high %v3186_v16, %v3190_v4 }
 0x4a9   : > { %7247 = vmatprep.subr.bf16.mxu0 %v8188_v63  ;;  %v3191_v56 = vld [vmem:[%s11839_s4 + $0x1338] sm:$0xff]  ;;  %v8233_v63 = vcombine.low %v3178_v19, %v3182_v31 }
 0x4aa   : > { %v8244_v10 = vcombine.high %v3187_v17, %v3191_v56  ;;  %v8243_v36 = vcombine.low %v3187_v17, %v3191_v56 }
 0x4ab   : > { %7043 = vmatpush1.bf16.msra.mxu1 %v8185_v11  ;;  %v3198_v11 = vld [vmem:[%s11839_s4 + $0x1370] sm:$0xff] }
 0x4ac   : > { %7248 = vmatpush1.bf16.msra.mxu0 %v8187_v1  ;;  %7044 = vmatprep.subr.bf16.mxu1 %v8194_v46  ;;  %v3195_v1 = vld [vmem:[%s11839_s4 + $0x1358] sm:$0xff]  ;;  %v8250_v28 = vcombine.high %v3194_v0, %v3198_v11 }
 0x4ad   : > { %7249 = vmatprep.subr.bf16.mxu0 %v8196_v55  ;;  %v3199_v46 = vld [vmem:[%s11839_s4 + $0x1378] sm:$0xff]  ;;  %v8241_v55 = vcombine.low %v3186_v16, %v3190_v4 }
 0x4ae   : > { %v8252_v50 = vcombine.high %v3195_v1, %v3199_v46  ;;  %v8251_v25 = vcombine.low %v3195_v1, %v3199_v46 }
 0x4af   : > { %7045 = vmatpush1.bf16.msra.mxu1 %v8193_v49  ;;  %v3206_v49 = vld [vmem:[%s11839_s4 + $0x13b0] sm:$0xff] }
 0x4b0   : > { %7250 = vmatpush1.bf16.msra.mxu0 %v8195_v47  ;;  %7046 = vmatprep.subr.bf16.mxu1 %v8202_v30  ;;  %v3203_v47 = vld [vmem:[%s11839_s4 + $0x1398] sm:$0xff]  ;;  %v8258_v54 = vcombine.high %v3202_v57, %v3206_v49 }
 0x4b1   : > { %7251 = vmatprep.subr.bf16.mxu0 %v8204_v33  ;;  %v3207_v30 = vld [vmem:[%s11839_s4 + $0x13b8] sm:$0xff]  ;;  %v8249_v33 = vcombine.low %v3194_v0, %v3198_v11 }
 0x4b2   : > { %v8260_v37 = vcombine.high %v3203_v47, %v3207_v30  ;;  %v8259_v34 = vcombine.low %v3203_v47, %v3207_v30 }
 0x4b3   : > { %7047 = vmatpush1.bf16.msra.mxu1 %v8201_v26  ;;  %v3214_v26 = vld [vmem:[%s11839_s4 + $0x13f0] sm:$0xff] }
 0x4b4   : > { %7252 = vmatpush1.bf16.msra.mxu0 %v8203_v35  ;;  %7048 = vmatprep.subr.bf16.mxu1 %v8210_v41  ;;  %v3211_v35 = vld [vmem:[%s11839_s4 + $0x13d8] sm:$0xff]  ;;  %v8266_v40 = vcombine.high %v3210_v43, %v3214_v26  ;;  %v8265_v3 = vcombine.low %v3210_v43, %v3214_v26 }
 0x4b5   : > { %7253 = vmatprep.subr.bf16.mxu0 %v8212_v52  ;;  %v3215_v41 = vld [vmem:[%s11839_s4 + $0x13f8] sm:$0xff]  ;;  %v8257_v52 = vcombine.low %v3202_v57, %v3206_v49 }
 0x4b6   : > { %v8268_v7 = vcombine.high %v3211_v35, %v3215_v41 }
 0x4b7   : > { %7049 = vmatpush1.bf16.msra.mxu1 %v8209_v29  ;;  %v8267_v29 = vcombine.low %v3211_v35, %v3215_v41 }
 0x4b8   : > { %7254 = vmatpush1.bf16.msra.mxu0 %v8211_v59  ;;  %7050 = vmatprep.subr.bf16.mxu1 %v8218_v2  ;;  %v6437_v59 = vrot.slane %v11465_v22, %v2534_v51  ;;  %v6445_v2 = vrot.slane %v11465_v22, %v2542_v60 }
 0x4b9   : > { %7255 = vmatprep.subr.bf16.mxu0 %v8220_v45  ;;  %v6441_v45 = vrot.slane %v11465_v22, %v2538_v15  ;;  %v7326_v22 = vrot.slane %v7318_v27, %v9426_v13 }
 0x4bb   : > { %7051 = vmatpush1.bf16.msra.mxu1 %v8217_v9 }
 0x4bc   : > { %7256 = vmatpush1.bf16.msra.mxu0 %v8219_v24  ;;  %7052 = vmatprep.subr.bf16.mxu1 %v8226_v48 }
 0x4bd   : > { %7257 = vmatprep.subr.bf16.mxu0 %v8228_v38 }
 0x4bf   : > { %7053 = vmatpush1.bf16.msra.mxu1 %v8225_v32 }
 0x4c0   : > { %7258 = vmatpush1.bf16.msra.mxu0 %v8227_v21  ;;  %7054 = vmatprep.subr.bf16.mxu1 %v8234_v58 }
 0x4c1   : > { %7259 = vmatprep.subr.bf16.mxu0 %v8236_v6 }
 0x4c3   : > { %7055 = vmatpush1.bf16.msra.mxu1 %v8233_v63 }
 0x4c4   : > { %7260 = vmatpush1.bf16.msra.mxu0 %v8235_v39  ;;  %7056 = vmatprep.subr.bf16.mxu1 %v8242_v44 }
 0x4c5   : > { %7261 = vmatprep.subr.bf16.mxu0 %v8244_v10 }
 0x4c7   : > { %7057 = vmatpush1.bf16.msra.mxu1 %v8241_v55 }
 0x4c8   : > { %7262 = vmatpush1.bf16.msra.mxu0 %v8243_v36  ;;  %7058 = vmatprep.subr.bf16.mxu1 %v8250_v28 }
 0x4c9   : > { %7263 = vmatprep.subr.bf16.mxu0 %v8252_v50 }
 0x4cb   : > { %7059 = vmatpush1.bf16.msra.mxu1 %v8249_v33 }
 0x4cc   : > { %7264 = vmatpush1.bf16.msra.mxu0 %v8251_v25  ;;  %7060 = vmatprep.subr.bf16.mxu1 %v8258_v54 }
 0x4cd   : > { %7265 = vmatprep.subr.bf16.mxu0 %v8260_v37 }
 0x4cf   : > { %7061 = vmatpush1.bf16.msra.mxu1 %v8257_v52 }
 0x4d0   : > { %7266 = vmatpush1.bf16.msra.mxu0 %v8259_v34  ;;  %7062 = vmatprep.subr.bf16.mxu1 %v8266_v40 }
 0x4d1   : > { %7267 = vmatprep.subr.bf16.mxu0 %v8268_v7 }
 0x4d3   : > { %7063 = vmatpush1.bf16.msra.mxu1 %v8265_v3 }
 0x4d4   : > { %7268 = vmatpush1.bf16.msra.mxu0 %v8267_v29 }
 0x4d6   : > { %7065 = vmatmul.mubr.bf16.vlgmr.msra.gmra.mrb[52].mxu1 %v10820_v53 }
 0x4d7   : > { %7270 = vmatmul.mubr.bf16.vlgmr.msra.gmra.mrb[56].mxu0 %v10820_v53 }
 0x5a9   : > { %v7066_v62 = vpop.f32.mrb[52].mxu1 }
 0x5aa   : > { %v8276_v12 = vadd.f32 %v7066_v62, %v6437_v59  ;;  %v7271_v53 = vpop.f32.mrb[56].mxu0  ;;  %v7068_v14 = vpop.f32.mrb[53].mxu1 }
 0x5ab   : > { %v8278_v9 = vadd.f32 %v7271_v53, %v6445_v2  ;;  %v8277_v24 = vadd.f32 %v7068_v14, %v6441_v45  ;;  %v7273_v51 = vpop.f32.mrb[57].mxu0  ;;  %v7070_v48 = vpop.f32.mrb[54].mxu1 }
 0x5ac   : > { %v8279_v38 = vadd.f32 %v7273_v51, %v6449_v5  ;;  %v7275_v19 = vpop.f32.mrb[58].mxu0  ;;  %v7071_v60 = vpop.f32.mrb[55].mxu1 }
 0x5ad   : > { %v7288_v31 = vcombine.low %v8276_v12, %v8277_v24  ;;  %v7276_v20 = vpop.f32.mrb[59].mxu0 }
 0x5ae   : > { %v7289_v42 = vcombine.low %v8278_v9, %v8279_v38 }
 0x5af   : > { %v7310_v15 = vrot.slane %v7288_v31, %v9426_v13 }
 0x5b0   : > { %v7317_v8 = vrot.slane %v7289_v42, %v9426_v13 }
 0x5b2   : > { %v7319_v61 = vcombine.low %v7310_v15, %v7317_v8 }
 0x5b4   : > { %v7333_v32 = vrot.slane %v7319_v61, %v9426_v13 }
 0x5b6   : > { %v7334_v21 = vcombine.low %v7326_v22, %v7333_v32 }
 0x5b8   : > { %7336 = vst [vmem:[%s280_s20] sm:$0xff] %v7334_v21 }
 0x5b9 PF: > { %s16_s23 = sadd.s32 1, %s8806_s23   ;;  %s11844_s21 = smov %s8802_s22 }
 0x5ba   : > { %p13_p5 = scmp.ge.s32.totalorder %s16_s23, 4   ;;  %s11845_s22 = smov %s11847_s24 }
 0x5bc   :  { %15 = sbr.rel (!%p13_p5) target bundleno = 2 (0x2), region = 82 }

</bundles_post_ra>
